<compile_context>
chip_gen: v7x
topology: tpu7x:2x2x1
jax: 0.10.0
libtpu: 0.0.40
codegen_flags: <defaults>
</compile_context>

<pallas_src>
import functools

import jax
import jax.numpy as jnp
import numpy as np
from jax.experimental import pallas as pl
from jax.experimental.pallas import tpu as pltpu

EPS = 1e-5
LANE = 128


def _vmem_limit_bytes():
    cap = 128 * 1024 * 1024
    try:
        info = pltpu.get_tpu_info()
        cap = int(getattr(info, "vmem_capacity_bytes", cap))
    except Exception:
        pass
    # 3/4 of physical VMEM, capped at 96 MiB: 96 MiB on v5e/v6e, 48 MiB on v7x.
    return int(min(3 * cap // 4, 96 * 1024 * 1024))


_VMEM_LIMIT_BYTES = _vmem_limit_bytes()


# ----------------------------------------------------------------------------
# Pallas kernels
# ----------------------------------------------------------------------------
def _write_stats(st_ref, y):
    """Per-image partial BN stats; sublane-dense (8, C): row0=sum, row1=sum_sq."""
    c = y.shape[-1]
    s = jnp.sum(y, axis=0, keepdims=True)
    ss = jnp.sum(y * y, axis=0, keepdims=True)
    st_ref[0] = jnp.concatenate([s, ss, jnp.zeros((6, c), jnp.float32)], axis=0)


def _conv3x3_fused(xp_ref, w_ref, acc_ref, Ho, Wo, stride):
    """3x3 conv as 3 matmuls of K=3*Cin (dw taps concatenated on the lane axis).

    Accumulates into a VMEM f32 scratch ref so the accumulator live range
    stays bounded regardless of the feature-map size.
    """
    mi = Ho * Wo
    for dh in range(3):
        taps = []
        for dw in range(3):
            p = (dh % stride) * stride + (dw % stride)
            r0, c0 = dh // stride, dw // stride
            taps.append(xp_ref[p, 0, r0:r0 + Ho, c0:c0 + Wo, :])
        lhs = jnp.concatenate(taps, axis=-1).reshape(mi, -1)        # (Mi, 3*Cin)
        part = jnp.dot(lhs, w_ref[dh], preferred_element_type=jnp.float32)
        if dh == 0:
            acc_ref[...] = part
        else:
            acc_ref[...] += part


def stage1_kernel(xp_ref, w1_ref, y1_ref, st1_ref, acc_ref, *, Ho, Wo, stride):
    """conv1 (pre-BN, bf16 out) + partial BN stats, one image per grid step."""
    _conv3x3_fused(xp_ref, w1_ref, acc_ref, Ho, Wo, stride)
    acc = acc_ref[...]
    y1_ref[0] = acc.astype(y1_ref.dtype)
    _write_stats(st1_ref, acc)


def stage1_proj_kernel(xp_ref, w1_ref, wsc_ref, y1_ref, st1_ref,
                       ysc_ref, stsc_ref, acc_ref, *, Ho, Wo, stride):
    """conv1 + projection-shortcut 1x1 conv (both pre-BN) + partial stats."""
    _conv3x3_fused(xp_ref, w1_ref, acc_ref, Ho, Wo, stride)
    acc = acc_ref[...]
    y1_ref[0] = acc.astype(y1_ref.dtype)
    _write_stats(st1_ref, acc)
    # The 1x1 stride-s shortcut conv reads exactly the centre-tap slab.
    mi = Ho * Wo
    p = (1 % stride) * stride + (1 % stride)
    o = 1 // stride
    sc = xp_ref[p, 0, o:o + Ho, o:o + Wo, :]
    acc_sc = jnp.dot(sc.reshape(mi, sc.shape[-1]), wsc_ref[...],
                     preferred_element_type=jnp.float32)
    ysc_ref[0] = acc_sc.astype(ysc_ref.dtype)
    _write_stats(stsc_ref, acc_sc)


def _bn_apply(y, p):
    """p rows: [mean, inv_std, gamma, beta]; all f32."""
    return (y - p[0:1, :]) * p[1:2, :] * p[2:3, :] + p[3:4, :]


def stage2_kernel(y1_ref, bn1_ref, w2_ref, y2_ref, st2_ref, pad_ref, acc_ref,
                  *, Ho, Wo):
    """bn1 + relu (fused epilogue) -> conv2 (pre-BN, bf16 out) + partial stats."""
    mi = Ho * Wo
    cpad = acc_ref.shape[-1]
    act = jnp.maximum(_bn_apply(y1_ref[0].astype(jnp.float32), bn1_ref[...]), 0.0)
    # Zero only the 1-pixel halo ring; the interior is fully overwritten below.
    # (A one-time @pl.when(pid==0) full fill is not megacore-safe: each core
    #  has its own scratch and may never execute program_id 0.)
    zrow = jnp.zeros((1, Wo + 2, cpad), pad_ref.dtype)
    zcol = jnp.zeros((Ho, 1, cpad), pad_ref.dtype)
    pad_ref[0:1] = zrow
    pad_ref[Ho + 1:Ho + 2] = zrow
    pad_ref[1:Ho + 1, 0:1, :] = zcol
    pad_ref[1:Ho + 1, Wo + 1:Wo + 2, :] = zcol
    pad_ref[1:Ho + 1, 1:Wo + 1, :] = act.reshape(Ho, Wo, cpad).astype(pad_ref.dtype)
    # 3 matmuls with K = 3*Cpad (dw taps concatenated on the lane axis).
    for dh in range(3):
        lhs = jnp.concatenate(
            [pad_ref[dh:dh + Ho, dw:dw + Wo, :] for dw in range(3)],
            axis=-1).reshape(mi, 3 * cpad)
        part = jnp.dot(lhs, w2_ref[dh], preferred_element_type=jnp.float32)
        if dh == 0:
            acc_ref[...] = part
        else:
            acc_ref[...] += part
    acc = acc_ref[...]
    y2_ref[0] = acc.astype(y2_ref.dtype)
    _write_stats(st2_ref, acc)


def stage3_id_kernel(xp_ref, y2_ref, bn2_ref, out_ref, *, Ho, Wo):
    """out = relu( bn2(y2) + identity_shortcut ) — shortcut sliced from phases."""
    mi = Ho * Wo
    sc = xp_ref[0, 0, 1:1 + Ho, 1:1 + Wo, :].astype(jnp.float32)
    out = _bn_apply(y2_ref[0].astype(jnp.float32), bn2_ref[...]) \
        + sc.reshape(mi, sc.shape[-1])
    out_ref[0] = jnp.maximum(out, 0.0)


def stage3_proj_kernel(y2_ref, ysc_ref, bn2_ref, bnsc_ref, out_ref):
    """out = relu( bn2(y2) + bn_sc(y_sc) )."""
    out = _bn_apply(y2_ref[0].astype(jnp.float32), bn2_ref[...]) \
        + _bn_apply(ysc_ref[0].astype(jnp.float32), bnsc_ref[...])
    out_ref[0] = jnp.maximum(out, 0.0)


# ----------------------------------------------------------------------------
# pallas_call helpers
# ----------------------------------------------------------------------------
def _cost(flops, *operands):
    nbytes = sum(int(np.prod(o.shape)) * np.dtype(o.dtype).itemsize
                 for o in operands)
    return pl.CostEstimate(flops=int(flops), transcendentals=0,
                           bytes_accessed=int(nbytes))


def _pcall(kernel, grid, in_specs, out_specs, out_shape, *,
           scratch_shapes=(), cost=None):
    return pl.pallas_call(
        kernel,
        out_shape=out_shape,
        grid_spec=pltpu.PrefetchScalarGridSpec(
            num_scalar_prefetch=0,
            grid=grid,
            in_specs=list(in_specs),
            out_specs=out_specs,
            scratch_shapes=list(scratch_shapes),
        ),
        compiler_params=pltpu.CompilerParams(
            dimension_semantics=("parallel",) * len(grid),
            vmem_limit_bytes=_VMEM_LIMIT_BYTES,
        ),
        cost_estimate=cost,
    )


# ----------------------------------------------------------------------------
# JAX glue: layout prep, BN stats finalization, BasicBlock wrapper
# ----------------------------------------------------------------------------
def _round_up(v, m):
    return (v + m - 1) // m * m


def _pad_last(x, c):
    pad = c - x.shape[-1]
    if pad == 0:
        return x
    return jnp.pad(x, [(0, 0)] * (x.ndim - 1) + [(0, pad)])


def _prep_w3x3(w_oihw, cin_pad, cout_pad):
    """(Cout, Cin, 3, 3) -> (3, 3*cin_pad, cout_pad) bf16 (dh-major, dw fused)."""
    cout, cin = w_oihw.shape[0], w_oihw.shape[1]
    w = jnp.transpose(w_oihw, (2, 3, 1, 0))                       # (3,3,Cin,Cout)
    w = jnp.pad(w, ((0, 0), (0, 0), (0, cin_pad - cin), (0, cout_pad - cout)))
    return w.reshape(3, 3 * cin_pad, cout_pad).astype(jnp.bfloat16)


def _prep_w1x1(w_oihw, cin_pad, cout_pad):
    """(Cout, Cin, 1, 1) -> (cin_pad, cout_pad) bf16."""
    cout, cin = w_oihw.shape[0], w_oihw.shape[1]
    w = jnp.transpose(w_oihw, (2, 3, 1, 0)).reshape(cin, cout)
    w = jnp.pad(w, ((0, cin_pad - cin), (0, cout_pad - cout)))
    return w.astype(jnp.bfloat16)


def _make_phases(x_nhwc, stride, Ho, Wo, cin_pad):
    """Phase-split, conv-padded, lane-dense input: (stride**2, N, Hn, Wn, cin_pad) bf16."""
    N, H, W, C = x_nhwc.shape
    hn = Ho + (2 // stride)                    # phase extent incl. halo
    wn = Wo + (2 // stride)
    ph = stride * hn - H - 1                   # bottom pad (top pad is 1)
    pw = stride * wn - W - 1
    assert ph >= 0 and pw >= 0, "phase halo would be truncated"
    xp = jnp.pad(x_nhwc, ((0, 0), (1, ph), (1, pw), (0, cin_pad - C)))
    phases = [xp[:, a::stride, b::stride, :]
              for a in range(stride) for b in range(stride)]
    return jnp.stack(phases, axis=0).astype(jnp.bfloat16)


def _bn_params(stats, gamma, beta, m_total, cpad):
    """Reduce per-image (sum, sum_sq) -> packed (mean, inv_std, gamma, beta)."""
    s = jnp.sum(stats[:, 0, :], axis=0)                           # (Cpad,)
    ss = jnp.sum(stats[:, 1, :], axis=0)
    mean = s / m_total
    var = jnp.maximum(ss / m_total - mean * mean, 0.0)            # biased, like BN2d
    inv_std = jax.lax.rsqrt(var + EPS)
    return jnp.stack([mean, inv_std, _pad_last(gamma, cpad),
                      _pad_last(beta, cpad)], axis=0).astype(jnp.float32)


@functools.partial(jax.jit, static_argnames=("stride",))
def basic_block_pallas(x_nchw, params, stride):
    """BasicBlock.forward; NCHW f32 in/out (PyTorch layout), batch-stats BN."""
    assert stride in (1, 2), "ResNet BasicBlock uses stride 1 or 2"
    x = jnp.transpose(x_nchw, (0, 2, 3, 1)).astype(jnp.float32)   # -> NHWC
    N, H, W, Cin = x.shape
    Cout = params["w1"].shape[0]
    Cpad = _round_up(Cout, LANE)                                  # lane-dense out
    Cinp = _round_up(Cin, LANE)                                   # lane-dense in
    Ho = (H + 2 - 3) // stride + 1
    Wo = (W + 2 - 3) // stride + 1
    Mi, Mtot = Ho * Wo, N * Ho * Wo
    proj = (stride != 1) or (Cin != Cout)
    P = stride * stride

    phases = _make_phases(x, stride, Ho, Wo, Cinp)    # (P, N, Hn, Wn, Cinp) bf16
    _, _, Hn, Wn, _ = phases.shape
    w1 = _prep_w3x3(params["w1"], Cinp, Cpad)         # (3, 3*Cinp, Cpad) bf16
    w2 = _prep_w3x3(params["w2"], Cpad, Cpad)         # (3, 3*Cpad, Cpad) bf16

    xp_spec = pl.BlockSpec((P, 1, Hn, Wn, Cinp), lambda n: (0, n, 0, 0, 0))
    act_spec = pl.BlockSpec((1, Mi, Cpad), lambda n: (n, 0, 0))
    st_spec = pl.BlockSpec((1, 8, Cpad), lambda n: (n, 0, 0))

    def full_spec(a):
        nd = a.ndim
        return pl.BlockSpec(tuple(a.shape), lambda n, _nd=nd: (0,) * _nd)

    y_bf = jax.ShapeDtypeStruct((N, Mi, Cpad), jnp.bfloat16)      # bf16 intermediates
    y_f32 = jax.ShapeDtypeStruct((N, Mi, Cpad), jnp.float32)      # final output only
    st_sd = jax.ShapeDtypeStruct((N, 8, Cpad), jnp.float32)
    acc_scr = pltpu.VMEM((Mi, Cpad), jnp.float32)

    # ---- stage 1: conv1 (+ projection shortcut conv) + partial BN stats ----
    if proj:
        wsc = _prep_w1x1(params["wsc"], Cinp, Cpad)
        kern = functools.partial(stage1_proj_kernel, Ho=Ho, Wo=Wo, stride=stride)
        flops = 2 * Mtot * Cinp * Cpad * 10           # 9 taps + 1x1 shortcut
        y1, st1, ysc, stsc = _pcall(
            kern, (N,),
            [xp_spec, full_spec(w1), full_spec(wsc)],
            (act_spec, st_spec, act_spec, st_spec),
            (y_bf, st_sd, y_bf, st_sd),
            scratch_shapes=[acc_scr],
            cost=_cost(flops, phases, w1, wsc, y_bf, st_sd, y_bf, st_sd),
        )(phases, w1, wsc)
    else:
        kern = functools.partial(stage1_kernel, Ho=Ho, Wo=Wo, stride=stride)
        flops = 2 * Mtot * Cinp * Cpad * 9
        y1, st1 = _pcall(
            kern, (N,),
            [xp_spec, full_spec(w1)],
            (act_spec, st_spec),
            (y_bf, st_sd),
            scratch_shapes=[acc_scr],
            cost=_cost(flops, phases, w1, y_bf, st_sd),
        )(phases, w1)

    bn1 = _bn_params(st1, params["g1"], params["b1"], Mtot, Cpad)   # (4, Cpad)

    # ---- stage 2: fused bn1+relu epilogue -> conv2 + partial BN stats ------
    kern2 = functools.partial(stage2_kernel, Ho=Ho, Wo=Wo)
    y2, st2 = _pcall(
        kern2, (N,),
        [act_spec, full_spec(bn1), full_spec(w2)],
        (act_spec, st_spec),
        (y_bf, st_sd),
        scratch_shapes=[pltpu.VMEM((Ho + 2, Wo + 2, Cpad), jnp.bfloat16), acc_scr],
        cost=_cost(2 * Mtot * Cpad * Cpad * 9, y_bf, bn1, w2, y_bf, st_sd),
    )(y1, bn1, w2)

    bn2 = _bn_params(st2, params["g2"], params["b2"], Mtot, Cpad)

    # ---- stage 3: bn2 (+ bn_sc) + residual add + relu ----------------------
    if proj:
        bnsc = _bn_params(stsc, params["gsc"], params["bsc"], Mtot, Cpad)
        out = _pcall(
            stage3_proj_kernel, (N,),
            [act_spec, act_spec, full_spec(bn2), full_spec(bnsc)],
            act_spec, y_f32,
            cost=_cost(10 * Mtot * Cpad, y_bf, y_bf, bn2, bnsc, y_f32),
        )(y2, ysc, bn2, bnsc)
    else:
        # Identity shortcut: reuse the bf16 phases centre slab (no extra HBM copy).
        assert Cinp == Cpad          # identity path implies Cin == Cout
        kern3 = functools.partial(stage3_id_kernel, Ho=Ho, Wo=Wo)
        out = _pcall(
            kern3, (N,),
            [xp_spec, act_spec, full_spec(bn2)],
            act_spec, y_f32,
            cost=_cost(8 * Mtot * Cpad, phases, y_bf, bn2, y_f32),
        )(phases, y2, bn2)

    out = out[:, :, :Cout].reshape(N, Ho, Wo, Cout)
    return jnp.transpose(out, (0, 3, 1, 2))           # back to NCHW


# ----------------------------------------------------------------------------
# Parameter init + pure-JAX reference (mirrors PyTorch forward, training BN)
# ----------------------------------------------------------------------------
def init_params(key, in_channels, out_channels, stride):
    ks = jax.random.split(key, 10)
    p = {
        "w1": 0.1 * jax.random.normal(ks[0], (out_channels, in_channels, 3, 3), jnp.float32),
        "g1": 1.0 + 0.1 * jax.random.normal(ks[1], (out_channels,), jnp.float32),
        "b1": 0.1 * jax.random.normal(ks[2], (out_channels,), jnp.float32),
        "w2": 0.1 * jax.random.normal(ks[3], (out_channels, out_channels, 3, 3), jnp.float32),
        "g2": 1.0 + 0.1 * jax.random.normal(ks[4], (out_channels,), jnp.float32),
        "b2": 0.1 * jax.random.normal(ks[5], (out_channels,), jnp.float32),
    }
    if stride != 1 or in_channels != out_channels:
        p.update({
            "wsc": 0.1 * jax.random.normal(ks[6], (out_channels, in_channels, 1, 1), jnp.float32),
            "gsc": 1.0 + 0.1 * jax.random.normal(ks[7], (out_channels,), jnp.float32),
            "bsc": 0.1 * jax.random.normal(ks[8], (out_channels,), jnp.float32),
        })
    return p


def basic_block_ref(x_nchw, params, stride):
    def conv(x, w, s, pad):
        return jax.lax.conv_general_dilated(
            x, w, (s, s), ((pad, pad), (pad, pad)),
            dimension_numbers=("NCHW", "OIHW", "NCHW"))

    def bn(y, g, b):
        mean = y.mean(axis=(0, 2, 3), keepdims=True)
        var = ((y - mean) ** 2).mean(axis=(0, 2, 3), keepdims=True)
        return (y - mean) / jnp.sqrt(var + EPS) * g.reshape(1, -1, 1, 1) \
            + b.reshape(1, -1, 1, 1)

    out = jax.nn.relu(bn(conv(x_nchw, params["w1"], stride, 1),
                         params["g1"], params["b1"]))
    out = bn(conv(out, params["w2"], 1, 1), params["g2"], params["b2"])
    if "wsc" in params:
        sc = bn(conv(x_nchw, params["wsc"], stride, 0),
                params["gsc"], params["bsc"])
    else:
        sc = x_nchw
    return jax.nn.relu(out + sc)


# ----------------------------------------------------------------------------
if __name__ == "__main__":
    key = jax.random.PRNGKey(0)
    k_x1, k_p1, k_x2, k_p2 = jax.random.split(key, 4)

    # Case 1: projection shortcut (stride=2, channel change)
    x1 = jax.random.normal(k_x1, (2, 4, 16, 16), jnp.float32)    # NCHW
    p1 = init_params(k_p1, in_channels=4, out_channels=8, stride=2)
    y1 = jax.block_until_ready(basic_block_pallas(x1, p1, stride=2))
    r1 = jax.block_until_ready(basic_block_ref(x1, p1, stride=2))

    # Case 2: identity shortcut (stride=1, same channels)
    x2 = jax.random.normal(k_x2, (2, 8, 8, 8), jnp.float32)      # NCHW
    p2 = init_params(k_p2, in_channels=8, out_channels=8, stride=1)
    y2 = jax.block_until_ready(basic_block_pallas(x2, p2, stride=1))
    r2 = jax.block_until_ready(basic_block_ref(x2, p2, stride=1))

    assert y1.shape == (2, 8, 8, 8) and y2.shape == (2, 8, 8, 8)
    # Tolerance reflects bf16 MXU operands and bf16 inter-stage storage
    # (accumulation / BN statistics / residual math stay f32).
    np.testing.assert_allclose(np.asarray(y1), np.asarray(r1), atol=5e-2, rtol=5e-2)
    np.testing.assert_allclose(np.asarray(y2), np.asarray(r2), atol=5e-2, rtol=5e-2)
    print("KERNEL_OK")
</pallas_src>

<mosaic_0001>
module attributes {stable_mosaic.version = 11 : i64} {
  func.func @stage1_proj_kernel(%arg0: i32, %arg1: memref<4x1x9x9x128xbf16, #tpu.memory_space<vmem>>, %arg2: memref<3x384x128xbf16, #tpu.memory_space<vmem>>, %arg3: memref<128x128xbf16, #tpu.memory_space<vmem>>, %arg4: memref<1x64x128xbf16, #tpu.memory_space<vmem>>, %arg5: memref<1x8x128xf32, #tpu.memory_space<vmem>>, %arg6: memref<1x64x128xbf16, #tpu.memory_space<vmem>>, %arg7: memref<1x8x128xf32, #tpu.memory_space<vmem>>, %arg8: memref<64x128xf32, #tpu.memory_space<vmem>>) attributes {dimension_semantics = [#tpu.dimension_semantics<parallel>], iteration_bounds = array<i64: 2>, scalar_prefetch = 0 : i64, scratch_operands = 1 : i64, tpu.core_type = #tpu.core_type<tc>, window_params = [{transform_indices = @transform_0, window_bounds = array<i64: 4, 1, 9, 9, 128>}, {pipeline_mode = #tpu.pipeline_mode<synchronous>, transform_indices = @transform_1, window_bounds = array<i64: 3, 384, 128>}, {pipeline_mode = #tpu.pipeline_mode<synchronous>, transform_indices = @transform_2, window_bounds = array<i64: 128, 128>}, {transform_indices = @transform_3, window_bounds = array<i64: 1, 64, 128>}, {transform_indices = @transform_4, window_bounds = array<i64: 1, 8, 128>}, {transform_indices = @transform_5, window_bounds = array<i64: 1, 64, 128>}, {transform_indices = @transform_6, window_bounds = array<i64: 1, 8, 128>}]} {
    %c0 = arith.constant 0 : index
    %c0_0 = arith.constant 0 : index
    %c0_1 = arith.constant 0 : index
    %c0_2 = arith.constant 0 : index
    %c0_3 = arith.constant 0 : index
    %0 = vector.load %arg1[%c0, %c0_0, %c0_1, %c0_2, %c0_3] : memref<4x1x9x9x128xbf16, #tpu.memory_space<vmem>>, vector<1x1x8x8x128xbf16>
    %1 = vector.shape_cast %0 : vector<1x1x8x8x128xbf16> to vector<8x8x128xbf16>
    %c1 = arith.constant 1 : index
    %c0_4 = arith.constant 0 : index
    %c0_5 = arith.constant 0 : index
    %c0_6 = arith.constant 0 : index
    %c0_7 = arith.constant 0 : index
    %2 = vector.load %arg1[%c1, %c0_4, %c0_5, %c0_6, %c0_7] : memref<4x1x9x9x128xbf16, #tpu.memory_space<vmem>>, vector<1x1x8x8x128xbf16>
    %3 = vector.shape_cast %2 : vector<1x1x8x8x128xbf16> to vector<8x8x128xbf16>
    %c0_8 = arith.constant 0 : index
    %c0_9 = arith.constant 0 : index
    %c0_10 = arith.constant 0 : index
    %c1_11 = arith.constant 1 : index
    %c0_12 = arith.constant 0 : index
    %4 = vector.load %arg1[%c0_8, %c0_9, %c0_10, %c1_11, %c0_12] : memref<4x1x9x9x128xbf16, #tpu.memory_space<vmem>>, vector<1x1x8x8x128xbf16>
    %5 = vector.shape_cast %4 : vector<1x1x8x8x128xbf16> to vector<8x8x128xbf16>
    %6 = tpu.concatenate %1, %3, %5 in 2 : vector<8x8x128xbf16>, vector<8x8x128xbf16>, vector<8x8x128xbf16> -> vector<8x8x384xbf16>
    %7 = vector.shape_cast %6 : vector<8x8x384xbf16> to vector<64x384xbf16>
    %c0_13 = arith.constant 0 : index
    %c0_14 = arith.constant 0 : index
    %c0_15 = arith.constant 0 : index
    %8 = vector.load %arg2[%c0_13, %c0_14, %c0_15] : memref<3x384x128xbf16, #tpu.memory_space<vmem>>, vector<1x384x128xbf16>
    %9 = vector.shape_cast %8 : vector<1x384x128xbf16> to vector<384x128xbf16>
    %cst = arith.constant dense<0.000000e+00> : vector<64x128xf32>
    %10 = tpu.matmul %7, %9, %cst {dimension_numbers = #tpu.dot_dimension_numbers<[1], [0], [0], [1], [0, 0, 1, 1], [], []>} : vector<64x384xbf16>, vector<384x128xbf16>, vector<64x128xf32> -> vector<64x128xf32>
    %c0_16 = arith.constant 0 : index
    %c0_17 = arith.constant 0 : index
    %11 = vector.load %arg8[%c0_16, %c0_17] : memref<64x128xf32, #tpu.memory_space<vmem>>, vector<64x128xf32>
    tpu.vector_store %arg8[%c0_16, %c0_17], %10 {strides = array<i32>} : memref<64x128xf32, #tpu.memory_space<vmem>>, vector<64x128xf32>,
    %c2 = arith.constant 2 : index
    %c0_18 = arith.constant 0 : index
    %c0_19 = arith.constant 0 : index
    %c0_20 = arith.constant 0 : index
    %c0_21 = arith.constant 0 : index
    %12 = vector.load %arg1[%c2, %c0_18, %c0_19, %c0_20, %c0_21] : memref<4x1x9x9x128xbf16, #tpu.memory_space<vmem>>, vector<1x1x8x8x128xbf16>
    %13 = vector.shape_cast %12 : vector<1x1x8x8x128xbf16> to vector<8x8x128xbf16>
    %c3 = arith.constant 3 : index
    %c0_22 = arith.constant 0 : index
    %c0_23 = arith.constant 0 : index
    %c0_24 = arith.constant 0 : index
    %c0_25 = arith.constant 0 : index
    %14 = vector.load %arg1[%c3, %c0_22, %c0_23, %c0_24, %c0_25] : memref<4x1x9x9x128xbf16, #tpu.memory_space<vmem>>, vector<1x1x8x8x128xbf16>
    %15 = vector.shape_cast %14 : vector<1x1x8x8x128xbf16> to vector<8x8x128xbf16>
    %c2_26 = arith.constant 2 : index
    %c0_27 = arith.constant 0 : index
    %c0_28 = arith.constant 0 : index
    %c1_29 = arith.constant 1 : index
    %c0_30 = arith.constant 0 : index
    %16 = vector.load %arg1[%c2_26, %c0_27, %c0_28, %c1_29, %c0_30] : memref<4x1x9x9x128xbf16, #tpu.memory_space<vmem>>, vector<1x1x8x8x128xbf16>
    %17 = vector.shape_cast %16 : vector<1x1x8x8x128xbf16> to vector<8x8x128xbf16>
    %18 = tpu.concatenate %13, %15, %17 in 2 : vector<8x8x128xbf16>, vector<8x8x128xbf16>, vector<8x8x128xbf16> -> vector<8x8x384xbf16>
    %19 = vector.shape_cast %18 : vector<8x8x384xbf16> to vector<64x384xbf16>
    %c1_31 = arith.constant 1 : index
    %c0_32 = arith.constant 0 : index
    %c0_33 = arith.constant 0 : index
    %20 = vector.load %arg2[%c1_31, %c0_32, %c0_33] : memref<3x384x128xbf16, #tpu.memory_space<vmem>>, vector<1x384x128xbf16>
    %21 = vector.shape_cast %20 : vector<1x384x128xbf16> to vector<384x128xbf16>
    %cst_34 = arith.constant dense<0.000000e+00> : vector<64x128xf32>
    %22 = tpu.matmul %19, %21, %cst_34 {dimension_numbers = #tpu.dot_dimension_numbers<[1], [0], [0], [1], [0, 0, 1, 1], [], []>} : vector<64x384xbf16>, vector<384x128xbf16>, vector<64x128xf32> -> vector<64x128xf32>
    %c0_35 = arith.constant 0 : index
    %c0_36 = arith.constant 0 : index
    %23 = vector.load %arg8[%c0_35, %c0_36] : memref<64x128xf32, #tpu.memory_space<vmem>>, vector<64x128xf32>
    %24 = arith.addf %23, %22 : vector<64x128xf32>
    %c0_37 = arith.constant 0 : index
    %c0_38 = arith.constant 0 : index
    %25 = vector.load %arg8[%c0_37, %c0_38] : memref<64x128xf32, #tpu.memory_space<vmem>>, vector<64x128xf32>
    tpu.vector_store %arg8[%c0_37, %c0_38], %24 {strides = array<i32>} : memref<64x128xf32, #tpu.memory_space<vmem>>, vector<64x128xf32>,
    %c0_39 = arith.constant 0 : index
    %c0_40 = arith.constant 0 : index
    %c1_41 = arith.constant 1 : index
    %c0_42 = arith.constant 0 : index
    %c0_43 = arith.constant 0 : index
    %26 = vector.load %arg1[%c0_39, %c0_40, %c1_41, %c0_42, %c0_43] : memref<4x1x9x9x128xbf16, #tpu.memory_space<vmem>>, vector<1x1x8x8x128xbf16>
    %27 = vector.shape_cast %26 : vector<1x1x8x8x128xbf16> to vector<8x8x128xbf16>
    %c1_44 = arith.constant 1 : index
    %c0_45 = arith.constant 0 : index
    %c1_46 = arith.constant 1 : index
    %c0_47 = arith.constant 0 : index
    %c0_48 = arith.constant 0 : index
    %28 = vector.load %arg1[%c1_44, %c0_45, %c1_46, %c0_47, %c0_48] : memref<4x1x9x9x128xbf16, #tpu.memory_space<vmem>>, vector<1x1x8x8x128xbf16>
    %29 = vector.shape_cast %28 : vector<1x1x8x8x128xbf16> to vector<8x8x128xbf16>
    %c0_49 = arith.constant 0 : index
    %c0_50 = arith.constant 0 : index
    %c1_51 = arith.constant 1 : index
    %c1_52 = arith.constant 1 : index
    %c0_53 = arith.constant 0 : index
    %30 = vector.load %arg1[%c0_49, %c0_50, %c1_51, %c1_52, %c0_53] : memref<4x1x9x9x128xbf16, #tpu.memory_space<vmem>>, vector<1x1x8x8x128xbf16>
    %31 = vector.shape_cast %30 : vector<1x1x8x8x128xbf16> to vector<8x8x128xbf16>
    %32 = tpu.concatenate %27, %29, %31 in 2 : vector<8x8x128xbf16>, vector<8x8x128xbf16>, vector<8x8x128xbf16> -> vector<8x8x384xbf16>
    %33 = vector.shape_cast %32 : vector<8x8x384xbf16> to vector<64x384xbf16>
    %c2_54 = arith.constant 2 : index
    %c0_55 = arith.constant 0 : index
    %c0_56 = arith.constant 0 : index
    %34 = vector.load %arg2[%c2_54, %c0_55, %c0_56] : memref<3x384x128xbf16, #tpu.memory_space<vmem>>, vector<1x384x128xbf16>
    %35 = vector.shape_cast %34 : vector<1x384x128xbf16> to vector<384x128xbf16>
    %cst_57 = arith.constant dense<0.000000e+00> : vector<64x128xf32>
    %36 = tpu.matmul %33, %35, %cst_57 {dimension_numbers = #tpu.dot_dimension_numbers<[1], [0], [0], [1], [0, 0, 1, 1], [], []>} : vector<64x384xbf16>, vector<384x128xbf16>, vector<64x128xf32> -> vector<64x128xf32>
    %c0_58 = arith.constant 0 : index
    %c0_59 = arith.constant 0 : index
    %37 = vector.load %arg8[%c0_58, %c0_59] : memref<64x128xf32, #tpu.memory_space<vmem>>, vector<64x128xf32>
    %38 = arith.addf %37, %36 : vector<64x128xf32>
    %c0_60 = arith.constant 0 : index
    %c0_61 = arith.constant 0 : index
    %39 = vector.load %arg8[%c0_60, %c0_61] : memref<64x128xf32, #tpu.memory_space<vmem>>, vector<64x128xf32>
    tpu.vector_store %arg8[%c0_60, %c0_61], %38 {strides = array<i32>} : memref<64x128xf32, #tpu.memory_space<vmem>>, vector<64x128xf32>,
    %c0_62 = arith.constant 0 : index
    %c0_63 = arith.constant 0 : index
    %40 = vector.load %arg8[%c0_62, %c0_63] : memref<64x128xf32, #tpu.memory_space<vmem>>, vector<64x128xf32>
    %41 = arith.truncf %40 : vector<64x128xf32> to vector<64x128xbf16>
    %c0_64 = arith.constant 0 : index
    %c0_65 = arith.constant 0 : index
    %c0_66 = arith.constant 0 : index
    %42 = vector.load %arg4[%c0_64, %c0_65, %c0_66] : memref<1x64x128xbf16, #tpu.memory_space<vmem>>, vector<1x64x128xbf16>
    %43 = vector.shape_cast %42 : vector<1x64x128xbf16> to vector<64x128xbf16>
    %44 = vector.shape_cast %41 : vector<64x128xbf16> to vector<1x64x128xbf16>
    tpu.vector_store %arg4[%c0_64, %c0_65, %c0_66], %44 {strides = array<i32>} : memref<1x64x128xbf16, #tpu.memory_space<vmem>>, vector<1x64x128xbf16>,
    %cst_67 = arith.constant dense<0.000000e+00> : vector<128xf32>
    %45 = vector.multi_reduction <add>, %40, %cst_67 [0] : vector<64x128xf32> to vector<128xf32>
    %46 = vector.shape_cast %45 : vector<128xf32> to vector<1x128xf32>
    %47 = arith.mulf %40, %40 : vector<64x128xf32>
    %cst_68 = arith.constant dense<0.000000e+00> : vector<128xf32>
    %48 = vector.multi_reduction <add>, %47, %cst_68 [0] : vector<64x128xf32> to vector<128xf32>
    %49 = vector.shape_cast %48 : vector<128xf32> to vector<1x128xf32>
    %cst_69 = arith.constant 0.000000e+00 : f32
    %50 = vector.broadcast %cst_69 : f32 to vector<6x128xf32>
    %51 = tpu.concatenate %46, %49, %50 in 0 : vector<1x128xf32>, vector<1x128xf32>, vector<6x128xf32> -> vector<8x128xf32>
    %c0_70 = arith.constant 0 : index
    %c0_71 = arith.constant 0 : index
    %c0_72 = arith.constant 0 : index
    %52 = vector.load %arg5[%c0_70, %c0_71, %c0_72] : memref<1x8x128xf32, #tpu.memory_space<vmem>>, vector<1x8x128xf32>
    %53 = vector.shape_cast %52 : vector<1x8x128xf32> to vector<8x128xf32>
    %54 = vector.shape_cast %51 : vector<8x128xf32> to vector<1x8x128xf32>
    tpu.vector_store %arg5[%c0_70, %c0_71, %c0_72], %54 {strides = array<i32>} : memref<1x8x128xf32, #tpu.memory_space<vmem>>, vector<1x8x128xf32>,
    %c3_73 = arith.constant 3 : index
    %c0_74 = arith.constant 0 : index
    %c0_75 = arith.constant 0 : index
    %c0_76 = arith.constant 0 : index
    %c0_77 = arith.constant 0 : index
    %55 = vector.load %arg1[%c3_73, %c0_74, %c0_75, %c0_76, %c0_77] : memref<4x1x9x9x128xbf16, #tpu.memory_space<vmem>>, vector<1x1x8x8x128xbf16>
    %56 = vector.shape_cast %55 : vector<1x1x8x8x128xbf16> to vector<8x8x128xbf16>
    %57 = vector.shape_cast %56 : vector<8x8x128xbf16> to vector<64x128xbf16>
    %c0_78 = arith.constant 0 : index
    %c0_79 = arith.constant 0 : index
    %58 = vector.load %arg3[%c0_78, %c0_79] : memref<128x128xbf16, #tpu.memory_space<vmem>>, vector<128x128xbf16>
    %cst_80 = arith.constant dense<0.000000e+00> : vector<64x128xf32>
    %59 = tpu.matmul %57, %58, %cst_80 {dimension_numbers = #tpu.dot_dimension_numbers<[1], [0], [0], [1], [0, 0, 1, 1], [], []>} : vector<64x128xbf16>, vector<128x128xbf16>, vector<64x128xf32> -> vector<64x128xf32>
    %60 = arith.truncf %59 : vector<64x128xf32> to vector<64x128xbf16>
    %c0_81 = arith.constant 0 : index
    %c0_82 = arith.constant 0 : index
    %c0_83 = arith.constant 0 : index
    %61 = vector.load %arg6[%c0_81, %c0_82, %c0_83] : memref<1x64x128xbf16, #tpu.memory_space<vmem>>, vector<1x64x128xbf16>
    %62 = vector.shape_cast %61 : vector<1x64x128xbf16> to vector<64x128xbf16>
    %63 = vector.shape_cast %60 : vector<64x128xbf16> to vector<1x64x128xbf16>
    tpu.vector_store %arg6[%c0_81, %c0_82, %c0_83], %63 {strides = array<i32>} : memref<1x64x128xbf16, #tpu.memory_space<vmem>>, vector<1x64x128xbf16>,
    %cst_84 = arith.constant dense<0.000000e+00> : vector<128xf32>
    %64 = vector.multi_reduction <add>, %59, %cst_84 [0] : vector<64x128xf32> to vector<128xf32>
    %65 = vector.shape_cast %64 : vector<128xf32> to vector<1x128xf32>
    %66 = arith.mulf %59, %59 : vector<64x128xf32>
    %cst_85 = arith.constant dense<0.000000e+00> : vector<128xf32>
    %67 = vector.multi_reduction <add>, %66, %cst_85 [0] : vector<64x128xf32> to vector<128xf32>
    %68 = vector.shape_cast %67 : vector<128xf32> to vector<1x128xf32>
    %cst_86 = arith.constant 0.000000e+00 : f32
    %69 = vector.broadcast %cst_86 : f32 to vector<6x128xf32>
    %70 = tpu.concatenate %65, %68, %69 in 0 : vector<1x128xf32>, vector<1x128xf32>, vector<6x128xf32> -> vector<8x128xf32>
    %c0_87 = arith.constant 0 : index
    %c0_88 = arith.constant 0 : index
    %c0_89 = arith.constant 0 : index
    %71 = vector.load %arg7[%c0_87, %c0_88, %c0_89] : memref<1x8x128xf32, #tpu.memory_space<vmem>>, vector<1x8x128xf32>
    %72 = vector.shape_cast %71 : vector<1x8x128xf32> to vector<8x128xf32>
    %73 = vector.shape_cast %70 : vector<8x128xf32> to vector<1x8x128xf32>
    tpu.vector_store %arg7[%c0_87, %c0_88, %c0_89], %73 {strides = array<i32>} : memref<1x8x128xf32, #tpu.memory_space<vmem>>, vector<1x8x128xf32>,
    return
  }
  func.func @transform_0(%arg0: i32) -> (i32, i32, i32, i32, i32) {
    %c0_i32 = arith.constant 0 : i32
    %c0_i32_0 = arith.constant 0 : i32
    %c0_i32_1 = arith.constant 0 : i32
    %c0_i32_2 = arith.constant 0 : i32
    %c0_i32_3 = arith.constant 0 : i32
    return %c0_i32, %arg0, %c0_i32_0, %c0_i32_1, %c0_i32_2 : i32, i32, i32, i32, i32
  }
  func.func @transform_1(%arg0: i32) -> (i32, i32, i32) {
    %c0_i32 = arith.constant 0 : i32
    %c0_i32_0 = arith.constant 0 : i32
    %c0_i32_1 = arith.constant 0 : i32
    %c0_i32_2 = arith.constant 0 : i32
    return %c0_i32, %c0_i32_0, %c0_i32_1 : i32, i32, i32
  }
  func.func @transform_2(%arg0: i32) -> (i32, i32) {
    %c0_i32 = arith.constant 0 : i32
    %c0_i32_0 = arith.constant 0 : i32
    %c0_i32_1 = arith.constant 0 : i32
    return %c0_i32, %c0_i32_0 : i32, i32
  }
  func.func @transform_3(%arg0: i32) -> (i32, i32, i32) {
    %c0_i32 = arith.constant 0 : i32
    %c0_i32_0 = arith.constant 0 : i32
    %c0_i32_1 = arith.constant 0 : i32
    return %arg0, %c0_i32, %c0_i32_0 : i32, i32, i32
  }
  func.func @transform_4(%arg0: i32) -> (i32, i32, i32) {
    %c0_i32 = arith.constant 0 : i32
    %c0_i32_0 = arith.constant 0 : i32
    %c0_i32_1 = arith.constant 0 : i32
    return %arg0, %c0_i32, %c0_i32_0 : i32, i32, i32
  }
  func.func @transform_5(%arg0: i32) -> (i32, i32, i32) {
    %c0_i32 = arith.constant 0 : i32
    %c0_i32_0 = arith.constant 0 : i32
    %c0_i32_1 = arith.constant 0 : i32
    return %arg0, %c0_i32, %c0_i32_0 : i32, i32, i32
  }
  func.func @transform_6(%arg0: i32) -> (i32, i32, i32) {
    %c0_i32 = arith.constant 0 : i32
    %c0_i32_0 = arith.constant 0 : i32
    %c0_i32_1 = arith.constant 0 : i32
    return %arg0, %c0_i32, %c0_i32_0 : i32, i32, i32
  }
}

module attributes {stable_mosaic.version = 11 : i64} {
  func.func @stage2_kernel(%arg0: i32, %arg1: memref<1x64x128xbf16, #tpu.memory_space<vmem>>, %arg2: memref<4x128xf32, #tpu.memory_space<vmem>>, %arg3: memref<3x384x128xbf16, #tpu.memory_space<vmem>>, %arg4: memref<1x64x128xbf16, #tpu.memory_space<vmem>>, %arg5: memref<1x8x128xf32, #tpu.memory_space<vmem>>, %arg6: memref<10x10x128xbf16, #tpu.memory_space<vmem>>, %arg7: memref<64x128xf32, #tpu.memory_space<vmem>>) attributes {dimension_semantics = [#tpu.dimension_semantics<parallel>], iteration_bounds = array<i64: 2>, scalar_prefetch = 0 : i64, scratch_operands = 2 : i64, tpu.core_type = #tpu.core_type<tc>, window_params = [{transform_indices = @transform_0, window_bounds = array<i64: 1, 64, 128>}, {pipeline_mode = #tpu.pipeline_mode<synchronous>, transform_indices = @transform_1, window_bounds = array<i64: 4, 128>}, {pipeline_mode = #tpu.pipeline_mode<synchronous>, transform_indices = @transform_2, window_bounds = array<i64: 3, 384, 128>}, {transform_indices = @transform_3, window_bounds = array<i64: 1, 64, 128>}, {transform_indices = @transform_4, window_bounds = array<i64: 1, 8, 128>}]} {
    %c0 = arith.constant 0 : index
    %c0_0 = arith.constant 0 : index
    %c0_1 = arith.constant 0 : index
    %0 = vector.load %arg1[%c0, %c0_0, %c0_1] : memref<1x64x128xbf16, #tpu.memory_space<vmem>>, vector<1x64x128xbf16>
    %1 = vector.shape_cast %0 : vector<1x64x128xbf16> to vector<64x128xbf16>
    %2 = arith.extf %1 : vector<64x128xbf16> to vector<64x128xf32>
    %c0_2 = arith.constant 0 : index
    %c0_3 = arith.constant 0 : index
    %3 = vector.load %arg2[%c0_2, %c0_3] : memref<4x128xf32, #tpu.memory_space<vmem>>, vector<4x128xf32>
    %4 = vector.extract_strided_slice %3 {offsets = [0, 0], sizes = [1, 128], strides = [1, 1]} : vector<4x128xf32> to vector<1x128xf32>
    %5 = vector.broadcast %4 : vector<1x128xf32> to vector<64x128xf32>
    %6 = arith.subf %2, %5 : vector<64x128xf32>
    %7 = vector.extract_strided_slice %3 {offsets = [1, 0], sizes = [1, 128], strides = [1, 1]} : vector<4x128xf32> to vector<1x128xf32>
    %8 = vector.broadcast %7 : vector<1x128xf32> to vector<64x128xf32>
    %9 = arith.mulf %6, %8 : vector<64x128xf32>
    %10 = vector.extract_strided_slice %3 {offsets = [2, 0], sizes = [1, 128], strides = [1, 1]} : vector<4x128xf32> to vector<1x128xf32>
    %11 = vector.broadcast %10 : vector<1x128xf32> to vector<64x128xf32>
    %12 = arith.mulf %9, %11 : vector<64x128xf32>
    %13 = vector.extract_strided_slice %3 {offsets = [3, 0], sizes = [1, 128], strides = [1, 1]} : vector<4x128xf32> to vector<1x128xf32>
    %14 = vector.broadcast %13 : vector<1x128xf32> to vector<64x128xf32>
    %15 = arith.addf %12, %14 : vector<64x128xf32>
    %cst = arith.constant 0.000000e+00 : f32
    %16 = vector.broadcast %cst : f32 to vector<64x128xf32>
    %17 = arith.maximumf %15, %16 : vector<64x128xf32>
    %cst_4 = arith.constant 0.000000e+00 : bf16
    %18 = vector.broadcast %cst_4 : bf16 to vector<1x10x128xbf16>
    %cst_5 = arith.constant 0.000000e+00 : bf16
    %19 = vector.broadcast %cst_5 : bf16 to vector<8x1x128xbf16>
    %c0_6 = arith.constant 0 : index
    %c0_7 = arith.constant 0 : index
    %c0_8 = arith.constant 0 : index
    %20 = vector.load %arg6[%c0_6, %c0_7, %c0_8] : memref<10x10x128xbf16, #tpu.memory_space<vmem>>, vector<1x10x128xbf16>
    tpu.vector_store %arg6[%c0_6, %c0_7, %c0_8], %18 {strides = array<i32>} : memref<10x10x128xbf16, #tpu.memory_space<vmem>>, vector<1x10x128xbf16>,
    %c9 = arith.constant 9 : index
    %c0_9 = arith.constant 0 : index
    %c0_10 = arith.constant 0 : index
    %21 = vector.load %arg6[%c9, %c0_9, %c0_10] : memref<10x10x128xbf16, #tpu.memory_space<vmem>>, vector<1x10x128xbf16>
    tpu.vector_store %arg6[%c9, %c0_9, %c0_10], %18 {strides = array<i32>} : memref<10x10x128xbf16, #tpu.memory_space<vmem>>, vector<1x10x128xbf16>,
    %c1 = arith.constant 1 : index
    %c0_11 = arith.constant 0 : index
    %c0_12 = arith.constant 0 : index
    %22 = vector.load %arg6[%c1, %c0_11, %c0_12] : memref<10x10x128xbf16, #tpu.memory_space<vmem>>, vector<8x1x128xbf16>
    tpu.vector_store %arg6[%c1, %c0_11, %c0_12], %19 {strides = array<i32>} : memref<10x10x128xbf16, #tpu.memory_space<vmem>>, vector<8x1x128xbf16>,
    %c1_13 = arith.constant 1 : index
    %c9_14 = arith.constant 9 : index
    %c0_15 = arith.constant 0 : index
    %23 = vector.load %arg6[%c1_13, %c9_14, %c0_15] : memref<10x10x128xbf16, #tpu.memory_space<vmem>>, vector<8x1x128xbf16>
    tpu.vector_store %arg6[%c1_13, %c9_14, %c0_15], %19 {strides = array<i32>} : memref<10x10x128xbf16, #tpu.memory_space<vmem>>, vector<8x1x128xbf16>,
    %24 = vector.shape_cast %17 : vector<64x128xf32> to vector<8x8x128xf32>
    %25 = arith.truncf %24 : vector<8x8x128xf32> to vector<8x8x128xbf16>
    %c1_16 = arith.constant 1 : index
    %c1_17 = arith.constant 1 : index
    %c0_18 = arith.constant 0 : index
    %26 = vector.load %arg6[%c1_16, %c1_17, %c0_18] : memref<10x10x128xbf16, #tpu.memory_space<vmem>>, vector<8x8x128xbf16>
    tpu.vector_store %arg6[%c1_16, %c1_17, %c0_18], %25 {strides = array<i32>} : memref<10x10x128xbf16, #tpu.memory_space<vmem>>, vector<8x8x128xbf16>,
    %c0_19 = arith.constant 0 : index
    %c0_20 = arith.constant 0 : index
    %c0_21 = arith.constant 0 : index
    %27 = vector.load %arg6[%c0_19, %c0_20, %c0_21] : memref<10x10x128xbf16, #tpu.memory_space<vmem>>, vector<8x8x128xbf16>
    %c0_22 = arith.constant 0 : index
    %c1_23 = arith.constant 1 : index
    %c0_24 = arith.constant 0 : index
    %28 = vector.load %arg6[%c0_22, %c1_23, %c0_24] : memref<10x10x128xbf16, #tpu.memory_space<vmem>>, vector<8x8x128xbf16>
    %c0_25 = arith.constant 0 : index
    %c2 = arith.constant 2 : index
    %c0_26 = arith.constant 0 : index
    %29 = vector.load %arg6[%c0_25, %c2, %c0_26] : memref<10x10x128xbf16, #tpu.memory_space<vmem>>, vector<8x8x128xbf16>
    %30 = tpu.concatenate %27, %28, %29 in 2 : vector<8x8x128xbf16>, vector<8x8x128xbf16>, vector<8x8x128xbf16> -> vector<8x8x384xbf16>
    %31 = vector.shape_cast %30 : vector<8x8x384xbf16> to vector<64x384xbf16>
    %c0_27 = arith.constant 0 : index
    %c0_28 = arith.constant 0 : index
    %c0_29 = arith.constant 0 : index
    %32 = vector.load %arg3[%c0_27, %c0_28, %c0_29] : memref<3x384x128xbf16, #tpu.memory_space<vmem>>, vector<1x384x128xbf16>
    %33 = vector.shape_cast %32 : vector<1x384x128xbf16> to vector<384x128xbf16>
    %cst_30 = arith.constant dense<0.000000e+00> : vector<64x128xf32>
    %34 = tpu.matmul %31, %33, %cst_30 {dimension_numbers = #tpu.dot_dimension_numbers<[1], [0], [0], [1], [0, 0, 1, 1], [], []>} : vector<64x384xbf16>, vector<384x128xbf16>, vector<64x128xf32> -> vector<64x128xf32>
    %c0_31 = arith.constant 0 : index
    %c0_32 = arith.constant 0 : index
    %35 = vector.load %arg7[%c0_31, %c0_32] : memref<64x128xf32, #tpu.memory_space<vmem>>, vector<64x128xf32>
    tpu.vector_store %arg7[%c0_31, %c0_32], %34 {strides = array<i32>} : memref<64x128xf32, #tpu.memory_space<vmem>>, vector<64x128xf32>,
    %c1_33 = arith.constant 1 : index
    %c0_34 = arith.constant 0 : index
    %c0_35 = arith.constant 0 : index
    %36 = vector.load %arg6[%c1_33, %c0_34, %c0_35] : memref<10x10x128xbf16, #tpu.memory_space<vmem>>, vector<8x8x128xbf16>
    %c1_36 = arith.constant 1 : index
    %c1_37 = arith.constant 1 : index
    %c0_38 = arith.constant 0 : index
    %37 = vector.load %arg6[%c1_36, %c1_37, %c0_38] : memref<10x10x128xbf16, #tpu.memory_space<vmem>>, vector<8x8x128xbf16>
    %c1_39 = arith.constant 1 : index
    %c2_40 = arith.constant 2 : index
    %c0_41 = arith.constant 0 : index
    %38 = vector.load %arg6[%c1_39, %c2_40, %c0_41] : memref<10x10x128xbf16, #tpu.memory_space<vmem>>, vector<8x8x128xbf16>
    %39 = tpu.concatenate %36, %37, %38 in 2 : vector<8x8x128xbf16>, vector<8x8x128xbf16>, vector<8x8x128xbf16> -> vector<8x8x384xbf16>
    %40 = vector.shape_cast %39 : vector<8x8x384xbf16> to vector<64x384xbf16>
    %c1_42 = arith.constant 1 : index
    %c0_43 = arith.constant 0 : index
    %c0_44 = arith.constant 0 : index
    %41 = vector.load %arg3[%c1_42, %c0_43, %c0_44] : memref<3x384x128xbf16, #tpu.memory_space<vmem>>, vector<1x384x128xbf16>
    %42 = vector.shape_cast %41 : vector<1x384x128xbf16> to vector<384x128xbf16>
    %cst_45 = arith.constant dense<0.000000e+00> : vector<64x128xf32>
    %43 = tpu.matmul %40, %42, %cst_45 {dimension_numbers = #tpu.dot_dimension_numbers<[1], [0], [0], [1], [0, 0, 1, 1], [], []>} : vector<64x384xbf16>, vector<384x128xbf16>, vector<64x128xf32> -> vector<64x128xf32>
    %c0_46 = arith.constant 0 : index
    %c0_47 = arith.constant 0 : index
    %44 = vector.load %arg7[%c0_46, %c0_47] : memref<64x128xf32, #tpu.memory_space<vmem>>, vector<64x128xf32>
    %45 = arith.addf %44, %43 : vector<64x128xf32>
    %c0_48 = arith.constant 0 : index
    %c0_49 = arith.constant 0 : index
    %46 = vector.load %arg7[%c0_48, %c0_49] : memref<64x128xf32, #tpu.memory_space<vmem>>, vector<64x128xf32>
    tpu.vector_store %arg7[%c0_48, %c0_49], %45 {strides = array<i32>} : memref<64x128xf32, #tpu.memory_space<vmem>>, vector<64x128xf32>,
    %c2_50 = arith.constant 2 : index
    %c0_51 = arith.constant 0 : index
    %c0_52 = arith.constant 0 : index
    %47 = vector.load %arg6[%c2_50, %c0_51, %c0_52] : memref<10x10x128xbf16, #tpu.memory_space<vmem>>, vector<8x8x128xbf16>
    %c2_53 = arith.constant 2 : index
    %c1_54 = arith.constant 1 : index
    %c0_55 = arith.constant 0 : index
    %48 = vector.load %arg6[%c2_53, %c1_54, %c0_55] : memref<10x10x128xbf16, #tpu.memory_space<vmem>>, vector<8x8x128xbf16>
    %c2_56 = arith.constant 2 : index
    %c2_57 = arith.constant 2 : index
    %c0_58 = arith.constant 0 : index
    %49 = vector.load %arg6[%c2_56, %c2_57, %c0_58] : memref<10x10x128xbf16, #tpu.memory_space<vmem>>, vector<8x8x128xbf16>
    %50 = tpu.concatenate %47, %48, %49 in 2 : vector<8x8x128xbf16>, vector<8x8x128xbf16>, vector<8x8x128xbf16> -> vector<8x8x384xbf16>
    %51 = vector.shape_cast %50 : vector<8x8x384xbf16> to vector<64x384xbf16>
    %c2_59 = arith.constant 2 : index
    %c0_60 = arith.constant 0 : index
    %c0_61 = arith.constant 0 : index
    %52 = vector.load %arg3[%c2_59, %c0_60, %c0_61] : memref<3x384x128xbf16, #tpu.memory_space<vmem>>, vector<1x384x128xbf16>
    %53 = vector.shape_cast %52 : vector<1x384x128xbf16> to vector<384x128xbf16>
    %cst_62 = arith.constant dense<0.000000e+00> : vector<64x128xf32>
    %54 = tpu.matmul %51, %53, %cst_62 {dimension_numbers = #tpu.dot_dimension_numbers<[1], [0], [0], [1], [0, 0, 1, 1], [], []>} : vector<64x384xbf16>, vector<384x128xbf16>, vector<64x128xf32> -> vector<64x128xf32>
    %c0_63 = arith.constant 0 : index
    %c0_64 = arith.constant 0 : index
    %55 = vector.load %arg7[%c0_63, %c0_64] : memref<64x128xf32, #tpu.memory_space<vmem>>, vector<64x128xf32>
    %56 = arith.addf %55, %54 : vector<64x128xf32>
    %c0_65 = arith.constant 0 : index
    %c0_66 = arith.constant 0 : index
    %57 = vector.load %arg7[%c0_65, %c0_66] : memref<64x128xf32, #tpu.memory_space<vmem>>, vector<64x128xf32>
    tpu.vector_store %arg7[%c0_65, %c0_66], %56 {strides = array<i32>} : memref<64x128xf32, #tpu.memory_space<vmem>>, vector<64x128xf32>,
    %c0_67 = arith.constant 0 : index
    %c0_68 = arith.constant 0 : index
    %58 = vector.load %arg7[%c0_67, %c0_68] : memref<64x128xf32, #tpu.memory_space<vmem>>, vector<64x128xf32>
    %59 = arith.truncf %58 : vector<64x128xf32> to vector<64x128xbf16>
    %c0_69 = arith.constant 0 : index
    %c0_70 = arith.constant 0 : index
    %c0_71 = arith.constant 0 : index
    %60 = vector.load %arg4[%c0_69, %c0_70, %c0_71] : memref<1x64x128xbf16, #tpu.memory_space<vmem>>, vector<1x64x128xbf16>
    %61 = vector.shape_cast %60 : vector<1x64x128xbf16> to vector<64x128xbf16>
    %62 = vector.shape_cast %59 : vector<64x128xbf16> to vector<1x64x128xbf16>
    tpu.vector_store %arg4[%c0_69, %c0_70, %c0_71], %62 {strides = array<i32>} : memref<1x64x128xbf16, #tpu.memory_space<vmem>>, vector<1x64x128xbf16>,
    %cst_72 = arith.constant dense<0.000000e+00> : vector<128xf32>
    %63 = vector.multi_reduction <add>, %58, %cst_72 [0] : vector<64x128xf32> to vector<128xf32>
    %64 = vector.shape_cast %63 : vector<128xf32> to vector<1x128xf32>
    %65 = arith.mulf %58, %58 : vector<64x128xf32>
    %cst_73 = arith.constant dense<0.000000e+00> : vector<128xf32>
    %66 = vector.multi_reduction <add>, %65, %cst_73 [0] : vector<64x128xf32> to vector<128xf32>
    %67 = vector.shape_cast %66 : vector<128xf32> to vector<1x128xf32>
    %cst_74 = arith.constant 0.000000e+00 : f32
    %68 = vector.broadcast %cst_74 : f32 to vector<6x128xf32>
    %69 = tpu.concatenate %64, %67, %68 in 0 : vector<1x128xf32>, vector<1x128xf32>, vector<6x128xf32> -> vector<8x128xf32>
    %c0_75 = arith.constant 0 : index
    %c0_76 = arith.constant 0 : index
    %c0_77 = arith.constant 0 : index
    %70 = vector.load %arg5[%c0_75, %c0_76, %c0_77] : memref<1x8x128xf32, #tpu.memory_space<vmem>>, vector<1x8x128xf32>
    %71 = vector.shape_cast %70 : vector<1x8x128xf32> to vector<8x128xf32>
    %72 = vector.shape_cast %69 : vector<8x128xf32> to vector<1x8x128xf32>
    tpu.vector_store %arg5[%c0_75, %c0_76, %c0_77], %72 {strides = array<i32>} : memref<1x8x128xf32, #tpu.memory_space<vmem>>, vector<1x8x128xf32>,
    return
  }
  func.func @transform_0(%arg0: i32) -> (i32, i32, i32) {
    %c0_i32 = arith.constant 0 : i32
    %c0_i32_0 = arith.constant 0 : i32
    %c0_i32_1 = arith.constant 0 : i32
    return %arg0, %c0_i32, %c0_i32_0 : i32, i32, i32
  }
  func.func @transform_1(%arg0: i32) -> (i32, i32) {
    %c0_i32 = arith.constant 0 : i32
    %c0_i32_0 = arith.constant 0 : i32
    %c0_i32_1 = arith.constant 0 : i32
    return %c0_i32, %c0_i32_0 : i32, i32
  }
  func.func @transform_2(%arg0: i32) -> (i32, i32, i32) {
    %c0_i32 = arith.constant 0 : i32
    %c0_i32_0 = arith.constant 0 : i32
    %c0_i32_1 = arith.constant 0 : i32
    %c0_i32_2 = arith.constant 0 : i32
    return %c0_i32, %c0_i32_0, %c0_i32_1 : i32, i32, i32
  }
  func.func @transform_3(%arg0: i32) -> (i32, i32, i32) {
    %c0_i32 = arith.constant 0 : i32
    %c0_i32_0 = arith.constant 0 : i32
    %c0_i32_1 = arith.constant 0 : i32
    return %arg0, %c0_i32, %c0_i32_0 : i32, i32, i32
  }
  func.func @transform_4(%arg0: i32) -> (i32, i32, i32) {
    %c0_i32 = arith.constant 0 : i32
    %c0_i32_0 = arith.constant 0 : i32
    %c0_i32_1 = arith.constant 0 : i32
    return %arg0, %c0_i32, %c0_i32_0 : i32, i32, i32
  }
}

module attributes {stable_mosaic.version = 11 : i64} {
  func.func @stage3_proj_kernel(%arg0: i32, %arg1: memref<1x64x128xbf16, #tpu.memory_space<vmem>>, %arg2: memref<1x64x128xbf16, #tpu.memory_space<vmem>>, %arg3: memref<4x128xf32, #tpu.memory_space<vmem>>, %arg4: memref<4x128xf32, #tpu.memory_space<vmem>>, %arg5: memref<1x64x128xf32, #tpu.memory_space<vmem>>) attributes {dimension_semantics = [#tpu.dimension_semantics<parallel>], iteration_bounds = array<i64: 2>, scalar_prefetch = 0 : i64, scratch_operands = 0 : i64, tpu.core_type = #tpu.core_type<tc>, window_params = [{transform_indices = @transform_0, window_bounds = array<i64: 1, 64, 128>}, {transform_indices = @transform_1, window_bounds = array<i64: 1, 64, 128>}, {pipeline_mode = #tpu.pipeline_mode<synchronous>, transform_indices = @transform_2, window_bounds = array<i64: 4, 128>}, {pipeline_mode = #tpu.pipeline_mode<synchronous>, transform_indices = @transform_3, window_bounds = array<i64: 4, 128>}, {transform_indices = @transform_4, window_bounds = array<i64: 1, 64, 128>}]} {
    %c0 = arith.constant 0 : index
    %c0_0 = arith.constant 0 : index
    %c0_1 = arith.constant 0 : index
    %0 = vector.load %arg1[%c0, %c0_0, %c0_1] : memref<1x64x128xbf16, #tpu.memory_space<vmem>>, vector<1x64x128xbf16>
    %1 = vector.shape_cast %0 : vector<1x64x128xbf16> to vector<64x128xbf16>
    %2 = arith.extf %1 : vector<64x128xbf16> to vector<64x128xf32>
    %c0_2 = arith.constant 0 : index
    %c0_3 = arith.constant 0 : index
    %3 = vector.load %arg3[%c0_2, %c0_3] : memref<4x128xf32, #tpu.memory_space<vmem>>, vector<4x128xf32>
    %4 = vector.extract_strided_slice %3 {offsets = [0, 0], sizes = [1, 128], strides = [1, 1]} : vector<4x128xf32> to vector<1x128xf32>
    %5 = vector.broadcast %4 : vector<1x128xf32> to vector<64x128xf32>
    %6 = arith.subf %2, %5 : vector<64x128xf32>
    %7 = vector.extract_strided_slice %3 {offsets = [1, 0], sizes = [1, 128], strides = [1, 1]} : vector<4x128xf32> to vector<1x128xf32>
    %8 = vector.broadcast %7 : vector<1x128xf32> to vector<64x128xf32>
    %9 = arith.mulf %6, %8 : vector<64x128xf32>
    %10 = vector.extract_strided_slice %3 {offsets = [2, 0], sizes = [1, 128], strides = [1, 1]} : vector<4x128xf32> to vector<1x128xf32>
    %11 = vector.broadcast %10 : vector<1x128xf32> to vector<64x128xf32>
    %12 = arith.mulf %9, %11 : vector<64x128xf32>
    %13 = vector.extract_strided_slice %3 {offsets = [3, 0], sizes = [1, 128], strides = [1, 1]} : vector<4x128xf32> to vector<1x128xf32>
    %14 = vector.broadcast %13 : vector<1x128xf32> to vector<64x128xf32>
    %15 = arith.addf %12, %14 : vector<64x128xf32>
    %c0_4 = arith.constant 0 : index
    %c0_5 = arith.constant 0 : index
    %c0_6 = arith.constant 0 : index
    %16 = vector.load %arg2[%c0_4, %c0_5, %c0_6] : memref<1x64x128xbf16, #tpu.memory_space<vmem>>, vector<1x64x128xbf16>
    %17 = vector.shape_cast %16 : vector<1x64x128xbf16> to vector<64x128xbf16>
    %18 = arith.extf %17 : vector<64x128xbf16> to vector<64x128xf32>
    %c0_7 = arith.constant 0 : index
    %c0_8 = arith.constant 0 : index
    %19 = vector.load %arg4[%c0_7, %c0_8] : memref<4x128xf32, #tpu.memory_space<vmem>>, vector<4x128xf32>
    %20 = vector.extract_strided_slice %19 {offsets = [0, 0], sizes = [1, 128], strides = [1, 1]} : vector<4x128xf32> to vector<1x128xf32>
    %21 = vector.broadcast %20 : vector<1x128xf32> to vector<64x128xf32>
    %22 = arith.subf %18, %21 : vector<64x128xf32>
    %23 = vector.extract_strided_slice %19 {offsets = [1, 0], sizes = [1, 128], strides = [1, 1]} : vector<4x128xf32> to vector<1x128xf32>
    %24 = vector.broadcast %23 : vector<1x128xf32> to vector<64x128xf32>
    %25 = arith.mulf %22, %24 : vector<64x128xf32>
    %26 = vector.extract_strided_slice %19 {offsets = [2, 0], sizes = [1, 128], strides = [1, 1]} : vector<4x128xf32> to vector<1x128xf32>
    %27 = vector.broadcast %26 : vector<1x128xf32> to vector<64x128xf32>
    %28 = arith.mulf %25, %27 : vector<64x128xf32>
    %29 = vector.extract_strided_slice %19 {offsets = [3, 0], sizes = [1, 128], strides = [1, 1]} : vector<4x128xf32> to vector<1x128xf32>
    %30 = vector.broadcast %29 : vector<1x128xf32> to vector<64x128xf32>
    %31 = arith.addf %28, %30 : vector<64x128xf32>
    %32 = arith.addf %15, %31 : vector<64x128xf32>
    %cst = arith.constant 0.000000e+00 : f32
    %33 = vector.broadcast %cst : f32 to vector<64x128xf32>
    %34 = arith.maximumf %32, %33 : vector<64x128xf32>
    %c0_9 = arith.constant 0 : index
    %c0_10 = arith.constant 0 : index
    %c0_11 = arith.constant 0 : index
    %35 = vector.load %arg5[%c0_9, %c0_10, %c0_11] : memref<1x64x128xf32, #tpu.memory_space<vmem>>, vector<1x64x128xf32>
    %36 = vector.shape_cast %35 : vector<1x64x128xf32> to vector<64x128xf32>
    %37 = vector.shape_cast %34 : vector<64x128xf32> to vector<1x64x128xf32>
    tpu.vector_store %arg5[%c0_9, %c0_10, %c0_11], %37 {strides = array<i32>} : memref<1x64x128xf32, #tpu.memory_space<vmem>>, vector<1x64x128xf32>,
    return
  }
  func.func @transform_0(%arg0: i32) -> (i32, i32, i32) {
    %c0_i32 = arith.constant 0 : i32
    %c0_i32_0 = arith.constant 0 : i32
    %c0_i32_1 = arith.constant 0 : i32
    return %arg0, %c0_i32, %c0_i32_0 : i32, i32, i32
  }
  func.func @transform_1(%arg0: i32) -> (i32, i32, i32) {
    %c0_i32 = arith.constant 0 : i32
    %c0_i32_0 = arith.constant 0 : i32
    %c0_i32_1 = arith.constant 0 : i32
    return %arg0, %c0_i32, %c0_i32_0 : i32, i32, i32
  }
  func.func @transform_2(%arg0: i32) -> (i32, i32) {
    %c0_i32 = arith.constant 0 : i32
    %c0_i32_0 = arith.constant 0 : i32
    %c0_i32_1 = arith.constant 0 : i32
    return %c0_i32, %c0_i32_0 : i32, i32
  }
  func.func @transform_3(%arg0: i32) -> (i32, i32) {
    %c0_i32 = arith.constant 0 : i32
    %c0_i32_0 = arith.constant 0 : i32
    %c0_i32_1 = arith.constant 0 : i32
    return %c0_i32, %c0_i32_0 : i32, i32
  }
  func.func @transform_4(%arg0: i32) -> (i32, i32, i32) {
    %c0_i32 = arith.constant 0 : i32
    %c0_i32_0 = arith.constant 0 : i32
    %c0_i32_1 = arith.constant 0 : i32
    return %arg0, %c0_i32, %c0_i32_0 : i32, i32, i32
  }
}

</mosaic_0001>

<bundles_post_ra>
// kernel: basic_block_pallas.5
= control target key start
LH: loop header
LB: loop body
LE: loop exit
PB: predicated region body
PF: predicated region fallthrough
CT: control target
= control target key end

     0   :  { %s1325_s0 = inlined_call_operand.hbm [shape: bf16[2,64,128], index: 0, kind: input, shape index: {}]   ;;  %s1326_s1 = inlined_call_operand.hbm [shape: bf16[2,64,128], index: 1, kind: input, shape index: {}]   ;;  %s1327_s2 = inlined_call_operand.hbm [shape: f32[4,128], index: 2, kind: input, shape index: {}]   ;;  %s1328_s3 = inlined_call_operand.hbm [shape: f32[4,128], index: 3, kind: input, shape index: {}]   ;;  %s1329_s4 = inlined_call_operand.hbm [shape: f32[2,64,128], index: 4, kind: output, shape index: {}]  }
   0x1   :  { %1335 = sst [smem:[#allocation16_spill]] %s1325_s0 }
   0x2   :  { %9 = vsyncpa [#allocation3], 0 }
   0x3   :  { %11 = vsyncpa [#allocation3 + $0x1], 0 }
   0x4   :  { %12 = vsyncpa [#allocation6], 0 }
   0x5   :  { %14 = vsyncpa [#allocation6 + $0x1], 0 }
   0x6   :  { %15 = vsyncpa [#allocation9], 0 }
   0x7   :  { %16 = vsyncpa [#allocation4], 0 }
   0x8   :  { %18 = vsyncpa [#allocation4 + $0x1], 0  ;;  %s933_s15 = smov 0   ;;  %s935_s16 = smov 0  }
   0x9   :  { %s937_s17 = smov 0   ;;  %s939_s18 = smov 0  }
   0xa LB: > { %s954_s19 = sadd.s32 4294967295, %s897_s18   ;;  %s564_s20 = sadd.s32 4294967294, %s897_s18   ;;  %s897_s18 = sphi %s939_s18, %s1358_s18   ;;  %s893_s17 = sphi %s937_s17, %s1357_s17   ;;  %s889_s16 = sphi %s935_s16, %s1356_s16   ;;  %s885_s15 = sphi %s933_s15, %s1355_s15  }
   0xb   : > { %s958_s21 = sadd.s32 1, %s897_s18   ;;  %s31_s22 = sadd.s32 1, %s893_s17 }
   0xc   : > { %s28_s23 = ssub.s32 %s897_s18, %s958_s21  ;;  %p38_p0 = scmp.ne.s32.totalorder %s893_s17, %s889_s16 }
   0xd   : > { %p29_p1 = scmp.eq.s32.totalorder %s28_s23, 0  ;;  %p39_p2 = scmp.eq.s32.totalorder %s897_s18, 0 }
   0xe   : > { %p44_p3 = scmp.ne.s32.totalorder %s889_s16, %s885_s15  ;;  %p1330_p4 = scmp.eq.s32.totalorder %s954_s19, 0 }
   0xf   : > { %s970_s24 = scalar_select %p29_p1, %s893_s17, %s31_s22  }
  0x10   : > { %p972_p5 = por %p39_p2, %p38_p0  ;;  %p978_p6 = por %p1330_p4, %p44_p3 }
  0x11   : > { %p136_p7 = scmp.eq.s32.totalorder %s954_s19, 1  ;;  %p142_p8 = scmp.eq.s32.totalorder %s564_s20, 1 }
  0x12   : > { %s1337_s26 = scalar_select %p978_p6, 1, 0 }
  0x13   : > { %p565_p9 = scmp.ge.s32.totalorder %s897_s18, 1  ;;  %p149_p10 = scmp.lt.s32.totalorder %s897_s18, 3 }
  0x14   : > { %p985_p11 = por %p136_p7, %p38_p0  ;;  %p989_p12 = por %p142_p8, %p44_p3 }
  0x15   : > { %p993_p13 = pnand %p565_p9, %p149_p10  ;;  %s899_s30 = smov [#allocation7]  }
  0x16   : > { %s1338_s27 = scalar_select %p985_p11, 1, 0 }
  0x17   : > { %s1339_s28 = scalar_select %p989_p12, 1, 0 }
  0x18   : > { %s1340_s29 = scalar_select %p993_p13, 1, 0 }
  0x19   : > { %p641_p2 = pneg %p993_p13  ;;  %s162_s5 = sshll.u32 %s899_s30, 4  ;;  %s163_s5 = int_to_ptr.vmem [resolvable:$true] %s162_s5 }
  0x1a   : > { %p661_p4 = scmp.lt.s32.totalorder %s897_s18, 2  ;;  %p1341_p0 = scmp.eq.s32.totalorder %s954_s19, 0 }
  0x1b   : > { %s900_s8 = smov [#allocation8]   ;;  %s703_s12 = scalar_lea.hbm %s1327_s2, 64 }
  0x1c   : > { %p1003_p7 = pnand %p641_p2, %p1341_p0  ;;  %p1009_p3 = pnand %p661_p4, %p972_p5 }
  0x1d   : > { %s173_s9 = sshll.u32 %s900_s8, 4  ;;  %p704_p8 = scmp.ne.s32.totalorder %s1327_s2, %s703_s12  ;;  %s1013_s9 = int_to_ptr.vmem [resolvable:$true] %s173_s9 }
  0x1e   : > { %s1343_s7 = scalar_select %p1009_p3, 1, 0 }
  0x1f   : > { %p705_p9 = pneg %p1003_p7  ;;  %p710_p10 = scmp.lt.u32.totalorder %s703_s12, %s1327_s2 }
  0x21   : > { %p706_p4 = pnand %p705_p9, %p704_p8 }
  0x23   : > { %p707_p5 = pneg %p706_p4 }
  0x25   : > { %p712_p2 = pnand %p710_p10, %p707_p5 }
  0x27   : > { %715 = shalt.err (!%p712_p2)
}
  0x28   : > { %s716_s23 = scalar_lea.vmem %s163_s5, 64  ;;  %p724_p11 = scmp.lt.s32.totalorder %s163_s5, %s163_s5 }
  0x29   : > { %p717_p0 = scmp.ne.s32.totalorder %s163_s5, %s716_s23  ;;  %p725_p6 = scmp.lt.s32.totalorder %s716_s23, %s716_s23 }
  0x2b   : > { %p719_p1 = pnand %p717_p0, %p705_p9  ;;  %p726_p13 = por %p725_p6, %p724_p11 }
  0x2d   : > { %p720_p12 = pneg %p719_p1 }
  0x2f   : > { %p727_p3 = pnand %p726_p13, %p720_p12 }
  0x31   : > { %730 = shalt.err (!%p727_p3)
}
  0x32   : > { %644 = dma.hbm_to_vmem [thread:$0]  (!%p1003_p7), %s1327_s2, 64, %s163_s5, [#allocation6]  }
  0x33   : > { %s184_s8 = sand.u32 1, %s893_s17   ;;  %s731_s12 = scalar_lea.hbm %s1328_s3, 64 }
  0x34   : > { %p732_p1 = scmp.ne.s32.totalorder %s1328_s3, %s731_s12  ;;  %p738_p12 = scmp.lt.u32.totalorder %s731_s12, %s1328_s3 }
  0x36   : > { %p734_p6 = pnand %p732_p1, %p705_p9 }
  0x38   : > { %p735_p11 = pneg %p734_p6 }
  0x3a   : > { %p740_p13 = pnand %p738_p12, %p735_p11 }
  0x3c   : > { %743 = shalt.err (!%p740_p13)
}
  0x3d   : > { %s744_s5 = scalar_lea.vmem %s1013_s9, 64  ;;  %p752_p5 = scmp.lt.s32.totalorder %s1013_s9, %s1013_s9 }
  0x3e   : > { %p745_p3 = scmp.ne.s32.totalorder %s1013_s9, %s744_s5  ;;  %p753_p10 = scmp.lt.s32.totalorder %s744_s5, %s744_s5 }
  0x40   : > { %p747_p8 = pnand %p745_p3, %p705_p9  ;;  %p754_p2 = por %p753_p10, %p752_p5 }
  0x42   : > { %p748_p4 = pneg %p747_p8 }
  0x44   : > { %p755_p0 = pnand %p754_p2, %p748_p4 }
  0x46   : > { %758 = shalt.err (!%p755_p0)
}
  0x47   : > { %647 = dma.hbm_to_vmem [thread:$0]  (!%p1003_p7), %s1328_s3, 64, %s1013_s9, [#allocation9]  }
  0x48   : > { %s1063_s30 = sshll.u32 %s184_s8, 5  ;;  %s586_s10 = sshll.u32 %s897_s18, 9 }
  0x49   : > { %s1344_s0 = sld [smem:[#allocation16_spill]]  ;;  %s188_s6 = scalar_lea.vmem [#allocation2], %s1063_s30 }
  0x4a   : > { %s195_s14 = sshll.u32 %s188_s6, 4  ;;  %s1076_s20 = scalar_lea.sflag [#allocation3], %s184_s8  ;;  %s1074_s14 = int_to_ptr.vmem [resolvable:$true] %s195_s14 }
  0x4b   : > { %p1345_p9 = scmp.ne.s32.totalorder %s1343_s7, 0 }
  0x4d   : > { %p761_p1 = pneg %p1345_p9 }
  0x4f   : > { %s1071_s13 = scalar_lea.hbm %s1344_s0, %s586_s10  ;;  %s764_s23 = scalar_lea.hbm %s1344_s0, 1024 }
  0x50   : > { %s759_s9 = scalar_lea.hbm %s1071_s13, 512  ;;  %p765_p12 = scmp.lt.u32.totalorder %s1071_s13, %s1344_s0 }
  0x51   : > { %p760_p7 = scmp.ne.s32.totalorder %s1071_s13, %s759_s9  ;;  %p766_p13 = scmp.lt.u32.totalorder %s764_s23, %s759_s9 }
  0x52   : > { %p768_p8 = scmp.lt.u32.totalorder %s759_s9, %s1071_s13 }
  0x53   : > { %p762_p6 = pnand %p761_p1, %p760_p7  ;;  %p767_p3 = por %p766_p13, %p765_p12 }
  0x55   : > { %p763_p11 = pneg %p762_p6  ;;  %p769_p4 = por %p768_p8, %p767_p3 }
  0x57   : > { %p770_p5 = pnand %p769_p4, %p763_p11 }
  0x59   : > { %773 = shalt.err (!%p770_p5)
}
  0x5a   : > { %s774_s8 = scalar_lea.vmem %s1074_s14, 512  ;;  %s901_s12 = smov [#allocation2]  }
  0x5b   : > { %p775_p10 = scmp.ne.s32.totalorder %s1074_s14, %s774_s8  ;;  %s779_s6 = sshll.u32 %s901_s12, 4  ;;  %s780_s6 = int_to_ptr.vmem [resolvable:$false] %s779_s6 }
  0x5c   : > { %s781_s22 = scalar_lea.vmem %s780_s6, 1024  ;;  %p782_p7 = scmp.lt.s32.totalorder %s1074_s14, %s780_s6 }
  0x5d   : > { %p777_p2 = pnand %p775_p10, %p761_p1  ;;  %p783_p6 = scmp.lt.s32.totalorder %s781_s22, %s774_s8 }
  0x5f   : > { %p778_p0 = pneg %p777_p2  ;;  %p784_p12 = por %p783_p6, %p782_p7 }
  0x61   : > { %p785_p13 = pnand %p784_p12, %p778_p0 }
  0x63   : > { %788 = shalt.err (!%p785_p13)
}
  0x64   : > { %s902_s9 = smov 64   ;;  %s903_s5 = smov 4  }
  0x65   : > { %651 = dma.hbm_to_vmem [thread:$0]  (!%p1345_p9), %s1071_s13, 512, %s1074_s14, %s1076_s20, %s902_s9, %s902_s9, %s903_s5  }
  0x66   : > { %s1112_s11 = scalar_lea.hbm %s1326_s1, %s586_s10  ;;  %s209_s8 = scalar_lea.vmem [#allocation5], %s1063_s30 }
  0x67   : > { %s216_s12 = sshll.u32 %s209_s8, 4  ;;  %s205_s6 = sand.u32 1, %s897_s18   ;;  %s1115_s12 = int_to_ptr.vmem [resolvable:$true] %s216_s12 }
  0x68   : > { %s1118_s22 = scalar_lea.sflag [#allocation6], %s205_s6  ;;  %s789_s0 = scalar_lea.hbm %s1112_s11, 512 }
  0x69   : > { %p790_p11 = scmp.ne.s32.totalorder %s1112_s11, %s789_s0  ;;  %s794_s14 = scalar_lea.hbm %s1326_s1, 1024 }
  0x6a   : > { %p795_p4 = scmp.lt.u32.totalorder %s1112_s11, %s1326_s1  ;;  %p796_p5 = scmp.lt.u32.totalorder %s794_s14, %s789_s0 }
  0x6b   : > { %p792_p3 = pnand %p790_p11, %p761_p1  ;;  %p798_p2 = scmp.lt.u32.totalorder %s789_s0, %s1112_s11 }
  0x6c   : > { %p797_p10 = por %p796_p5, %p795_p4 }
  0x6d   : > { %p793_p8 = pneg %p792_p3 }
  0x6e   : > { %p799_p0 = por %p798_p2, %p797_p10 }
  0x70   : > { %p800_p7 = pnand %p799_p0, %p793_p8 }
  0x72   : > { %803 = shalt.err (!%p800_p7)
}
  0x73   : > { %s804_s30 = scalar_lea.vmem %s1115_s12, 512  ;;  %s904_s25 = smov [#allocation5]  }
  0x74   : > { %p805_p6 = scmp.ne.s32.totalorder %s1115_s12, %s804_s30  ;;  %s809_s8 = sshll.u32 %s904_s25, 4  ;;  %s810_s8 = int_to_ptr.vmem [resolvable:$false] %s809_s8 }
  0x75   : > { %s811_s6 = scalar_lea.vmem %s810_s8, 1024  ;;  %p812_p11 = scmp.lt.s32.totalorder %s1115_s12, %s810_s8 }
  0x76   : > { %p807_p12 = pnand %p805_p6, %p761_p1  ;;  %p813_p3 = scmp.lt.s32.totalorder %s811_s6, %s804_s30 }
  0x78   : > { %p808_p13 = pneg %p807_p12  ;;  %p814_p4 = por %p813_p3, %p812_p11 }
  0x7a   : > { %p815_p5 = pnand %p814_p4, %p808_p13 }
  0x7c   : > { %818 = shalt.err (!%p815_p5)
}
  0x7d   : > { %654 = dma.hbm_to_vmem [thread:$0]  (!%p1345_p9), %s1112_s11, 512, %s1115_s12, %s1118_s22, %s902_s9, %s902_s9, %s903_s5  }
  0x7e   : > { %p1346_p1 = scmp.ne.s32.totalorder %s1340_s29, 0 }
  0x7f   : > { %s1150_s0 = sand.u32 (!%p1346_p1), 1, %s889_s16   ;;  %p1347_p8 = scmp.ne.s32.totalorder (!%p1346_p1), %s1337_s26, 0 }
  0x80   : > { %228 = sbr.rel (%p1346_p1) target bundleno = 196 (0xc4), region = 36  ;;  %s576_s13 = sshll.u32 (!%p1346_p1), %s1150_s0, 5 }
  0x81   : > { %s231_s10 = scalar_lea.sflag (!%p1346_p1), [#allocation3], %s1150_s0  ;;  %s1154_s14 = scalar_lea.vmem (!%p1346_p1), [#allocation2], %s576_s13 }
  0x87   : > { %864 = dma.done.wait (%p1347_p8), %s231_s10, 512  }
  0x88   : > { %866 = vsyncadd (%p1347_p8), %s231_s10, 4294966784  ;;  %s239_s7 = sand.u32 1, %s954_s19   ;;  %s1161_s9 = scalar_lea.vmem [#allocation5], %s576_s13 }
  0x89   : > { %s240_s29 = scalar_lea.sflag [#allocation6], %s239_s7 }
  0x8a   : > { %868 = dma.done.wait (%p1347_p8), %s240_s29, 512  }
  0x8b   : > { %870 = vsyncadd (%p1347_p8), %s240_s29, 4294966784  ;;  %p1348_p9 = scmp.eq.s32.totalorder %s954_s19, 0 }
  0x8d   : > { %872 = dma.done.wait (%p1348_p9), [#allocation6], 64   ;;  %p1349_p10 = pmov %p1348_p9 }
  0x8e   : > { %p1350_p2 = pmov %p1348_p9 }
  0x8f   : > { %874 = vsyncadd (%p1349_p10), [#allocation6], 4294967232 }
  0x90   : > { %876 = dma.done.wait (%p1350_p2), [#allocation9], 64   ;;  %p1351_p0 = pmov %p1350_p2 }
  0x91   : > { %v298_v0 = vlaneseq  ;;  %v590_v6 = vld [vmem:[%s1154_s14] sm:$0xff]   ;;  %v621_v14 = vld [vmem:[%s1154_s14 + $0x8] sm:$0xff]   ;;  %v622_v44 = vld [vmem:[%s1154_s14 + $0x10] sm:$0xff]   ;;  %s580_s26 = sshll.u32 %s1150_s0, 6  ;;  %s588_s12 = sshll.u32 %s954_s19, 10 }
  0x92   : > { %878 = vsyncadd (%p1351_p0), [#allocation9], 4294967232  ;;  %v297_v7 = vld [vmem:[#allocation7] sm:$0xf]  ;;  %v591_v9 = vunpack.c.l.bf16 %v590_v6  ;;  %v362_v13 = vld [vmem:[#allocation8] sm:$0xf]  ;;  %v592_v23 = vunpack.c.h.bf16 %v590_v6  ;;  %v595_v26 = vunpack.c.l.bf16 %v621_v14  ;;  %v596_v30 = vunpack.c.h.bf16 %v621_v14  ;;  %s1279_s23 = scalar_lea.hbm %s1329_s4, %s588_s12 }
  0x93   : > { %v299_v1 = vshrl.u32 %v298_v0, 7  ;;  %v606_v8 = vld [vmem:[%s1161_s9] sm:$0xff]   ;;  %v624_v15 = vld [vmem:[%s1161_s9 + $0x8] sm:$0xff]   ;;  %v625_v53 = vld [vmem:[%s1161_s9 + $0x10] sm:$0xff]   ;;  %v599_v57 = vunpack.c.l.bf16 %v622_v44  ;;  %v600_v6 = vunpack.c.h.bf16 %v622_v44  ;;  %s1235_s5 = scalar_lea.vmem [#allocation10], %s580_s26  ;;  %s436_s30 = scalar_lea.sflag [#allocation4], %s1150_s0 }
  0x94   : > { %v607_v17 = vunpack.c.l.bf16 %v606_v8  ;;  %v608_v25 = vunpack.c.h.bf16 %v606_v8  ;;  %v611_v27 = vunpack.c.l.bf16 %v624_v15  ;;  %v612_v31 = vunpack.c.h.bf16 %v624_v15  ;;  %v626_v14 = vld [vmem:[%s1161_s9 + $0x18] sm:$0xff]   ;;  %s449_s11 = sshll.u32 %s1235_s5, 4  ;;  %p1352_p6 = scmp.ne.s32.totalorder %s1338_s27, 0  ;;  %s1274_s11 = int_to_ptr.vmem [resolvable:$true] %s449_s11 }
  0x95   : > { %v300_v2 = vsub.s32 0, %v299_v1  ;;  %v312_v3 = vsub.s32 1, %v299_v1  ;;  %v324_v4 = vsub.s32 2, %v299_v1  ;;  %v336_v5 = vsub.s32 3, %v299_v1  ;;  %s819_s25 = scalar_lea.vmem %s1274_s11, 1024  ;;  %s905_s19 = smov [#allocation10]  }
  0x96   : > { %v615_v1 = vunpack.c.l.bf16 %v625_v53  ;;  %p820_p7 = scmp.ne.s32.totalorder %s1274_s11, %s819_s25  ;;  %s823_s8 = sshll.u32 %s905_s19, 4  ;;  %s824_s8 = int_to_ptr.vmem [resolvable:$false] %s823_s8 }
  0x97   : > { %v1177_v10 = vrot.slane %v297_v7, %v300_v2  ;;  %v1179_v11 = vrot.slane %v297_v7, %v312_v3  ;;  %v1181_v12 = vrot.slane %v297_v7, %v324_v4  ;;  %v1185_v16 = vrot.slane %v297_v7, %v336_v5  ;;  %s825_s6 = scalar_lea.vmem %s824_s8, 2048  ;;  %p826_p11 = scmp.lt.s32.totalorder %s1274_s11, %s824_s8 }
  0x98   : > { %v1187_v18 = vrot.slane %v362_v13, %v300_v2  ;;  %v1189_v19 = vrot.slane %v362_v13, %v312_v3  ;;  %v1192_v21 = vrot.slane %v362_v13, %v324_v4  ;;  %v1194_v22 = vrot.slane %v362_v13, %v336_v5  ;;  %v623_v2 = vld [vmem:[%s1154_s14 + $0x18] sm:$0xff]   ;;  %p821_p12 = pnand %p820_p7, %p1352_p6  ;;  %p827_p3 = scmp.lt.s32.totalorder %s825_s6, %s819_s25 }
  0x99   : > { %v302_v20 = vsub.f32 %v591_v9, %v1177_v10  ;;  %v303_v29 = vsub.f32 %v592_v23, %v1177_v10  ;;  %v304_v34 = vsub.f32 %v595_v26, %v1177_v10  ;;  %v305_v38 = vsub.f32 %v596_v30, %v1177_v10 }
  0x9a   : > { %v367_v24 = vsub.f32 %v607_v17, %v1187_v18  ;;  %v368_v33 = vsub.f32 %v608_v25, %v1187_v18  ;;  %v369_v35 = vsub.f32 %v611_v27, %v1187_v18  ;;  %v370_v39 = vsub.f32 %v612_v31, %v1187_v18  ;;  %p822_p13 = pneg %p821_p12  ;;  %p828_p4 = por %p827_p3, %p826_p11 }
  0x9b   : > { %v314_v28 = vmul.f32 %v1179_v11, %v302_v20  ;;  %v315_v37 = vmul.f32 %v1179_v11, %v303_v29  ;;  %v316_v42 = vmul.f32 %v1179_v11, %v304_v34  ;;  %v317_v47 = vmul.f32 %v1179_v11, %v305_v38 }
  0x9c   : > { %v379_v32 = vmul.f32 %v1189_v19, %v367_v24  ;;  %v380_v41 = vmul.f32 %v1189_v19, %v368_v33  ;;  %v381_v43 = vmul.f32 %v1189_v19, %v369_v35  ;;  %v382_v48 = vmul.f32 %v1189_v19, %v370_v39  ;;  %p829_p5 = pnand %p828_p4, %p822_p13 }
  0x9d   : > { %v326_v36 = vmul.f32 %v1181_v12, %v314_v28  ;;  %v327_v46 = vmul.f32 %v1181_v12, %v315_v37  ;;  %v328_v51 = vmul.f32 %v1181_v12, %v316_v42  ;;  %v329_v55 = vmul.f32 %v1181_v12, %v317_v47 }
  0x9e   : > { %v391_v40 = vmul.f32 %v1192_v21, %v379_v32  ;;  %v392_v50 = vmul.f32 %v1192_v21, %v380_v41  ;;  %v393_v52 = vmul.f32 %v1192_v21, %v381_v43  ;;  %v394_v56 = vmul.f32 %v1192_v21, %v382_v48 }
  0x9f   : > { %v338_v45 = vadd.f32 %v1185_v16, %v326_v36  ;;  %v339_v54 = vadd.f32 %v1185_v16, %v327_v46  ;;  %v340_v60 = vadd.f32 %v1185_v16, %v328_v51  ;;  %v341_v62 = vadd.f32 %v1185_v16, %v329_v55 }
  0xa0   : > { %v403_v49 = vadd.f32 %v1194_v22, %v391_v40  ;;  %v404_v59 = vadd.f32 %v1194_v22, %v392_v50  ;;  %v405_v61 = vadd.f32 %v1194_v22, %v393_v52  ;;  %v406_v63 = vadd.f32 %v1194_v22, %v394_v56 }
  0xa1   : > { %v306_v0 = vsub.f32 %v599_v57, %v1177_v10  ;;  %v371_v9 = vsub.f32 %v615_v1, %v1187_v18  ;;  %v616_v13 = vunpack.c.h.bf16 %v625_v53  ;;  %v307_v20 = vsub.f32 %v600_v6, %v1177_v10 }
  0xa2   : > { %v411_v58 = vadd.f32 %v403_v49, %v338_v45  ;;  %v412_v4 = vadd.f32 %v404_v59, %v339_v54  ;;  %v413_v5 = vadd.f32 %v405_v61, %v340_v60  ;;  %v414_v7 = vadd.f32 %v406_v63, %v341_v62 }
  0xa3   : > { %v318_v8 = vmul.f32 %v1179_v11, %v306_v0  ;;  %v603_v23 = vunpack.c.l.bf16 %v623_v2  ;;  %v383_v26 = vmul.f32 %v1189_v19, %v371_v9  ;;  %v372_v27 = vsub.f32 %v616_v13, %v1187_v18 }
  0xa4   : > { %v419_v3 = vmax.f32 %v411_v58, 0.0  ;;  %v420_v15 = vmax.f32 %v412_v4, 0.0  ;;  %v421_v17 = vmax.f32 %v413_v5, 0.0  ;;  %v422_v24 = vmax.f32 %v414_v7, 0.0 }
  0xa5   : > { %v330_v25 = vmul.f32 %v1181_v12, %v318_v8  ;;  %v319_v28 = vmul.f32 %v1179_v11, %v307_v20  ;;  %v308_v29 = vsub.f32 %v603_v23, %v1177_v10  ;;  %v619_v30 = vunpack.c.l.bf16 %v626_v14 }
  0xa6   : > { %427 = vst [vmem:[%s1235_s5] sm:$0xff] %v419_v3  ;;  %428 = vst [vmem:[%s1235_s5 + $0x8] sm:$0xff] %v420_v15  ;;  %v604_v31 = vunpack.c.h.bf16 %v623_v2  ;;  %v395_v33 = vmul.f32 %v1192_v21, %v383_v26  ;;  %v384_v34 = vmul.f32 %v1189_v19, %v372_v27  ;;  %v620_v35 = vunpack.c.h.bf16 %v626_v14 }
  0xa7   : > { %429 = vst [vmem:[%s1235_s5 + $0x10] sm:$0xff] %v421_v17  ;;  %430 = vst [vmem:[%s1235_s5 + $0x18] sm:$0xff] %v422_v24  ;;  %v342_v32 = vadd.f32 %v1185_v16, %v330_v25  ;;  %v331_v36 = vmul.f32 %v1181_v12, %v319_v28  ;;  %v320_v37 = vmul.f32 %v1179_v11, %v308_v29 }
  0xa8   : > { %v373_v38 = vsub.f32 %v619_v30, %v1187_v18  ;;  %v309_v39 = vsub.f32 %v604_v31, %v1177_v10  ;;  %v407_v40 = vadd.f32 %v1194_v22, %v395_v33  ;;  %v396_v41 = vmul.f32 %v1192_v21, %v384_v34 }
  0xa9   : > { %v374_v42 = vsub.f32 %v620_v35, %v1187_v18  ;;  %v343_v43 = vadd.f32 %v1185_v16, %v331_v36  ;;  %v332_v44 = vmul.f32 %v1181_v12, %v320_v37 }
  0xaa   : > { %v385_v45 = vmul.f32 %v1189_v19, %v373_v38  ;;  %v321_v46 = vmul.f32 %v1179_v11, %v309_v39  ;;  %v415_v47 = vadd.f32 %v407_v40, %v342_v32  ;;  %v408_v10 = vadd.f32 %v1194_v22, %v396_v41 }
  0xab   : > { %v386_v48 = vmul.f32 %v1189_v19, %v374_v42  ;;  %v344_v49 = vadd.f32 %v1185_v16, %v332_v44 }
  0xac   : > { %v397_v18 = vmul.f32 %v1192_v21, %v385_v45  ;;  %v333_v50 = vmul.f32 %v1181_v12, %v321_v46  ;;  %v423_v51 = vmax.f32 %v415_v47, 0.0  ;;  %v416_v52 = vadd.f32 %v408_v10, %v343_v43 }
  0xad   : > { %v398_v53 = vmul.f32 %v1192_v21, %v386_v48 }
  0xae   : > { %v409_v11 = vadd.f32 %v1194_v22, %v397_v18  ;;  %v345_v54 = vadd.f32 %v1185_v16, %v333_v50  ;;  %431 = vst [vmem:[%s1235_s5 + $0x20] sm:$0xff] %v423_v51  ;;  %v424_v19 = vmax.f32 %v416_v52, 0.0 }
  0xaf   : > { %v410_v55 = vadd.f32 %v1194_v22, %v398_v53 }
  0xb0   : > { %v417_v56 = vadd.f32 %v409_v11, %v344_v49  ;;  %432 = vst [vmem:[%s1235_s5 + $0x28] sm:$0xff] %v424_v19 }
  0xb1   : > { %v418_v12 = vadd.f32 %v410_v55, %v345_v54 }
  0xb2   : > { %v425_v21 = vmax.f32 %v417_v56, 0.0 }
  0xb3   : > { %v426_v16 = vmax.f32 %v418_v12, 0.0 }
  0xb4   : > { %433 = vst [vmem:[%s1235_s5 + $0x30] sm:$0xff] %v425_v21 }
  0xb5   : > { %434 = vst [vmem:[%s1235_s5 + $0x38] sm:$0xff] %v426_v16 }
  0xb6   : > { %832 = shalt.err (!%p829_p5)
}
  0xb7   : > { %s833_s13 = scalar_lea.hbm %s1279_s23, 1024  ;;  %s837_s7 = scalar_lea.hbm %s1329_s4, 2048 }
  0xb8   : > { %p834_p1 = scmp.ne.s32.totalorder %s1279_s23, %s833_s13  ;;  %p838_p10 = scmp.lt.u32.totalorder %s1279_s23, %s1329_s4 }
  0xb9   : > { %p839_p2 = scmp.lt.u32.totalorder %s837_s7, %s833_s13  ;;  %p841_p7 = scmp.lt.u32.totalorder %s833_s13, %s1279_s23 }
  0xba   : > { %p835_p8 = pnand %p834_p1, %p1352_p6 }
  0xbb   : > { %p840_p0 = por %p839_p2, %p838_p10 }
  0xbc   : > { %p836_p9 = pneg %p835_p8 }
  0xbd   : > { %p842_p12 = por %p841_p7, %p840_p0 }
  0xbf   : > { %p843_p13 = pnand %p842_p12, %p836_p9 }
  0xc1   : > { %846 = shalt.err (!%p843_p13)
}
  0xc2   : > { %s906_s26 = smov 128   ;;  %s907_s5 = smov 8  }
  0xc3   : > { %639 = dma.vmem_to_hbm [thread:$0]  (%p1352_p6), %s1274_s11, 1024, %s1279_s23, %s436_s30, %s906_s26, %s906_s26, %s907_s5  }
  0xc4 PF: > { %s464_s12 = sand.u32 1, %s885_s15   ;;  %p1353_p11 = scmp.ne.s32.totalorder %s1339_s28, 0 }
  0xc5   : > { %p1354_p3 = scmp.ge.s32.totalorder %s897_s18, 2  ;;  %s465_s22 = scalar_lea.sflag [#allocation4], %s464_s12 }
  0xc7   : > { %p656_p4 = pnand %p1354_p3, %p1353_p11 }
  0xc9   : > { %880 = dma.done.wait (!%p656_p4), %s465_s22, 1024  }
  0xca   : > { %882 = vsyncadd (!%p656_p4), %s465_s22, 4294966272  ;;  %p21_p5 = scmp.ge.s32.totalorder %s958_s21, 4   ;;  %s1355_s15 = smov %s889_s16 }
  0xcb   : > { %s1356_s16 = smov %s893_s17  ;;  %s1357_s17 = smov %s970_s24 }
  0xcc   : > { %s1358_s18 = smov %s958_s21  ;;  %23 = sbr.rel (!%p21_p5) target bundleno = 10 (0xa), region = 102 }
  0xd3   :  { %470 = vsyncpa [#allocation3], 1 }
  0xd4   :  { %472 = vsyncpa [#allocation3 + $0x1], 1 }
  0xd5   :  { %473 = vsyncpa [#allocation6], 1 }
  0xd6   :  { %475 = vsyncpa [#allocation6 + $0x1], 1 }
  0xd7   :  { %476 = vsyncpa [#allocation9], 1 }
  0xd8   :  { %477 = vsyncpa [#allocation4], 1 }
  0xd9   :  { %479 = vsyncpa [#allocation4 + $0x1], 1 }

// kernel: basic_block_pallas.3
= control target key start
LH: loop header
LB: loop body
LE: loop exit
PB: predicated region body
PF: predicated region fallthrough
CT: control target
= control target key end

     0   :  { %12 = vsyncpa [#allocation4], 0  ;;  %s4045_s0 = inlined_call_operand.hbm [shape: bf16[4,2,9,9,128], index: 0, kind: input, shape index: {}]   ;;  %s4046_s1 = inlined_call_operand.hbm [shape: bf16[3,384,128], index: 1, kind: input, shape index: {}]   ;;  %s4047_s2 = inlined_call_operand.hbm [shape: bf16[128,128], index: 2, kind: input, shape index: {}]   ;;  %s4048_s3 = inlined_call_operand.hbm [shape: bf16[2,64,128], index: 3, kind: output, shape index: {0}]   ;;  %s4049_s4 = inlined_call_operand.hbm [shape: f32[2,8,128], index: 4, kind: output, shape index: {1}]   ;;  %s4050_s5 = inlined_call_operand.hbm [shape: bf16[2,64,128], index: 5, kind: output, shape index: {2}]   ;;  %s4051_s6 = inlined_call_operand.hbm [shape: f32[2,8,128], index: 6, kind: output, shape index: {3}]  }
   0x1   :  { %14 = vsyncpa [#allocation4 + $0x1], 0 }
   0x2   :  { %15 = vsyncpa [#allocation7], 0 }
   0x3   :  { %16 = vsyncpa [#allocation5], 0 }
   0x4   :  { %18 = vsyncpa [#allocation5 + $0x1], 0 }
   0x5   :  { %19 = vsyncpa [#allocation11], 0 }
   0x6   :  { %21 = vsyncpa [#allocation11 + $0x1], 0 }
   0x7   :  { %22 = vsyncpa [#allocation14], 0 }
   0x8   :  { %24 = vsyncpa [#allocation14 + $0x1], 0  ;;  %s3602_s21 = smov 0   ;;  %s3604_s22 = smov 0  }
   0x9   :  { %s3606_s23 = smov 0   ;;  %s3608_s24 = smov 0  }
   0xa LB: > { %s3623_s25 = sadd.s32 4294967295, %s3549_s24   ;;  %s4057_s26 = sadd.s32 4294967294, %s3549_s24   ;;  %s3549_s24 = sphi %s3608_s24, %s4080_s24   ;;  %s3545_s23 = sphi %s3606_s23, %s4084_s23   ;;  %s3541_s22 = sphi %s3604_s22, %s4083_s22   ;;  %s3537_s21 = sphi %s3602_s21, %s4082_s21  }
   0xb   : > { %s3627_s27 = sadd.s32 1, %s3549_s24   ;;  %s37_s28 = sadd.s32 1, %s3545_s23 }
   0xc   : > { %4062 = sst [smem:[#allocation23_spill]] %s3627_s27  ;;  %s34_s29 = ssub.s32 %s3549_s24, %s3627_s27 }
   0xd   : > { %p44_p0 = scmp.ne.s32.totalorder %s3545_s23, %s3541_s22  ;;  %p35_p1 = scmp.eq.s32.totalorder %s34_s29, 0 }
   0xe   : > { %p45_p2 = scmp.eq.s32.totalorder %s3549_s24, 0  ;;  %p50_p3 = scmp.ne.s32.totalorder %s3541_s22, %s3537_s21 }
   0xf   : > { %p4052_p4 = scmp.eq.s32.totalorder %s3623_s25, 0  ;;  %p116_p7 = scmp.eq.s32.totalorder %s3623_s25, 1 }
  0x10   : > { %s3639_s30 = scalar_select %p35_p1, %s3545_s23, %s37_s28  }
  0x11   : > { %p3641_p5 = por %p45_p2, %p44_p0  ;;  %p3647_p6 = por %p4052_p4, %p50_p3 }
  0x12   : > { %4063 = sst [smem:[#allocation24_spill]] %s3639_s30  ;;  %p122_p8 = scmp.eq.s32.totalorder %s4057_s26, 1 }
  0x13   : > { %s4064_s7 = scalar_select %p3641_p5, 1, 0 }
  0x14   : > { %s4065_s8 = scalar_select %p3647_p6, 1, 0 }
  0x15   : > { %p2468_p9 = scmp.ge.s32.totalorder %s3549_s24, 1  ;;  %p207_p10 = scmp.lt.s32.totalorder %s3549_s24, 3 }
  0x16   : > { %p3656_p11 = por %p116_p7, %p44_p0  ;;  %p3660_p12 = por %p122_p8, %p50_p3 }
  0x17   : > { %p3664_p13 = pnand %p2468_p9, %p207_p10  ;;  %s3551_s12 = smov [#allocation6]  }
  0x18   : > { %s4066_s9 = scalar_select %p3656_p11, 1, 0 }
  0x19   : > { %s4067_s10 = scalar_select %p3660_p12, 1, 0 }
  0x1a   : > { %s4068_s11 = scalar_select %p3664_p13, 1, 0 }
  0x1b   : > { %p3130_p1 = pneg %p3664_p13  ;;  %s219_s13 = sshll.u32 %s3551_s12, 4  ;;  %s220_s13 = int_to_ptr.vmem [resolvable:$true] %s219_s13 }
  0x1c   : > { %s3552_s15 = smov [#allocation8]   ;;  %s3331_s19 = scalar_lea.hbm %s4046_s1, 9216 }
  0x1d   : > { %p3672_p2 = pnand %p3130_p1, %p4052_p4  ;;  %s232_s16 = sshll.u32 %s3552_s15, 4  ;;  %s3676_s16 = int_to_ptr.vmem [resolvable:$true] %s232_s16 }
  0x1e   : > { %p3332_p0 = scmp.ne.s32.totalorder %s4046_s1, %s3331_s19  ;;  %p3338_p9 = scmp.lt.u32.totalorder %s3331_s19, %s4046_s1 }
  0x1f   : > { %p3333_p3 = pneg %p3672_p2 }
  0x21   : > { %p3334_p7 = pnand %p3333_p3, %p3332_p0 }
  0x23   : > { %p3335_p8 = pneg %p3334_p7 }
  0x25   : > { %p3340_p10 = pnand %p3338_p9, %p3335_p8 }
  0x27   : > { %3343 = shalt.err (!%p3340_p10)
}
  0x28   : > { %s3344_s15 = scalar_lea.vmem %s220_s13, 9216  ;;  %p3352_p11 = scmp.lt.s32.totalorder %s220_s13, %s220_s13 }
  0x29   : > { %p3345_p1 = scmp.ne.s32.totalorder %s220_s13, %s3344_s15  ;;  %p3353_p6 = scmp.lt.s32.totalorder %s3344_s15, %s3344_s15 }
  0x2b   : > { %p3347_p4 = pnand %p3345_p1, %p3333_p3  ;;  %p3354_p13 = por %p3353_p6, %p3352_p11 }
  0x2d   : > { %p3348_p12 = pneg %p3347_p4 }
  0x2f   : > { %p3355_p5 = pnand %p3354_p13, %p3348_p12 }
  0x31   : > { %3358 = shalt.err (!%p3355_p5)
}
  0x32   : > { %s3553_s17 = smov 64   ;;  %s3554_s18 = smov 4  }
  0x33   : > { %3133 = dma.hbm_to_vmem [thread:$0]  (!%p3672_p2), %s4046_s1, 9216, %s220_s13, [#allocation7], %s3553_s17, %s3553_s17, %s3554_s18  }
  0x34   : > { %s3359_s12 = scalar_lea.hbm %s4047_s2, 1024 }
  0x35   : > { %p3360_p4 = scmp.ne.s32.totalorder %s4047_s2, %s3359_s12  ;;  %p3366_p11 = scmp.lt.u32.totalorder %s3359_s12, %s4047_s2 }
  0x37   : > { %p3362_p5 = pnand %p3360_p4, %p3333_p3 }
  0x39   : > { %p3363_p6 = pneg %p3362_p5 }
  0x3b   : > { %p3368_p12 = pnand %p3366_p11, %p3363_p6 }
  0x3d   : > { %3371 = shalt.err (!%p3368_p12)
}
  0x3e   : > { %s3372_s13 = scalar_lea.vmem %s3676_s16, 1024  ;;  %p3380_p8 = scmp.lt.s32.totalorder %s3676_s16, %s3676_s16 }
  0x3f   : > { %p3373_p13 = scmp.ne.s32.totalorder %s3676_s16, %s3372_s13  ;;  %p3381_p9 = scmp.lt.s32.totalorder %s3372_s13, %s3372_s13 }
  0x41   : > { %p3375_p0 = pnand %p3373_p13, %p3333_p3  ;;  %p3382_p10 = por %p3381_p9, %p3380_p8 }
  0x43   : > { %p3376_p7 = pneg %p3375_p0 }
  0x45   : > { %p3383_p1 = pnand %p3382_p10, %p3376_p7 }
  0x47   : > { %3386 = shalt.err (!%p3383_p1)
}
  0x48   : > { %3136 = dma.hbm_to_vmem [thread:$0]  (!%p3672_p2), %s4047_s2, 1024, %s3676_s16, [#allocation7], %s3553_s17, %s3553_s17, %s3554_s18  }
  0x49   : > { %p2471_p4 = scmp.ge.s32.totalorder %s3549_s24, 2 }
  0x4b   : > { %242 = sbr.rel (%p2471_p4) target bundleno = 98 (0x62), region = 24 }
  0x52   : > { %s246_s30 = sand.u32 1, %s3545_s23   ;;  %s3103_s19 = smul.u32 1152, %s3549_s24 }
  0x53   : > { %s3102_s14 = smul.u32 288, %s246_s30  ;;  %s3555_s20 = smov 2304  }
  0x54   : > { %p4070_p3 = scmp.ne.s32.totalorder %s4064_s7, 0  ;;  %s256_s28 = scalar_lea.hbm %s4045_s0, %s3103_s19 }
  0x55   : > { %s250_s12 = scalar_lea.vmem [#allocation3], %s3102_s14  ;;  %s3556_s13 = smov 1152  }
  0x56   : > { %3110 = sst [smem:[#allocation16]] (%p4070_p3), %s3555_s20  ;;  %s269_s15 = sshll.u32 %s250_s12, 4  ;;  %s270_s15 = int_to_ptr.vmem [resolvable:$true] %s269_s15 }
  0x57   : > { %s3109_s16 = scalar_select %p4070_p3, [#allocation0], [#allocation17] }
  0x58   : > { %3111 = sst [smem:[#allocation16 + $0x1]] (%p4070_p3), %s3556_s13  ;;  %s3557_s26 = smov 18  }
  0x59   : > { %s261_s29 = sld [smem:[%s3109_s16]]   ;;  %s3558_s27 = smov 64  }
  0x5a   : > { %3112 = sst [smem:[#allocation16 + $0x2]] (%p4070_p3), %s3557_s26  ;;  %s3559_s20 = smov 4  }
  0x5b   : > { %3113 = sst [smem:[#allocation16 + $0x3]] (%p4070_p3), %s3558_s27  ;;  %s247_s14 = scalar_lea.sflag [#allocation4], %s246_s30 }
  0x5c   : > { %3114 = sst [smem:[#allocation16 + $0x4]] (%p4070_p3), %s3558_s27  ;;  %s3560_s17 = smov [#allocation15]  }
  0x5d   : > { %3115 = sst [smem:[#allocation16 + $0x5]] (%p4070_p3), %s3559_s20 }
  0x5f   : > { %s2473_s19 = sshll.u32 %s261_s29, 26 }
  0x60   : > { %s2474_s16 = sadd.s32 134217728, %s2473_s19 }
  0x61   : > { %3116 = dma.general (%p4070_p3), %s256_s28, 4608, %s270_s15, %s247_s14, %s3560_s17, [#allocation16], %s2474_s16, 0  }
  0x62 PF: > { %p4071_p2 = scmp.ne.s32.totalorder %s4068_s11, 0 }
  0x63   : > { %s3752_s18 = sand.u32 (!%p4071_p2), 1, %s3541_s22   ;;  %p4072_p5 = scmp.ne.s32.totalorder (!%p4071_p2), %s4065_s8, 0 }
  0x64   : > { %294 = sbr.rel (%p4071_p2) target bundleno = 546 (0x222), region = 32  ;;  %s297_s13 = scalar_lea.sflag (!%p4071_p2), [#allocation4], %s3752_s18 }
  0x65   : > { %s3104_s12 = smul.u32 (!%p4071_p2), 288, %s3752_s18 }
  0x67   : > { %s3756_s26 = scalar_lea.vmem (!%p4071_p2), [#allocation3], %s3104_s12 }
  0x6b   : > { %3516 = dma.done.wait (%p4072_p5), %s297_s13, 4608  }
  0x6c   : > { %3518 = vsyncadd (%p4072_p5), %s297_s13, 4294962688  ;;  %p4073_p6 = scmp.eq.s32.totalorder %s3623_s25, 0 }
  0x6e   : > { %3520 = dma.done.wait (%p4073_p6), [#allocation7], 10240   ;;  %p4074_p11 = pmov %p4073_p6 }
  0x6f   : > { %v3199_v0 = vld [vmem:[#allocation6 + $0x40] sm:$0xff]   ;;  %v3202_v3 = vld [vmem:[#allocation6 + $0x48] sm:$0xff]   ;;  %v3205_v6 = vld [vmem:[#allocation6 + $0x50] sm:$0xff]   ;;  %s2478_s7 = sshll.u32 %s3752_s18, 5  ;;  %s2734_s30 = sshll.u32 %s3623_s25, 9 }
  0x70   : > { %3522 = vsyncadd (%p4074_p11), [#allocation7], 4294957056  ;;  %v3200_v1 = vld [vmem:[#allocation6 + $0x80] sm:$0xff]   ;;  %2782 = vmatprep.subr.bf16.mxu0 %v3199_v0  ;;  %v3203_v4 = vld [vmem:[#allocation6 + $0x88] sm:$0xff]   ;;  %s3861_s8 = scalar_lea.vmem [#allocation9], %s2478_s7  ;;  %s3877_s15 = scalar_lea.hbm %s4048_s3, %s2734_s30 }
  0x71   : > { %v3201_v2 = vld [vmem:[#allocation6] sm:$0xff]   ;;  %2950 = vmatprep.subr.bf16.mxu1 %v3200_v1  ;;  %v3204_v5 = vld [vmem:[#allocation6 + $0x8] sm:$0xff]   ;;  %v3206_v7 = vld [vmem:[#allocation6 + $0x90] sm:$0xff]   ;;  %s2240_s11 = sshll.u32 %s3861_s8, 4  ;;  %s3882_s27 = scalar_lea.vmem [#allocation12], %s2478_s7  ;;  %s3870_s11 = int_to_ptr.vmem [resolvable:$true] %s2240_s11 }
  0x72   : > { %2783 = vmatpush3.bf16.msra.mxu0 %v3201_v2  ;;  %2951 = vmatpush3.bf16.msra.mxu1 %v3200_v1  ;;  %v3207_v8 = vld [vmem:[#allocation6 + $0x10] sm:$0xff]   ;;  %v3208_v9 = vld [vmem:[#allocation6 + $0x58] sm:$0xff]   ;;  %v3211_v12 = vld [vmem:[#allocation6 + $0x60] sm:$0xff]   ;;  %s2212_s20 = scalar_lea.sflag [#allocation5], %s3752_s18  ;;  %s3387_s19 = scalar_lea.vmem %s3870_s11, 512 }
  0x73   : > { %2784 = vmatprep.subr.bf16.mxu0 %v3202_v3  ;;  %2952 = vmatprep.subr.bf16.mxu1 %v3203_v4  ;;  %v3209_v10 = vld [vmem:[#allocation6 + $0x98] sm:$0xff]   ;;  %v3212_v13 = vld [vmem:[#allocation6 + $0xa0] sm:$0xff]   ;;  %v3214_v15 = vld [vmem:[#allocation6 + $0x68] sm:$0xff]   ;;  %p3388_p12 = scmp.ne.s32.totalorder %s3870_s11, %s3387_s19  ;;  %p4075_p13 = scmp.ne.s32.totalorder %s4066_s9, 0 }
  0x74   : > { %v3210_v11 = vld [vmem:[#allocation6 + $0x18] sm:$0xff]   ;;  %v3213_v14 = vld [vmem:[#allocation6 + $0x20] sm:$0xff]   ;;  %v3215_v16 = vld [vmem:[#allocation6 + $0xa8] sm:$0xff]   ;;  %s3561_s16 = smov [#allocation9]  }
  0x75   : > { %v3216_v17 = vld [vmem:[#allocation6 + $0x28] sm:$0xff]   ;;  %v3217_v18 = vld [vmem:[#allocation6 + $0x70] sm:$0xff]   ;;  %v3220_v21 = vld [vmem:[#allocation6 + $0x78] sm:$0xff]   ;;  %p3389_p0 = pnand %p3388_p12, %p4075_p13  ;;  %s3391_s14 = sshll.u32 %s3561_s16, 4  ;;  %s3392_s14 = int_to_ptr.vmem [resolvable:$false] %s3391_s14 }
  0x76   : > { %2785 = vmatpush3.bf16.msra.mxu0 %v3204_v5  ;;  %2953 = vmatpush3.bf16.msra.mxu1 %v3203_v4  ;;  %v3218_v19 = vld [vmem:[#allocation6 + $0xb0] sm:$0xff]   ;;  %v3221_v22 = vld [vmem:[#allocation6 + $0xb8] sm:$0xff]   ;;  %v353_v24 = vld [vmem:[%s3756_s26] sm:$0xf]  ;;  %s3393_s17 = scalar_lea.vmem %s3392_s14, 1024  ;;  %p3394_p8 = scmp.lt.s32.totalorder %s3870_s11, %s3392_s14 }
  0x77   : > { %2786 = vmatprep.subr.bf16.mxu0 %v3205_v6  ;;  %2954 = vmatprep.subr.bf16.mxu1 %v3206_v7  ;;  %v3219_v20 = vld [vmem:[#allocation6 + $0x30] sm:$0xff]   ;;  %v354_v25 = vld [vmem:[%s3756_s26 + $0x8] sm:$0xf]  ;;  %v370_v26 = vld [vmem:[%s3756_s26 + $0x4] sm:$0x1]  ;;  %p3390_p7 = pneg %p3389_p0  ;;  %p3395_p9 = scmp.lt.s32.totalorder %s3393_s17, %s3387_s19 }
  0x78   : > { %v3223_v23 = vld [vmem:[%s3756_s26 + $0x48] ss:$8 sps:$4 sm:$0xff]   ;;  %v371_v27 = vld [vmem:[%s3756_s26 + $0xc] sm:$0x1]  ;;  %v2490_v28 = vcombine.low %v353_v24, %v370_v26  ;;  %v3222_v29 = vld [vmem:[#allocation6 + $0x38] sm:$0xff]   ;;  %v2498_v44 = vcombine.low %v353_v24, %v354_v25 }
  0x79   : > { %746 = vmatprep.mubr.bf16.mxu0 %v3223_v23  ;;  %v2491_v30 = vcombine.low %v354_v25, %v371_v27  ;;  %v3227_v33 = vld [vmem:[#allocation6 + $0x100] sm:$0xff]   ;;  %v355_v35 = vld [vmem:[%s3756_s26 + $0x10] sm:$0xf]  ;;  %v356_v38 = vld [vmem:[%s3756_s26 + $0x18] sm:$0xf]  ;;  %p3396_p10 = por %p3395_p9, %p3394_p8 }
  0x7a   : > { %2787 = vmatpush3.bf16.msra.mxu0 %v3207_v8  ;;  %2955 = vmatpush3.bf16.msra.mxu1 %v3206_v7  ;;  %v419_v31 = vshrl.u32 %v2490_v28, 16  ;;  %v421_v32 = vshll.u32 %v2490_v28, 16  ;;  %v3228_v34 = vld [vmem:[#allocation6 + $0x140] sm:$0xff]   ;;  %v372_v39 = vld [vmem:[%s3756_s26 + $0x14] sm:$0x1]  ;;  %v3232_v47 = vld [vmem:[#allocation6 + $0x108] sm:$0xff]   ;;  %v2501_v0 = vcombine.low %v355_v35, %v356_v38 }
  0x7b   : > { %2788 = vmatprep.subr.bf16.mxu0 %v3208_v9  ;;  %2956 = vmatprep.subr.bf16.mxu1 %v3209_v10  ;;  %v426_v36 = vshrl.u32 %v2491_v30, 16  ;;  %v428_v37 = vshll.u32 %v2491_v30, 16  ;;  %v373_v41 = vld [vmem:[%s3756_s26 + $0x1c] sm:$0x1]  ;;  %v2492_v42 = vcombine.low %v355_v35, %v372_v39  ;;  %v3231_v43 = vld [vmem:[#allocation6 + $0xc0] sm:$0xff]   ;;  %v3234_v57 = vld [vmem:[#allocation6 + $0xc8] sm:$0xff]   ;;  %p3397_p1 = pnand %p3396_p10, %p3390_p7 }
  0x7c   : > { %v423_v40 = vrot.slane %v421_v32, 1  ;;  %v2493_v46 = vcombine.low %v356_v38, %v373_v41  ;;  %v3235_v58 = vld [vmem:[%s3756_s26 + $0x58] ss:$8 sps:$4 sm:$0xff]   ;;  %v3237_v61 = vld [vmem:[#allocation6 + $0x110] sm:$0xff]   ;;  %v3233_v63 = vld [vmem:[#allocation6 + $0x148] sm:$0xff]  }
  0x7d   : > { %v430_v45 = vrot.slane %v428_v37, 1  ;;  %v433_v49 = vshrl.u32 %v2492_v42, 16  ;;  %v435_v50 = vshll.u32 %v2492_v42, 16  ;;  %v3239_v1 = vld [vmem:[#allocation6 + $0xd0] sm:$0xff]   ;;  %v3240_v3 = vld [vmem:[#allocation6 + $0x118] sm:$0xff]   ;;  %v3252_v23 = vld [vmem:[#allocation6 + $0xe8] sm:$0xff]  }
  0x7e   : > { %2789 = vmatpush3.bf16.msra.mxu0 %v3210_v11  ;;  %2957 = vmatpush3.bf16.msra.mxu1 %v3209_v10  ;;  %v424_v48 = vor.u32 %v423_v40, %v419_v31  ;;  %v440_v52 = vshrl.u32 %v2493_v46, 16  ;;  %v442_v53 = vshll.u32 %v2493_v46, 16  ;;  %v3238_v2 = vld [vmem:[#allocation6 + $0x150] sm:$0xff]   ;;  %v357_v5 = vld [vmem:[%s3756_s26 + $0x20] sm:$0xf]  ;;  %v3242_v9 = vld [vmem:[#allocation6 + $0xd8] sm:$0xff]  }
  0x7f   : > { %2790 = vmatprep.subr.bf16.mxu0 %v3211_v12  ;;  %2958 = vmatprep.subr.bf16.mxu1 %v3212_v13  ;;  %v431_v51 = vor.u32 %v430_v45, %v426_v36  ;;  %v437_v54 = vrot.slane %v435_v50, 1  ;;  %v3243_v4 = vld [vmem:[%s3756_s26 + $0x68] ss:$8 sps:$4 sm:$0xff]   ;;  %v374_v7 = vld [vmem:[%s3756_s26 + $0x24] sm:$0x1]  ;;  %v3260_v46 = vld [vmem:[#allocation6 + $0x138] sm:$0xff]  }
  0x80   : > { %v444_v56 = vrot.slane %v442_v53, 1  ;;  %v358_v6 = vld [vmem:[%s3756_s26 + $0x28] sm:$0xf]  ;;  %v375_v8 = vld [vmem:[%s3756_s26 + $0x2c] sm:$0x1]  ;;  %v2494_v10 = vcombine.low %v357_v5, %v374_v7  ;;  %v3247_v12 = vld [vmem:[#allocation6 + $0x120] sm:$0xff]  }
  0x81   : > { %v2500_v55 = vcombine.low %v424_v48, %v431_v51  ;;  %v438_v59 = vor.u32 %v437_v54, %v433_v49  ;;  %v2495_v11 = vcombine.low %v358_v6, %v375_v8  ;;  %v3253_v26 = vld [vmem:[%s3756_s26 + $0x78] ss:$8 sps:$4 sm:$0xff]   ;;  %v359_v27 = vld [vmem:[%s3756_s26 + $0x30] sm:$0xf]  ;;  %v377_v30 = vld [vmem:[%s3756_s26 + $0x3c] sm:$0x1] }
  0x82   : > { %2791 = vmatpush3.bf16.msra.mxu0 %v3213_v14  ;;  %2959 = vmatpush3.bf16.msra.mxu1 %v3212_v13  ;;  %v445_v60 = vor.u32 %v444_v56, %v440_v52  ;;  %v449_v13 = vshll.u32 %v2494_v10, 16  ;;  %v360_v28 = vld [vmem:[%s3756_s26 + $0x38] sm:$0xf]  ;;  %v3251_v35 = vld [vmem:[#allocation6 + $0x168] sm:$0xff]   ;;  %v3259_v42 = vld [vmem:[#allocation6 + $0xf0] sm:$0xff]  }
  0x83   : > { %2792 = vmatprep.subr.bf16.mxu0 %v3214_v15  ;;  %2960 = vmatprep.subr.bf16.mxu1 %v3215_v16  ;;  %v456_v14 = vshll.u32 %v2495_v11, 16  ;;  %v3241_v15 = vld [vmem:[#allocation6 + $0x158] sm:$0xff]   ;;  %v2507_v36 = vcombine.low %v359_v27, %v360_v28  ;;  %v2534_v51 = vld [vmem:[%s3756_s26 + $0x90] sm:$0xf]  ;;  %v2550_v54 = vld [vmem:[%s3756_s26 + $0x94] sm:$0x1] }
  0x84   : > { %2966 = vmatprep.mubr.bf16.mxu1 %v2500_v55  ;;  %v2503_v62 = vcombine.low %v438_v59, %v445_v60  ;;  %v3262_v49 = vld [vmem:[#allocation6 + $0xf8] sm:$0xff]   ;;  %v2558_v56 = vcombine.low %v2534_v51, %v2550_v54 }
  0x85   : > { %v458_v25 = vrot.slane %v456_v14, 1  ;;  %v3263_v50 = vld [vmem:[%s3756_s26 + $0xd8] ss:$8 sps:$4 sm:$0xff]   ;;  %v2551_v55 = vld [vmem:[%s3756_s26 + $0x9c] sm:$0x1] }
  0x86   : > { %2793 = vmatpush3.bf16.msra.mxu0 %v3216_v17  ;;  %2961 = vmatpush3.bf16.msra.mxu1 %v3215_v16  ;;  %v2504_v16 = vcombine.low %v357_v5, %v358_v6  ;;  %v447_v17 = vshrl.u32 %v2494_v10, 16  ;;  %v2535_v52 = vld [vmem:[%s3756_s26 + $0x98] sm:$0xf]  ;;  %v2553_v5 = vld [vmem:[%s3756_s26 + $0xac] sm:$0x1]  ;;  %v3271_v10 = vld [vmem:[#allocation6 + $0x180] sm:$0xff]  }
  0x87   : > { %2794 = vmatprep.subr.bf16.mxu0 %v3217_v18  ;;  %2962 = vmatprep.subr.bf16.mxu1 %v3218_v19  ;;  %v3249_v18 = vld [vmem:[#allocation6 + $0xe0] sm:$0xff]   ;;  %v3261_v59 = vld [vmem:[#allocation6 + $0x178] sm:$0xff]   ;;  %v2566_v60 = vcombine.low %v2534_v51, %v2535_v52 }
  0x8a   : > { %2795 = vmatpush3.bf16.msra.mxu0 %v3219_v20  ;;  %2963 = vmatpush3.bf16.msra.mxu1 %v3218_v19  ;;  %v451_v19 = vrot.slane %v449_v13, 1  ;;  %v3248_v20 = vld [vmem:[#allocation6 + $0x160] sm:$0xff]  }
  0x8b   : > { %2796 = vmatprep.subr.bf16.mxu0 %v3220_v21  ;;  %2964 = vmatprep.subr.bf16.mxu1 %v3221_v22  ;;  %v3250_v21 = vld [vmem:[#allocation6 + $0x128] sm:$0xff]  }
  0x8c   : > { %v452_v24 = vor.u32 %v451_v19, %v447_v17 }
  0x8e   : > { %2797 = vmatpush3.bf16.msra.mxu0 %v3222_v29  ;;  %2965 = vmatpush3.bf16.msra.mxu1 %v3221_v22  ;;  %v454_v22 = vshrl.u32 %v2495_v11, 16  ;;  %v376_v29 = vld [vmem:[%s3756_s26 + $0x34] sm:$0x1]  ;;  %v3272_v11 = vld [vmem:[#allocation6 + $0x1c8] sm:$0xff]  }
  0x8f   : > { %2834 = vmatprep.subr.bf16.mxu0 %v3227_v33  ;;  %2974 = vmatprep.subr.bf16.mxu1 %v3228_v34  ;;  %v2496_v32 = vcombine.low %v359_v27, %v376_v29  ;;  %v2497_v33 = vcombine.low %v360_v28, %v377_v30  ;;  %v3279_v27 = vld [vmem:[#allocation6 + $0x190] sm:$0xff]   ;;  %v3280_v28 = vld [vmem:[#allocation6 + $0x1d8] sm:$0xff]   ;;  %v3273_v30 = vld [vmem:[#allocation6 + $0x208] sm:$0xff]  }
  0x90   : > { %v459_v31 = vor.u32 %v458_v25, %v454_v22 }
  0x91   : > { %747 = vmatmul.mubr.bf16.vlgmr.msra.gmra.mrb[0].mxu0 %v2498_v44  ;;  %2967 = vmatmul.mubr.bf16.vlgmr.msra.gmra.mrb[0].mxu1 %v2503_v62  ;;  %v463_v38 = vshll.u32 %v2496_v32, 16  ;;  %v470_v39 = vshll.u32 %v2497_v33, 16  ;;  %v461_v40 = vshrl.u32 %v2496_v32, 16  ;;  %v468_v41 = vshrl.u32 %v2497_v33, 16  ;;  %v3278_v32 = vld [vmem:[#allocation6 + $0x210] sm:$0xff]  }
  0x92   : > { %2835 = vmatpush3.bf16.msra.mxu0 %v3231_v43  ;;  %754 = vmatprep.mubr.bf16.mxu0 %v3235_v58  ;;  %v2506_v37 = vcombine.low %v452_v24, %v459_v31  ;;  %v3258_v43 = vld [vmem:[#allocation6 + $0x170] sm:$0xff]   ;;  %v3267_v58 = vld [vmem:[#allocation6 + $0x1c0] sm:$0xff]   ;;  %v919_v62 = vshrl.u32 %v2558_v56, 16  ;;  %v3282_v31 = vld [vmem:[#allocation6 + $0x198] sm:$0xff]  }
  0x93   : > { %2836 = vmatprep.subr.bf16.mxu0 %v3232_v47  ;;  %2975 = vmatpush3.bf16.msra.mxu1 %v3228_v34  ;;  %v3257_v34 = vld [vmem:[#allocation6 + $0x130] sm:$0xff]   ;;  %v465_v44 = vrot.slane %v463_v38, 1  ;;  %v472_v45 = vrot.slane %v470_v39, 1  ;;  %v3283_v33 = vld [vmem:[%s3756_s26 + $0xf8] ss:$8 sps:$4 sm:$0xff]  }
  0x94   : > { %2976 = vmatprep.subr.bf16.mxu1 %v3233_v63  ;;  %2970 = vmatprep.mubr.bf16.mxu1 %v2506_v37  ;;  %v2555_v37 = vld [vmem:[%s3756_s26 + $0xbc] sm:$0x1] }
  0x95   : > { %v466_v47 = vor.u32 %v465_v44, %v461_v40  ;;  %v473_v48 = vor.u32 %v472_v45, %v468_v41  ;;  %v3287_v41 = vld [vmem:[#allocation6 + $0x1e0] sm:$0xff]  }
  0x96   : > { %2837 = vmatpush3.bf16.msra.mxu0 %v3234_v57  ;;  %v2559_v57 = vcombine.low %v2535_v52, %v2551_v55  ;;  %v3289_v45 = vld [vmem:[#allocation6 + $0x1a0] sm:$0xff]   ;;  %v3293_v52 = vld [vmem:[%s3756_s26 + $0x108] ss:$8 sps:$4 sm:$0xff]  }
  0x97   : > { %2838 = vmatprep.subr.bf16.mxu0 %v3237_v61  ;;  %2977 = vmatpush3.bf16.msra.mxu1 %v3233_v63  ;;  %v2509_v53 = vcombine.low %v466_v47, %v473_v48  ;;  %v2536_v61 = vld [vmem:[%s3756_s26 + $0xa0] sm:$0xf]  ;;  %v921_v63 = vshll.u32 %v2558_v56, 16  ;;  %v3297_v56 = vld [vmem:[#allocation6 + $0x1f0] sm:$0xff]  }
  0x98   : > { %2978 = vmatprep.subr.bf16.mxu1 %v3238_v2  ;;  %v2540_v55 = vld [vmem:[%s3756_s26 + $0xc0] sm:$0xf] }
  0x99   : > { %755 = vmatmul.mubr.bf16.gmra.mrb[4].mxu0 %v2501_v0  ;;  %2971 = vmatmul.mubr.bf16.gmra.mrb[4].mxu1 %v2509_v53  ;;  %v926_v0 = vshrl.u32 %v2559_v57, 16  ;;  %v923_v6 = vrot.slane %v921_v63, 1  ;;  %v3291_v63 = vld [vmem:[#allocation6 + $0x228] sm:$0xff]  }
  0x9a   : > { %2839 = vmatpush3.bf16.msra.mxu0 %v3239_v1  ;;  %762 = vmatprep.mubr.bf16.mxu0 %v3243_v4  ;;  %v928_v1 = vshll.u32 %v2559_v57, 16  ;;  %v2552_v4 = vld [vmem:[%s3756_s26 + $0xa4] sm:$0x1]  ;;  %v2541_v57 = vld [vmem:[%s3756_s26 + $0xc8] sm:$0xf] }
  0x9b   : > { %2840 = vmatprep.subr.bf16.mxu0 %v3240_v3  ;;  %2979 = vmatpush3.bf16.msra.mxu1 %v3238_v2  ;;  %v2537_v2 = vld [vmem:[%s3756_s26 + $0xa8] sm:$0xf]  ;;  %v3268_v3 = vld [vmem:[#allocation6 + $0x200] sm:$0xff]   ;;  %v2560_v8 = vcombine.low %v2536_v61, %v2552_v4 }
  0x9c   : > { %2980 = vmatprep.subr.bf16.mxu1 %v3241_v15  ;;  %v930_v7 = vrot.slane %v928_v1, 1  ;;  %v2569_v24 = vcombine.low %v2536_v61, %v2537_v2 }
  0x9d   : > { %v933_v14 = vshrl.u32 %v2560_v8, 16 }
  0x9e   : > { %2841 = vmatpush3.bf16.msra.mxu0 %v3242_v9  ;;  %v2561_v9 = vcombine.low %v2537_v2, %v2553_v5  ;;  %v931_v13 = vor.u32 %v930_v7, %v926_v0  ;;  %v2575_v0 = vcombine.low %v2540_v55, %v2541_v57  ;;  %v3299_v5 = vld [vmem:[#allocation6 + $0x1b0] sm:$0xff]   ;;  %v3300_v7 = vld [vmem:[#allocation6 + $0x1f8] sm:$0xff]  }
  0x9f   : > { %2842 = vmatprep.subr.bf16.mxu0 %v3247_v12  ;;  %2981 = vmatpush3.bf16.msra.mxu1 %v3241_v15  ;;  %v924_v12 = vor.u32 %v923_v6, %v919_v62  ;;  %v935_v15 = vshll.u32 %v2560_v8, 16 }
  0xa0   : > { %2982 = vmatprep.subr.bf16.mxu1 %v3248_v20  ;;  %v940_v17 = vshrl.u32 %v2561_v9, 16 }
  0xa1   : > { %763 = vmatmul.mubr.bf16.gmra.mrb[8].mxu0 %v2504_v16  ;;  %v3274_v16 = vld [vmem:[#allocation6 + $0x188] sm:$0xff]   ;;  %v2568_v19 = vcombine.low %v924_v12, %v931_v13  ;;  %v3302_v13 = vld [vmem:[#allocation6 + $0x1b8] sm:$0xff]  }
  0xa2   : > { %2843 = vmatpush3.bf16.msra.mxu0 %v3249_v18  ;;  %770 = vmatprep.mubr.bf16.mxu0 %v3253_v26  ;;  %v942_v18 = vshll.u32 %v2561_v9, 16 }
  0xa3   : > { %2844 = vmatprep.subr.bf16.mxu0 %v3250_v21  ;;  %2983 = vmatpush3.bf16.msra.mxu1 %v3248_v20  ;;  %v937_v20 = vrot.slane %v935_v15, 1  ;;  %v3277_v21 = vld [vmem:[#allocation6 + $0x1d0] sm:$0xff]   ;;  %v2602_v15 = vld [vmem:[%s3756_s26 + $0x8] sm:$0xf] }
  0xa4   : > { %2984 = vmatprep.subr.bf16.mxu1 %v3251_v35  ;;  %v944_v22 = vrot.slane %v942_v18, 1  ;;  %2990 = vmatprep.mubr.bf16.mxu1 %v2568_v19  ;;  %v2618_v18 = vld [vmem:[%s3756_s26 + $0xc] sm:$0x1]  ;;  %v2619_v19 = vld [vmem:[%s3756_s26 + $0x14] sm:$0x1] }
  0xa5   : > { %v938_v25 = vor.u32 %v937_v20, %v933_v14  ;;  %v3303_v14 = vld [vmem:[%s3756_s26 + $0x50] ss:$8 sps:$4 sm:$0xff]  }
  0xa6   : > { %2845 = vmatpush3.bf16.msra.mxu0 %v3252_v23  ;;  %v3275_v23 = vld [vmem:[%s3756_s26 + $0xe8] ss:$8 sps:$4 sm:$0xff]   ;;  %v945_v26 = vor.u32 %v944_v22, %v940_v17  ;;  %v3301_v22 = vld [vmem:[#allocation6 + $0x238] sm:$0xff]  }
  0xa7   : > { %2846 = vmatprep.subr.bf16.mxu0 %v3257_v34  ;;  %2985 = vmatpush3.bf16.msra.mxu1 %v3251_v35  ;;  %v2538_v34 = vld [vmem:[%s3756_s26 + $0xb0] sm:$0xf]  ;;  %v2539_v35 = vld [vmem:[%s3756_s26 + $0xb8] sm:$0xf] }
  0xa8   : > { %2986 = vmatprep.subr.bf16.mxu1 %v3258_v43  ;;  %v2571_v29 = vcombine.low %v938_v25, %v945_v26  ;;  %v2572_v39 = vcombine.low %v2538_v34, %v2539_v35  ;;  %v2563_v40 = vcombine.low %v2539_v35, %v2555_v37  ;;  %v2605_v25 = vld [vmem:[%s3756_s26 + $0x20] sm:$0xf]  ;;  %v2620_v26 = vld [vmem:[%s3756_s26 + $0x1c] sm:$0x1] }
  0xa9   : > { %771 = vmatmul.mubr.bf16.gmra.mrb[12].mxu0 %v2507_v36  ;;  %v2554_v36 = vld [vmem:[%s3756_s26 + $0xb4] sm:$0x1] }
  0xaa   : > { %2847 = vmatpush3.bf16.msra.mxu0 %v3259_v42  ;;  %1247 = vmatprep.mubr.bf16.mxu0 %v3263_v50  ;;  %v2562_v38 = vcombine.low %v2538_v34, %v2554_v36  ;;  %v3281_v42 = vld [vmem:[#allocation6 + $0x218] sm:$0xff]   ;;  %v956_v44 = vshll.u32 %v2563_v40, 16  ;;  %v3292_v50 = vld [vmem:[#allocation6 + $0x1a8] sm:$0xff]   ;;  %v954_v51 = vshrl.u32 %v2563_v40, 16 }
  0xab   : > { %2848 = vmatprep.subr.bf16.mxu0 %v3260_v46  ;;  %2987 = vmatpush3.bf16.msra.mxu1 %v3258_v43  ;;  %v3290_v46 = vld [vmem:[#allocation6 + $0x1e8] sm:$0xff]  }
  0xac   : > { %2988 = vmatprep.subr.bf16.mxu1 %v3261_v59  ;;  %v949_v43 = vshll.u32 %v2562_v38, 16  ;;  %v947_v47 = vshrl.u32 %v2562_v38, 16  ;;  %v958_v54 = vrot.slane %v956_v44, 1 }
  0xae   : > { %2849 = vmatpush3.bf16.msra.mxu0 %v3262_v49  ;;  %v951_v48 = vrot.slane %v949_v43, 1  ;;  %v3288_v49 = vld [vmem:[#allocation6 + $0x220] sm:$0xff]  }
  0xaf   : > { %2886 = vmatprep.subr.bf16.mxu0 %v3267_v58  ;;  %2989 = vmatpush3.bf16.msra.mxu1 %v3261_v59  ;;  %v2556_v58 = vld [vmem:[%s3756_s26 + $0xc4] sm:$0x1]  ;;  %v2557_v59 = vld [vmem:[%s3756_s26 + $0xcc] sm:$0x1] }
  0xb0   : > { %2998 = vmatprep.subr.bf16.mxu1 %v3268_v3  ;;  %v952_v53 = vor.u32 %v951_v48, %v947_v47  ;;  %v2564_v61 = vcombine.low %v2540_v55, %v2556_v58  ;;  %v2565_v62 = vcombine.low %v2541_v57, %v2557_v59  ;;  %v2606_v48 = vld [vmem:[%s3756_s26 + $0x28] sm:$0xf]  ;;  %v3834_v57 = vld [vmem:[%s3756_s26 + $0x40] sm:$0xf] }
  0xb1   : > { %1248 = vmatmul.mubr.bf16.vlgmr.msra.gmra.mrb[16].mxu0 %v2566_v60  ;;  %v959_v60 = vor.u32 %v958_v54, %v954_v51 }
  0xb2   : > { %2887 = vmatpush3.bf16.msra.mxu0 %v3271_v10  ;;  %1255 = vmatprep.mubr.bf16.mxu0 %v3275_v23  ;;  %v963_v2 = vshll.u32 %v2564_v61, 16  ;;  %v961_v4 = vshrl.u32 %v2564_v61, 16  ;;  %v968_v6 = vshrl.u32 %v2565_v62, 16  ;;  %v3298_v10 = vld [vmem:[#allocation6 + $0x230] sm:$0xff]   ;;  %v2626_v23 = vcombine.low %v2602_v15, %v2618_v18  ;;  %v2625_v61 = vld [vmem:[%s3756_s26 + $0x44] sm:$0x1] }
  0xb3   : > { %2888 = vmatprep.subr.bf16.mxu0 %v3272_v11  ;;  %2991 = vmatmul.mubr.bf16.vlgmr.msra.gmra.mrb[0].mxu1 %v2571_v29  ;;  %v2574_v1 = vcombine.low %v952_v53, %v959_v60  ;;  %v2623_v53 = vld [vmem:[%s3756_s26 + $0x34] sm:$0x1]  ;;  %v2624_v60 = vld [vmem:[%s3756_s26 + $0x3c] sm:$0x1] }
  0xb4   : > { %2999 = vmatpush3.bf16.msra.mxu1 %v3268_v3  ;;  %v970_v3 = vshll.u32 %v2565_v62, 16  ;;  %v965_v8 = vrot.slane %v963_v2, 1 }
  0xb5   : > { %3000 = vmatprep.subr.bf16.mxu1 %v3273_v30  ;;  %2994 = vmatprep.mubr.bf16.mxu1 %v2574_v1 }
  0xb6   : > { %2889 = vmatpush3.bf16.msra.mxu0 %v3274_v16  ;;  %v972_v9 = vrot.slane %v970_v3, 1  ;;  %v966_v11 = vor.u32 %v965_v8, %v961_v4  ;;  %v2603_v16 = vld [vmem:[%s3756_s26 + $0x10] sm:$0xf]  ;;  %v2633_v4 = vcombine.low %v3834_v57, %v2625_v61 }
  0xb7   : > { %2890 = vmatprep.subr.bf16.mxu0 %v3277_v21  ;;  %v2634_v20 = vcombine.low %v2602_v15, %v2603_v16  ;;  %v3812_v21 = vld [vmem:[%s3756_s26 + $0x18] sm:$0xf]  ;;  %v3321_v15 = vld [vmem:[#allocation8 + $0x20] sm:$0xff]  }
  0xb8   : > { %3001 = vmatpush3.bf16.msra.mxu1 %v3273_v30  ;;  %v973_v12 = vor.u32 %v972_v9, %v968_v6  ;;  %v3818_v30 = vld [vmem:[#allocation8] sm:$0xff]   ;;  %v2637_v55 = vcombine.low %v3812_v21, %v2605_v25 }
  0xb9   : > { %1256 = vmatmul.mubr.bf16.gmra.mrb[20].mxu0 %v2569_v24  ;;  %3002 = vmatprep.subr.bf16.mxu1 %v3278_v32  ;;  %v2627_v24 = vcombine.low %v2603_v16, %v2619_v19 }
  0xba   : > { %2891 = vmatpush3.bf16.msra.mxu0 %v3279_v27  ;;  %1263 = vmatprep.mubr.bf16.mxu0 %v3283_v33  ;;  %v2577_v17 = vcombine.low %v966_v11, %v973_v12  ;;  %v2621_v27 = vld [vmem:[%s3756_s26 + $0x24] sm:$0x1]  ;;  %v1487_v11 = vshll.u32 %v2633_v4, 16 }
  0xbb   : > { %2892 = vmatprep.subr.bf16.mxu0 %v3280_v28  ;;  %v2628_v28 = vcombine.low %v3812_v21, %v2620_v26  ;;  %v2629_v29 = vcombine.low %v2605_v25, %v2621_v27  ;;  %v1443_v33 = vshrl.u32 %v2627_v24, 16  ;;  %v1445_v34 = vshll.u32 %v2627_v24, 16  ;;  %v3323_v24 = vld [vmem:[%s3756_s26 + $0x80] ss:$8 sps:$4 sm:$0xff]   ;;  %v3325_v26 = vld [vmem:[#allocation8 + $0x30] sm:$0xff]  }
  0xbc   : > { %3003 = vmatpush3.bf16.msra.mxu1 %v3278_v32  ;;  %v1438_v32 = vshll.u32 %v2626_v23, 16  ;;  %v3329_v25 = vld [vmem:[%s3756_s26 + $0xf8] ss:$8 sps:$4 sm:$0xff]  }
  0xbd   : > { %3004 = vmatprep.subr.bf16.mxu1 %v3281_v42  ;;  %2995 = vmatmul.mubr.bf16.gmra.mrb[4].mxu1 %v2577_v17  ;;  %v1450_v35 = vshrl.u32 %v2628_v28, 16  ;;  %v1452_v36 = vshll.u32 %v2628_v28, 16  ;;  %v1457_v37 = vshrl.u32 %v2629_v29, 16  ;;  %v1459_v38 = vshll.u32 %v2629_v29, 16  ;;  %v3327_v28 = vld [vmem:[%s3756_s26 + $0xd8] ss:$8 sps:$4 sm:$0xff]  }
  0xbe   : > { %2893 = vmatpush3.bf16.msra.mxu0 %v3282_v31  ;;  %v1436_v31 = vshrl.u32 %v2626_v23, 16  ;;  %v1447_v40 = vrot.slane %v1445_v34, 1  ;;  %v1489_v17 = vrot.slane %v1487_v11, 1  ;;  %v3326_v29 = vld [vmem:[#allocation8 + $0x38] sm:$0xff]  }
  0xbf   : > { %2894 = vmatprep.subr.bf16.mxu0 %v3287_v41  ;;  %v3310_v41 = vld [vmem:[#allocation8 + $0x8] sm:$0xff]   ;;  %v1454_v43 = vrot.slane %v1452_v36, 1  ;;  %v1461_v44 = vrot.slane %v1459_v38, 1 }
  0xc0   : > { %3005 = vmatpush3.bf16.msra.mxu1 %v3281_v42  ;;  %v3822_v42 = vld [vmem:[#allocation8 + $0x10] sm:$0xff]   ;;  %v1448_v47 = vor.u32 %v1447_v40, %v1443_v33 }
  0xc1   : > { %1264 = vmatmul.mubr.bf16.gmra.mrb[24].mxu0 %v2572_v39  ;;  %3006 = vmatprep.subr.bf16.mxu1 %v3288_v49  ;;  %v1440_v39 = vrot.slane %v1438_v32, 1  ;;  %v1455_v51 = vor.u32 %v1454_v43, %v1450_v35 }
  0xc2   : > { %2895 = vmatpush3.bf16.msra.mxu0 %v3289_v45  ;;  %1271 = vmatprep.mubr.bf16.mxu0 %v3293_v52  ;;  %v3311_v45 = vld [vmem:[%s3756_s26 + $0x60] ss:$8 sps:$4 sm:$0xff]   ;;  %v1462_v52 = vor.u32 %v1461_v44, %v1457_v37 }
  0xc3   : > { %2896 = vmatprep.subr.bf16.mxu0 %v3290_v46  ;;  %v1441_v46 = vor.u32 %v1440_v39, %v1436_v31  ;;  %v3330_v31 = vld [vmem:[%s3756_s26 + $0x108] ss:$8 sps:$4 sm:$0xff]  }
  0xc4   : > { %3007 = vmatpush3.bf16.msra.mxu1 %v3288_v49  ;;  %v2607_v49 = vld [vmem:[%s3756_s26 + $0x30] sm:$0xf]  ;;  %v2639_v62 = vcombine.low %v1455_v51, %v1462_v52 }
  0xc5   : > { %3008 = vmatprep.subr.bf16.mxu1 %v3291_v63  ;;  %v2636_v58 = vcombine.low %v1441_v46, %v1448_v47  ;;  %v2631_v59 = vcombine.low %v2607_v49, %v2623_v53  ;;  %v2640_v19 = vcombine.low %v2606_v48, %v2607_v49 }
  0xc6   : > { %2897 = vmatpush3.bf16.msra.mxu0 %v3292_v50  ;;  %v2622_v50 = vld [vmem:[%s3756_s26 + $0x2c] sm:$0x1] }
  0xc7   : > { %2898 = vmatprep.subr.bf16.mxu0 %v3297_v56  ;;  %v2630_v54 = vcombine.low %v2606_v48, %v2622_v50  ;;  %v3831_v56 = vld [vmem:[%s3756_s26 + $0x38] sm:$0xf]  ;;  %3014 = vmatprep.mubr.bf16.mxu1 %v2636_v58  ;;  %v1471_v2 = vshrl.u32 %v2631_v59, 16  ;;  %v1473_v3 = vshll.u32 %v2631_v59, 16 }
  0xc8   : > { %3009 = vmatpush3.bf16.msra.mxu1 %v3291_v63  ;;  %v2632_v1 = vcombine.low %v3831_v56, %v2624_v60  ;;  %v2643_v27 = vcombine.low %v3831_v56, %v3834_v57 }
  0xc9   : > { %1272 = vmatmul.mubr.bf16.gmra.mrb[28].mxu0 %v2575_v0  ;;  %3010 = vmatprep.subr.bf16.mxu1 %v3298_v10  ;;  %v1464_v63 = vshrl.u32 %v2630_v54, 16  ;;  %v1466_v0 = vshll.u32 %v2630_v54, 16  ;;  %v1475_v9 = vrot.slane %v1473_v3, 1 }
  0xca   : > { %2899 = vmatpush3.bf16.msra.mxu0 %v3299_v5  ;;  %1764 = vmatprep.mubr.bf16.mxu0 %v3303_v14  ;;  %v3318_v5 = vld [vmem:[#allocation8 + $0x18] sm:$0xff]   ;;  %v1480_v8 = vshll.u32 %v2632_v1, 16 }
  0xcb   : > { %2900 = vmatprep.subr.bf16.mxu0 %v3300_v7  ;;  %v1468_v6 = vrot.slane %v1466_v0, 1  ;;  %v1478_v7 = vshrl.u32 %v2632_v1, 16  ;;  %v3319_v14 = vld [vmem:[%s3756_s26 + $0x70] ss:$8 sps:$4 sm:$0xff]   ;;  %v1476_v16 = vor.u32 %v1475_v9, %v1471_v2 }
  0xcc   : > { %3011 = vmatpush3.bf16.msra.mxu1 %v3298_v10  ;;  %v1485_v10 = vshrl.u32 %v2633_v4, 16 }
  0xcd   : > { %3012 = vmatprep.subr.bf16.mxu1 %v3301_v22  ;;  %v1469_v12 = vor.u32 %v1468_v6, %v1464_v63 }
  0xce   : > { %2901 = vmatpush3.bf16.msra.mxu0 %v3302_v13  ;;  %v1482_v13 = vrot.slane %v1480_v8, 1  ;;  %v1490_v21 = vor.u32 %v1489_v17, %v1485_v10 }
  0xcf   : > { %3022 = vmatprep.subr.bf16.mxu0 %v3818_v30 }
  0xd0   : > { %3013 = vmatpush3.bf16.msra.mxu1 %v3301_v22  ;;  %v1483_v18 = vor.u32 %v1482_v13, %v1478_v7  ;;  %v3322_v22 = vld [vmem:[#allocation8 + $0x28] sm:$0xff]  }
  0xd1   : > { %1765 = vmatmul.mubr.bf16.vlgmr.msra.gmra.mrb[32].mxu0 %v2634_v20  ;;  %3046 = vmatprep.subr.bf16.mxu1 %v3818_v30  ;;  %v2642_v20 = vcombine.low %v1469_v12, %v1476_v16 }
  0xd2   : > { %3023 = vmatpush3.bf16.msra.mxu0 %v3818_v30  ;;  %1772 = vmatprep.mubr.bf16.mxu0 %v3311_v45  ;;  %v2645_v23 = vcombine.low %v1483_v18, %v1490_v21 }
  0xd3   : > { %3024 = vmatprep.subr.bf16.mxu0 %v3310_v41  ;;  %3015 = vmatmul.mubr.bf16.vlgmr.msra.gmra.mrb[0].mxu1 %v2639_v62 }
  0xd4   : > { %3054 = vmatpush3.bf16.msra.mxu1 %v3818_v30  ;;  %3018 = vmatprep.mubr.bf16.mxu1 %v2642_v20  ;;  %v3328_v30 = vld [vmem:[%s3756_s26 + $0xe8] ss:$8 sps:$4 sm:$0xff]  }
  0xd5   : > { %3047 = vmatprep.subr.bf16.mxu1 %v3310_v41 }
  0xd6   : > { %3025 = vmatpush3.bf16.msra.mxu0 %v3310_v41 }
  0xd7   : > { %3026 = vmatprep.subr.bf16.mxu0 %v3822_v42 }
  0xd8   : > { %3055 = vmatpush3.bf16.msra.mxu1 %v3310_v41 }
  0xd9   : > { %1773 = vmatmul.mubr.bf16.gmra.mrb[36].mxu0 %v2637_v55  ;;  %3048 = vmatprep.subr.bf16.mxu1 %v3822_v42 }
  0xda   : > { %3027 = vmatpush3.bf16.msra.mxu0 %v3822_v42  ;;  %1780 = vmatprep.mubr.bf16.mxu0 %v3319_v14 }
  0xdb   : > { %3028 = vmatprep.subr.bf16.mxu0 %v3318_v5  ;;  %3019 = vmatmul.mubr.bf16.gmra.mrb[4].mxu1 %v2645_v23 }
  0xdc   : > { %3056 = vmatpush3.bf16.msra.mxu1 %v3822_v42  ;;  %3042 = vmatprep.mubr.bf16.mxu1 %v3329_v25 }
  0xdd   : > { %3049 = vmatprep.subr.bf16.mxu1 %v3318_v5 }
  0xde   : > { %3029 = vmatpush3.bf16.msra.mxu0 %v3318_v5 }
  0xdf   : > { %3030 = vmatprep.subr.bf16.mxu0 %v3321_v15 }
  0xe0   : > { %3057 = vmatpush3.bf16.msra.mxu1 %v3318_v5 }
  0xe1   : > { %1781 = vmatmul.mubr.bf16.gmra.mrb[40].mxu0 %v2640_v19  ;;  %3050 = vmatprep.subr.bf16.mxu1 %v3321_v15 }
  0xe2   : > { %3031 = vmatpush3.bf16.msra.mxu0 %v3321_v15  ;;  %1788 = vmatprep.mubr.bf16.mxu0 %v3323_v24 }
  0xe3   : > { %3032 = vmatprep.subr.bf16.mxu0 %v3322_v22 }
  0xe4   : > { %3058 = vmatpush3.bf16.msra.mxu1 %v3321_v15 }
  0xe5   : > { %3051 = vmatprep.subr.bf16.mxu1 %v3322_v22 }
  0xe6   : > { %3033 = vmatpush3.bf16.msra.mxu0 %v3322_v22 }
  0xe7   : > { %3034 = vmatprep.subr.bf16.mxu0 %v3325_v26 }
  0xe8   : > { %3059 = vmatpush3.bf16.msra.mxu1 %v3322_v22 }
  0xe9   : > { %1789 = vmatmul.mubr.bf16.gmra.mrb[44].mxu0 %v2643_v27  ;;  %3052 = vmatprep.subr.bf16.mxu1 %v3325_v26 }
  0xea   : > { %3035 = vmatpush3.bf16.msra.mxu0 %v3325_v26  ;;  %3038 = vmatprep.mubr.bf16.mxu0 %v3327_v28 }
  0xeb   : > { %3036 = vmatprep.subr.bf16.mxu0 %v3326_v29 }
  0xec   : > { %3060 = vmatpush3.bf16.msra.mxu1 %v3325_v26 }
  0xed   : > { %3053 = vmatprep.subr.bf16.mxu1 %v3326_v29 }
  0xee   : > { %3037 = vmatpush3.bf16.msra.mxu0 %v3326_v29 }
  0xf0   : > { %3061 = vmatpush3.bf16.msra.mxu1 %v3326_v29 }
  0xf1   : > { %3039 = vmatmul.mubr.bf16.vlgmr.msra.gmra.mrb[48].mxu0 %v3328_v30 }
  0xf3   : > { %3043 = vmatmul.mubr.bf16.vlgmr.msra.gmra.mrb[8].mxu1 %v3330_v31 }
 0x164   : > { %v2798_v32 = vpop.f32.mrb[0].mxu0 }
 0x165   : > { %v2799_v33 = vpop.f32.mrb[1].mxu0 }
 0x166   : > { %v2800_v34 = vadd.f32 %v2799_v33, %v2798_v32  ;;  %v2801_v35 = vpop.f32.mrb[2].mxu0 }
 0x167   : > { %v2802_v36 = vpop.f32.mrb[3].mxu0 }
 0x168   : > { %v2803_v37 = vadd.f32 %v2802_v36, %v2801_v35 }
 0x16c   : > { %v2804_v38 = vpop.f32.mrb[4].mxu0 }
 0x16d   : > { %v2805_v39 = vpop.f32.mrb[5].mxu0 }
 0x16e   : > { %v2806_v40 = vadd.f32 %v2805_v39, %v2804_v38  ;;  %v2807_v41 = vpop.f32.mrb[6].mxu0 }
 0x16f   : > { %v2808_v42 = vpop.f32.mrb[7].mxu0 }
 0x170   : > { %v2809_v43 = vadd.f32 %v2808_v42, %v2807_v41 }
 0x174   : > { %v2810_v44 = vpop.f32.mrb[8].mxu0 }
 0x175   : > { %v2811_v45 = vpop.f32.mrb[9].mxu0 }
 0x176   : > { %v2812_v46 = vadd.f32 %v2811_v45, %v2810_v44  ;;  %v2813_v47 = vpop.f32.mrb[10].mxu0 }
 0x177   : > { %v2814_v48 = vpop.f32.mrb[11].mxu0 }
 0x178   : > { %v2815_v49 = vadd.f32 %v2814_v48, %v2813_v47 }
 0x17c   : > { %v2816_v50 = vpop.f32.mrb[12].mxu0 }
 0x17d   : > { %v2817_v51 = vpop.f32.mrb[13].mxu0 }
 0x17e   : > { %v2818_v52 = vadd.f32 %v2817_v51, %v2816_v50  ;;  %v2819_v53 = vpop.f32.mrb[14].mxu0 }
 0x17f   : > { %v2820_v54 = vpop.f32.mrb[15].mxu0 }
 0x180   : > { %v2821_v55 = vadd.f32 %v2820_v54, %v2819_v53 }
 0x184   : > { %v2850_v56 = vpop.f32.mrb[16].mxu0 }
 0x185   : > { %v2851_v57 = vpop.f32.mrb[17].mxu0 }
 0x186   : > { %v2852_v58 = vadd.f32 %v2851_v57, %v2850_v56  ;;  %v2853_v59 = vpop.f32.mrb[18].mxu0 }
 0x187   : > { %v2854_v60 = vpop.f32.mrb[19].mxu0 }
 0x188   : > { %v3065_v61 = vadd.f32 %v2852_v58, %v2800_v34  ;;  %v2855_v62 = vadd.f32 %v2854_v60, %v2853_v59 }
 0x18a   : > { %v3071_v63 = vadd.f32 %v2855_v62, %v2803_v37 }
 0x18c   : > { %v2856_v0 = vpop.f32.mrb[20].mxu0 }
 0x18d   : > { %v2857_v1 = vpop.f32.mrb[21].mxu0 }
 0x18e   : > { %v2858_v2 = vadd.f32 %v2857_v1, %v2856_v0  ;;  %v2859_v3 = vpop.f32.mrb[22].mxu0 }
 0x18f   : > { %v2860_v4 = vpop.f32.mrb[23].mxu0 }
 0x190   : > { %v3062_v5 = vadd.f32 %v2858_v2, %v2806_v40  ;;  %v2861_v6 = vadd.f32 %v2860_v4, %v2859_v3 }
 0x192   : > { %v3068_v7 = vadd.f32 %v2861_v6, %v2809_v43 }
 0x194   : > { %v2862_v8 = vpop.f32.mrb[24].mxu0 }
 0x195   : > { %v2863_v9 = vpop.f32.mrb[25].mxu0 }
 0x196   : > { %v2864_v10 = vadd.f32 %v2863_v9, %v2862_v8  ;;  %v2865_v11 = vpop.f32.mrb[26].mxu0 }
 0x197   : > { %v2866_v12 = vpop.f32.mrb[27].mxu0 }
 0x198   : > { %v3077_v13 = vadd.f32 %v2864_v10, %v2812_v46  ;;  %v2867_v14 = vadd.f32 %v2866_v12, %v2865_v11 }
 0x19a   : > { %v3083_v15 = vadd.f32 %v2867_v14, %v2815_v49 }
 0x19c   : > { %v2868_v16 = vpop.f32.mrb[28].mxu0 }
 0x19d   : > { %v2869_v17 = vpop.f32.mrb[29].mxu0 }
 0x19e   : > { %v2870_v18 = vadd.f32 %v2869_v17, %v2868_v16  ;;  %v2871_v19 = vpop.f32.mrb[30].mxu0 }
 0x19f   : > { %v2872_v20 = vpop.f32.mrb[31].mxu0 }
 0x1a0   : > { %v3854_v21 = vadd.f32 %v2870_v18, %v2818_v52  ;;  %v2873_v22 = vadd.f32 %v2872_v20, %v2871_v19 }
 0x1a2   : > { %v3856_v23 = vadd.f32 %v2873_v22, %v2821_v55 }
 0x1a4   : > { %v2902_v24 = vpop.f32.mrb[32].mxu0 }
 0x1a5   : > { %v2903_v25 = vpop.f32.mrb[33].mxu0 }
 0x1a6   : > { %v2904_v26 = vadd.f32 %v2903_v25, %v2902_v24  ;;  %v2905_v27 = vpop.f32.mrb[34].mxu0  ;;  %v3016_v33 = vpop.f32.mrb[0].mxu1 }
 0x1a7   : > { %v2906_v28 = vpop.f32.mrb[35].mxu0  ;;  %v1831_v35 = vpop.f32.mrb[1].mxu1 }
 0x1a8   : > { %v3066_v29 = vadd.f32 %v3065_v61, %v2904_v26  ;;  %v2907_v30 = vadd.f32 %v2906_v28, %v2905_v27  ;;  %v3017_v39 = vpop.f32.mrb[2].mxu1 }
 0x1a9   : > { %v1834_v41 = vpop.f32.mrb[3].mxu1 }
 0x1aa   : > { %v3072_v31 = vadd.f32 %v3071_v63, %v2907_v30  ;;  %v3067_v38 = vadd.f32 %v3066_v29, %v1831_v35 }
 0x1ac   : > { %v2908_v32 = vpop.f32.mrb[36].mxu0  ;;  %v3073_v44 = vadd.f32 %v3072_v31, %v1834_v41  ;;  %v1947_v47 = vmul.f32 %v3067_v38, %v3067_v38 }
 0x1ad   : > { %v2909_v34 = vpop.f32.mrb[37].mxu0 }
 0x1ae   : > { %v2910_v36 = vadd.f32 %v2909_v34, %v2908_v32  ;;  %v2911_v37 = vpop.f32.mrb[38].mxu0  ;;  %v2739_v48 = vpack.c.bf16 %v3073_v44, %v3067_v38  ;;  %v1934_v49 = vadd.f32 %v3073_v44, %v3067_v38  ;;  %v1948_v50 = vmul.f32 %v3073_v44, %v3073_v44  ;;  %v3020_v55 = vpop.f32.mrb[4].mxu1 }
 0x1af   : > { %v2912_v40 = vpop.f32.mrb[39].mxu0  ;;  %v1847_v58 = vpop.f32.mrb[5].mxu1 }
 0x1b0   : > { %v3063_v42 = vadd.f32 %v3062_v5, %v2910_v36  ;;  %v2913_v43 = vadd.f32 %v2912_v40, %v2911_v37  ;;  %2740 = vst [vmem:[%s3861_s8] sm:$0xff] %v2739_v48   ;;  %v1955_v54 = vadd.f32 %v1948_v50, %v1947_v47  ;;  %v3021_v0 = vpop.f32.mrb[6].mxu1 }
 0x1b1   : > { %v1850_v3 = vpop.f32.mrb[7].mxu1 }
 0x1b2   : > { %v3064_v45 = vadd.f32 %v3063_v42, %v3016_v33  ;;  %v3069_v46 = vadd.f32 %v3068_v7, %v2913_v43 }
 0x1b4   : > { %v1949_v51 = vmul.f32 %v3064_v45, %v3064_v45  ;;  %v3070_v52 = vadd.f32 %v3069_v46, %v3017_v39  ;;  %v2914_v53 = vpop.f32.mrb[40].mxu0  ;;  %v1935_v56 = vadd.f32 %v3064_v45, %v1934_v49 }
 0x1b5   : > { %v2915_v57 = vpop.f32.mrb[41].mxu0 }
 0x1b6   : > { %v2744_v59 = vpack.c.bf16 %v3070_v52, %v3064_v45  ;;  %v1950_v60 = vmul.f32 %v3070_v52, %v3070_v52  ;;  %v2916_v61 = vadd.f32 %v2915_v57, %v2914_v53  ;;  %v2917_v62 = vpop.f32.mrb[42].mxu0  ;;  %v1956_v63 = vadd.f32 %v1955_v54, %v1949_v51 }
 0x1b7   : > { %v1936_v1 = vadd.f32 %v3070_v52, %v1935_v56  ;;  %v2918_v2 = vpop.f32.mrb[43].mxu0 }
 0x1b8   : > { %2776 = vst [vmem:[%s3861_s8 + $0x8] sm:$0xff] %v2744_v59   ;;  %v3078_v4 = vadd.f32 %v3077_v13, %v2916_v61  ;;  %v2919_v5 = vadd.f32 %v2918_v2, %v2917_v62  ;;  %v1957_v6 = vadd.f32 %v1956_v63, %v1950_v60 }
 0x1ba   : > { %v3079_v7 = vadd.f32 %v3078_v4, %v1847_v58  ;;  %v3084_v8 = vadd.f32 %v3083_v15, %v2919_v5 }
 0x1bc   : > { %v1937_v9 = vadd.f32 %v3079_v7, %v1936_v1  ;;  %v1951_v10 = vmul.f32 %v3079_v7, %v3079_v7  ;;  %v3085_v11 = vadd.f32 %v3084_v8, %v1850_v3  ;;  %v2920_v12 = vpop.f32.mrb[44].mxu0 }
 0x1bd   : > { %v2921_v14 = vpop.f32.mrb[45].mxu0 }
 0x1be   : > { %v1958_v16 = vadd.f32 %v1957_v6, %v1951_v10  ;;  %v2749_v17 = vpack.c.bf16 %v3085_v11, %v3079_v7  ;;  %v1938_v18 = vadd.f32 %v3085_v11, %v1937_v9  ;;  %v1952_v19 = vmul.f32 %v3085_v11, %v3085_v11  ;;  %v2923_v20 = vpop.f32.mrb[46].mxu0 }
 0x1bf   : > { %v2922_v22 = vadd.f32 %v2921_v14, %v2920_v12  ;;  %v2924_v13 = vpop.f32.mrb[47].mxu0 }
 0x1c0   : > { %2777 = vst [vmem:[%s3861_s8 + $0x10] sm:$0xff] %v2749_v17   ;;  %v1959_v24 = vadd.f32 %v1958_v16, %v1952_v19  ;;  %v2925_v25 = vadd.f32 %v2924_v13, %v2923_v20 }
 0x1c1   : > { %v3075_v15 = vadd.f32 %v3854_v21, %v2922_v22 }
 0x1c2   : > { %v3081_v26 = vadd.f32 %v3856_v23, %v2925_v25 }
 0x1c3   : > { %v3076_v27 = vadd.f32 %v3075_v15, %v3020_v55 }
 0x1c4   : > { %v3082_v28 = vadd.f32 %v3081_v26, %v3021_v0  ;;  %v3040_v29 = vpop.f32.mrb[48].mxu0 }
 0x1c5   : > { %v1939_v30 = vadd.f32 %v3076_v27, %v1938_v18  ;;  %v1953_v31 = vmul.f32 %v3076_v27, %v3076_v27  ;;  %v2103_v32 = vpop.f32.mrb[49].mxu0 }
 0x1c6   : > { %v2754_v21 = vpack.c.bf16 %v3082_v28, %v3076_v27  ;;  %v1954_v23 = vmul.f32 %v3082_v28, %v3082_v28  ;;  %v3041_v33 = vpop.f32.mrb[50].mxu0  ;;  %v2187_v38 = vmul.f32 %v2103_v32, %v2103_v32 }
 0x1c7   : > { %v1960_v34 = vadd.f32 %v1959_v24, %v1953_v31  ;;  %v1940_v35 = vadd.f32 %v3082_v28, %v1939_v30  ;;  %v2764_v36 = vpack.c.bf16 %v3041_v33, %v3040_v29  ;;  %v2106_v37 = vpop.f32.mrb[51].mxu0 }
 0x1c8   : > { %2778 = vst [vmem:[%s3861_s8 + $0x18] sm:$0xff] %v2754_v21   ;;  %v2759_v39 = vpack.c.bf16 %v2106_v37, %v2103_v32  ;;  %v2174_v40 = vadd.f32 %v2106_v37, %v2103_v32  ;;  %v2188_v41 = vmul.f32 %v2106_v37, %v2106_v37 }
 0x1c9   : > { %v1941_v42 = vrot.slane %v1940_v35, 4  ;;  %v1961_v43 = vadd.f32 %v1960_v34, %v1954_v23  ;;  %2779 = vst [vmem:[%s3882_s27 + $0x8] sm:$0xff] %v2764_v36  }
 0x1ca   : > { %3400 = shalt.err (!%p3397_p1)
}
 0x1cb   : > { %s3401_s12 = scalar_lea.hbm %s3877_s15, 512  ;;  %s3405_s7 = scalar_lea.hbm %s4048_s3, 1024 }
 0x1cc   : > { %p3402_p3 = scmp.ne.s32.totalorder %s3877_s15, %s3401_s12  ;;  %p3406_p6 = scmp.lt.u32.totalorder %s3877_s15, %s4048_s3 }
 0x1cd   : > { %p3407_p11 = scmp.lt.u32.totalorder %s3405_s7, %s3401_s12  ;;  %p3409_p0 = scmp.lt.u32.totalorder %s3401_s12, %s3877_s15 }
 0x1ce   : > { %p3403_p2 = pnand %p3402_p3, %p4075_p13 }
 0x1cf   : > { %p3408_p12 = por %p3407_p11, %p3406_p6 }
 0x1d0   : > { %p3404_p5 = pneg %p3403_p2 }
 0x1d1   : > { %p3410_p7 = por %p3409_p0, %p3408_p12 }
 0x1d3   : > { %p3411_p8 = pnand %p3410_p7, %p3404_p5 }
 0x1d5   : > { %3414 = shalt.err (!%p3411_p8)
}
 0x1d6   : > { %s3562_s29 = smov 64   ;;  %s3563_s19 = smov 4   ;;  %v2189_v44 = vmul.f32 %v3040_v29, %v3040_v29  ;;  %2760 = vst [vmem:[%s3882_s27] sm:$0xff] %v2759_v39   ;;  %v2175_v45 = vadd.f32 %v3040_v29, %v2174_v40  ;;  %v2195_v46 = vadd.f32 %v2188_v41, %v2187_v38  ;;  %v1942_v47 = vadd.f32 %v1941_v42, %v1940_v35  ;;  %v3044_v54 = vpop.f32.mrb[8].mxu1 }
 0x1d7   : > { %3122 = dma.vmem_to_hbm [thread:$0]  (%p4075_p13), %s3870_s11, 512, %s3877_s15, %s2212_s20, %s3562_s29, %s3562_s29, %s3563_s19   ;;  %v1962_v48 = vrot.slane %v1961_v43, 4  ;;  %v2190_v49 = vmul.f32 %v3041_v33, %v3041_v33  ;;  %v2119_v55 = vpop.f32.mrb[9].mxu1  ;;  %v2193_v7 = vmul.f32 %v3044_v54, %v3044_v54  ;;  %vm1968_vm0 = vcmask 1040384  }
 0x1d8   : > { %v2196_v50 = vadd.f32 %v2195_v46, %v2189_v44  ;;  %v2176_v51 = vadd.f32 %v3041_v33, %v2175_v45  ;;  %v1943_v52 = vrot.slane %v1942_v47, 2  ;;  %v2191_v60 = vmul.f32 %v2119_v55, %v2119_v55  ;;  %v3045_v61 = vpop.f32.mrb[10].mxu1  ;;  %s4061_s11 = sshll.u32 %s3752_s18, 3  ;;  %s2216_s15 = sand.u32 1, %s3623_s25  }
 0x1d9   : > { %v1963_v53 = vadd.f32 %v1962_v48, %v1961_v43  ;;  %v2774_v62 = vpack.c.bf16 %v3045_v61, %v3044_v54  ;;  %v2122_v63 = vpop.f32.mrb[11].mxu1  ;;  %s4060_s20 = sshll.u32 %s3623_s25, 7  ;;  %s337_s16 = scalar_lea.vmem [#allocation10], %s4061_s11  ;;  %vm1970_vm1 = vcmask 1041408   ;;  %v2194_v12 = vmul.f32 %v3045_v61, %v3045_v61 }
 0x1da   : > { %v2197_v56 = vadd.f32 %v2196_v50, %v2190_v49  ;;  %v1944_v57 = vadd.f32 %v1943_v52, %v1942_v47  ;;  %v2177_v59 = vadd.f32 %v2176_v51, %v2119_v55  ;;  %v2769_v3 = vpack.c.bf16 %v2122_v63, %v2119_v55  ;;  %s2256_s14 = sshll.u32 %s337_s16, 4  ;;  %s2269_s17 = sshll.u32 %s3882_s27, 4  ;;  %s3929_s14 = int_to_ptr.vmem [resolvable:$true] %s2256_s14  ;;  %s3931_s17 = int_to_ptr.vmem [resolvable:$true] %s2269_s17 }
 0x1db   : > { %v1964_v58 = vrot.slane %v1963_v53, 2  ;;  %2781 = vst [vmem:[%s3882_s27 + $0x18] sm:$0xff] %v2774_v62   ;;  %v2192_v5 = vmul.f32 %v2122_v63, %v2122_v63  ;;  %s3927_s26 = scalar_lea.hbm %s4049_s4, %s4060_s20  ;;  %s3939_s8 = scalar_lea.hbm %s4050_s5, %s2734_s30 }
 0x1dc   : > { %v1945_v0 = vrot.slane %v1944_v57, 1  ;;  %v2198_v2 = vadd.f32 %v2197_v56, %v2191_v60  ;;  %v2178_v4 = vadd.f32 %v2177_v59, %v2122_v63  ;;  %2780 = vst [vmem:[%s3882_s27 + $0x10] sm:$0xff] %v2769_v3   ;;  %s3941_s28 = scalar_lea.sflag [#allocation11], %s2216_s15  ;;  %s3415_s12 = scalar_lea.vmem %s3929_s14, 128 }
 0x1dd   : > { %v1965_v1 = vadd.f32 %v1964_v58, %v1963_v53  ;;  %p3416_p9 = scmp.ne.s32.totalorder %s3929_s14, %s3415_s12  ;;  %s3564_s13 = smov [#allocation10]  }
 0x1de   : > { %v2179_v8 = vadd.f32 %v3044_v54, %v2178_v4  ;;  %v2199_v9 = vadd.f32 %v2198_v2, %v2192_v5  ;;  %v1946_v10 = vadd.f32 %v1945_v0, %v1944_v57  ;;  %s3419_s20 = sshll.u32 %s3564_s13, 4  ;;  %s3420_s20 = int_to_ptr.vmem [resolvable:$false] %s3419_s20 }
 0x1df   : > { %v1966_v6 = vrot.slane %v1965_v1, 1  ;;  %p3417_p10 = pnand %p3416_p9, %p4075_p13  ;;  %s3421_s11 = scalar_lea.vmem %s3420_s20, 256 }
 0x1e0   : > { %v2180_v14 = vadd.f32 %v3045_v61, %v2179_v8  ;;  %v2200_v16 = vadd.f32 %v2199_v9, %v2193_v7  ;;  %p3422_p3 = scmp.lt.s32.totalorder %s3929_s14, %s3420_s20  ;;  %p3423_p2 = scmp.lt.s32.totalorder %s3421_s11, %s3415_s12 }
 0x1e1   : > { %v1967_v11 = vadd.f32 %v1966_v6, %v1965_v1  ;;  %p3418_p1 = pneg %p3417_p10 }
 0x1e2   : > { %v2181_v18 = vrot.slane %v2180_v14, 4  ;;  %v2201_v19 = vadd.f32 %v2200_v16, %v2194_v12  ;;  %p3424_p5 = por %p3423_p2, %p3422_p3 }
 0x1e3   : > { %v1969_v17 = vsel %vm1968_vm0, %v1946_v10, %v1967_v11 }
 0x1e4   : > { %v1971_v20 = vsel %vm1970_vm1, %v1969_v17, 0.0  ;;  %v2182_v22 = vadd.f32 %v2181_v18, %v2180_v14  ;;  %v2202_v13 = vrot.slane %v2201_v19, 4  ;;  %p3425_p6 = pnand %p3424_p5, %p3418_p1 }
 0x1e5   : > { %1972 = vst [vmem:[%s337_s16] sm:$0xff] %v1971_v20 }
 0x1e6   : > { %3428 = shalt.err (!%p3425_p6)
}
 0x1e7   : > { %s3429_s30 = scalar_lea.hbm %s3927_s26, 128  ;;  %s3433_s27 = scalar_lea.hbm %s4049_s4, 256 }
 0x1e8   : > { %p3430_p11 = scmp.ne.s32.totalorder %s3927_s26, %s3429_s30  ;;  %p3434_p7 = scmp.lt.u32.totalorder %s3927_s26, %s4049_s4 }
 0x1e9   : > { %p3435_p8 = scmp.lt.u32.totalorder %s3433_s27, %s3429_s30  ;;  %p3437_p10 = scmp.lt.u32.totalorder %s3429_s30, %s3927_s26 }
 0x1ea   : > { %p3431_p12 = pnand %p3430_p11, %p4075_p13 }
 0x1eb   : > { %p3436_p9 = por %p3435_p8, %p3434_p7 }
 0x1ec   : > { %p3432_p0 = pneg %p3431_p12 }
 0x1ed   : > { %p3438_p1 = por %p3437_p10, %p3436_p9 }
 0x1ef   : > { %p3439_p3 = pnand %p3438_p1, %p3432_p0 }
 0x1f1   : > { %3442 = shalt.err (!%p3439_p3)
}
 0x1f2   : > { %3123 = dma.vmem_to_hbm [thread:$0]  (%p4075_p13), %s3929_s14, 128, %s3927_s26, %s3941_s28  }
 0x1f3   : > { %s3443_s11 = scalar_lea.vmem %s3931_s17, 512  ;;  %s3565_s12 = smov [#allocation12]  }
 0x1f4   : > { %p3444_p2 = scmp.ne.s32.totalorder %s3931_s17, %s3443_s11  ;;  %s3447_s13 = sshll.u32 %s3565_s12, 4  ;;  %s3448_s13 = int_to_ptr.vmem [resolvable:$false] %s3447_s13 }
 0x1f5   : > { %s3449_s30 = scalar_lea.vmem %s3448_s13, 1024  ;;  %p3450_p11 = scmp.lt.s32.totalorder %s3931_s17, %s3448_s13 }
 0x1f6   : > { %p3445_p5 = pnand %p3444_p2, %p4075_p13  ;;  %p3451_p12 = scmp.lt.s32.totalorder %s3449_s30, %s3443_s11 }
 0x1f8   : > { %p3446_p6 = pneg %p3445_p5  ;;  %p3452_p0 = por %p3451_p12, %p3450_p11 }
 0x1fa   : > { %p3453_p7 = pnand %p3452_p0, %p3446_p6 }
 0x1fc   : > { %3456 = shalt.err (!%p3453_p7)
}
 0x1fd   : > { %s3457_s14 = scalar_lea.hbm %s3939_s8, 512  ;;  %s3461_s16 = scalar_lea.hbm %s4050_s5, 1024 }
 0x1fe   : > { %p3458_p8 = scmp.ne.s32.totalorder %s3939_s8, %s3457_s14  ;;  %p3462_p1 = scmp.lt.u32.totalorder %s3939_s8, %s4050_s5 }
 0x1ff   : > { %p3463_p3 = scmp.lt.u32.totalorder %s3461_s16, %s3457_s14  ;;  %p3465_p5 = scmp.lt.u32.totalorder %s3457_s14, %s3939_s8 }
 0x200   : > { %p3459_p9 = pnand %p3458_p8, %p4075_p13 }
 0x201   : > { %p3464_p2 = por %p3463_p3, %p3462_p1 }
 0x202   : > { %p3460_p10 = pneg %p3459_p9 }
 0x203   : > { %p3466_p6 = por %p3465_p5, %p3464_p2 }
 0x205   : > { %p3467_p11 = pnand %p3466_p6, %p3460_p10 }
 0x207   : > { %3470 = shalt.err (!%p3467_p11)
}
 0x208   : > { %3124 = dma.vmem_to_hbm [thread:$0]  (%p4075_p13), %s3931_s17, 512, %s3939_s8, %s3941_s28, %s3562_s29, %s3562_s29, %s3563_s19   ;;  %v2183_v24 = vrot.slane %v2182_v22, 2  ;;  %v2203_v25 = vadd.f32 %v2202_v13, %v2201_v19 }
 0x209   : > { %s4076_s20 = sshll.u32 %s3752_s18, 3  ;;  %s4077_s13 = sshll.u32 %s3623_s25, 7 }
 0x20a   : > { %v2184_v15 = vadd.f32 %v2183_v24, %v2182_v22  ;;  %v2204_v26 = vrot.slane %v2203_v25, 2  ;;  %s351_s11 = scalar_lea.vmem [#allocation13], %s4076_s20  ;;  %s3998_s29 = scalar_lea.hbm %s4051_s6, %s4077_s13 }
 0x20b   : > { %s2285_s12 = sshll.u32 %s351_s11, 4  ;;  %s2227_s19 = scalar_lea.sflag [#allocation14], %s3752_s18  ;;  %s4000_s12 = int_to_ptr.vmem [resolvable:$true] %s2285_s12 }
 0x20c   : > { %v2185_v27 = vrot.slane %v2184_v15, 1  ;;  %v2205_v28 = vadd.f32 %v2204_v26, %v2203_v25  ;;  %s3471_s17 = scalar_lea.vmem %s4000_s12, 128  ;;  %s3566_s25 = smov [#allocation13]  }
 0x20d   : > { %p3472_p12 = scmp.ne.s32.totalorder %s4000_s12, %s3471_s17  ;;  %s3475_s8 = sshll.u32 %s3566_s25, 4  ;;  %s3476_s8 = int_to_ptr.vmem [resolvable:$false] %s3475_s8 }
 0x20e   : > { %v2206_v29 = vrot.slane %v2205_v28, 1  ;;  %v2186_v30 = vadd.f32 %v2185_v27, %v2184_v15  ;;  %s3477_s28 = scalar_lea.vmem %s3476_s8, 256  ;;  %p3478_p8 = scmp.lt.s32.totalorder %s4000_s12, %s3476_s8 }
 0x20f   : > { %p3473_p0 = pnand %p3472_p12, %p4075_p13  ;;  %p3479_p9 = scmp.lt.s32.totalorder %s3477_s28, %s3471_s17 }
 0x210   : > { %v2207_v31 = vadd.f32 %v2206_v29, %v2205_v28 }
 0x211   : > { %p3474_p7 = pneg %p3473_p0  ;;  %p3480_p10 = por %p3479_p9, %p3478_p8 }
 0x212   : > { %v2208_v32 = vsel %vm1968_vm0, %v2186_v30, %v2207_v31 }
 0x213   : > { %v2209_v21 = vsel %vm1970_vm1, %v2208_v32, 0.0  ;;  %p3481_p1 = pnand %p3480_p10, %p3474_p7 }
 0x214   : > { %2210 = vst [vmem:[%s351_s11] sm:$0xff] %v2209_v21 }
 0x215   : > { %3484 = shalt.err (!%p3481_p1)
}
 0x216   : > { %s3485_s18 = scalar_lea.hbm %s3998_s29, 128  ;;  %s3489_s16 = scalar_lea.hbm %s4051_s6, 256 }
 0x217   : > { %p3486_p3 = scmp.ne.s32.totalorder %s3998_s29, %s3485_s18  ;;  %p3490_p6 = scmp.lt.u32.totalorder %s3998_s29, %s4051_s6 }
 0x218   : > { %p3491_p11 = scmp.lt.u32.totalorder %s3489_s16, %s3485_s18  ;;  %p3493_p0 = scmp.lt.u32.totalorder %s3485_s18, %s3998_s29 }
 0x219   : > { %p3487_p2 = pnand %p3486_p3, %p4075_p13 }
 0x21a   : > { %p3492_p12 = por %p3491_p11, %p3490_p6 }
 0x21b   : > { %p3488_p5 = pneg %p3487_p2 }
 0x21c   : > { %p3494_p7 = por %p3493_p0, %p3492_p12 }
 0x21e   : > { %p3495_p8 = pnand %p3494_p7, %p3488_p5 }
 0x220   : > { %3498 = shalt.err (!%p3495_p8)
}
 0x221   : > { %3125 = dma.vmem_to_hbm [thread:$0]  (%p4075_p13), %s4000_s12, 128, %s3998_s29, %s2227_s19  }
 0x222 PF: > { %s2297_s20 = sand.u32 1, %s3537_s21   ;;  %p4078_p9 = scmp.ne.s32.totalorder %s4067_s10, 0 }
 0x223   : > { %s2298_s11 = scalar_lea.sflag [#allocation5], %s2297_s20 }
 0x224   : > { %p3138_p10 = pnand %p2471_p4, %p4078_p9 }
 0x226   : > { %3524 = dma.done.wait (!%p3138_p10), %s2298_s11, 512  }
 0x227   : > { %3526 = vsyncadd (!%p3138_p10), %s2298_s11, 4294966784  ;;  %s4079_s13 = sadd.s32 4294967294, %s3549_s24  }
 0x228   : > { %s2306_s30 = sand.u32 1, %s4079_s13  }
 0x229   : > { %s2307_s14 = scalar_lea.sflag [#allocation11], %s2306_s30 }
 0x22a   : > { %3528 = dma.done.wait (!%p3138_p10), %s2307_s14, 640  }
 0x22b   : > { %3530 = vsyncadd (!%p3138_p10), %s2307_s14, 4294966656  ;;  %s2325_s9 = scalar_lea.sflag [#allocation14], %s2297_s20 }
 0x22c   : > { %3532 = dma.done.wait (!%p3138_p10), %s2325_s9, 128  }
 0x22d   : > { %3534 = vsyncadd (!%p3138_p10), %s2325_s9, 4294967168  ;;  %s4080_s24 = sld [smem:[#allocation23_spill]]  ;;  %s4081_s12 = sld [smem:[#allocation24_spill]] }
 0x22e   : > { %s4082_s21 = smov %s3541_s22  ;;  %s4083_s22 = smov %s3545_s23 }
 0x233   : > { %p27_p13 = scmp.ge.s32.totalorder %s4080_s24, 4   ;;  %s4084_s23 = smov %s4081_s12 }
 0x235   :  { %29 = sbr.rel (!%p27_p13) target bundleno = 10 (0xa), region = 146 }
 0x23c   :  { %2330 = vsyncpa [#allocation4], 1 }
 0x23d   :  { %2332 = vsyncpa [#allocation4 + $0x1], 1 }
 0x23e   :  { %2333 = vsyncpa [#allocation7], 1 }
 0x23f   :  { %2334 = vsyncpa [#allocation5], 1 }
 0x240   :  { %2336 = vsyncpa [#allocation5 + $0x1], 1 }
 0x241   :  { %2337 = vsyncpa [#allocation11], 1 }
 0x242   :  { %2339 = vsyncpa [#allocation11 + $0x1], 1 }
 0x243   :  { %2340 = vsyncpa [#allocation14], 1 }
 0x244   :  { %2342 = vsyncpa [#allocation14 + $0x1], 1 }

// kernel: basic_block_pallas.4
= control target key start
LH: loop header
LB: loop body
LE: loop exit
PB: predicated region body
PF: predicated region fallthrough
CT: control target
= control target key end

     0   :  { %s3903_s0 = inlined_call_operand.hbm [shape: bf16[2,64,128], index: 0, kind: input, shape index: {}]   ;;  %s3904_s1 = inlined_call_operand.hbm [shape: f32[4,128], index: 1, kind: input, shape index: {}]   ;;  %s3905_s2 = inlined_call_operand.hbm [shape: bf16[3,384,128], index: 2, kind: input, shape index: {}]   ;;  %s3906_s3 = inlined_call_operand.hbm [shape: bf16[2,64,128], index: 3, kind: output, shape index: {0}]   ;;  %s3907_s4 = inlined_call_operand.hbm [shape: f32[2,8,128], index: 4, kind: output, shape index: {1}]  }
   0x1   :  { %3913 = sst [smem:[#allocation17_spill]] %s3904_s1 }
   0x2   :  { %10 = vsyncpa [#allocation5], 0 }
   0x3   :  { %12 = vsyncpa [#allocation5 + $0x1], 0 }
   0x4   :  { %13 = vsyncpa [#allocation8], 0 }
   0x5   :  { %14 = vsyncpa [#allocation6], 0 }
   0x6   :  { %16 = vsyncpa [#allocation6 + $0x1], 0 }
   0x7   :  { %17 = vsyncpa [#allocation12], 0 }
   0x8   :  { %19 = vsyncpa [#allocation12 + $0x1], 0  ;;  %s3348_s15 = smov 0   ;;  %s3350_s16 = smov 0  }
   0x9   :  { %s3352_s17 = smov 0   ;;  %s3354_s18 = smov 0  }
   0xa LB: > { %s3369_s19 = sadd.s32 4294967295, %s3311_s18   ;;  %s2393_s20 = sadd.s32 4294967294, %s3311_s18   ;;  %s3311_s18 = sphi %s3354_s18, %s3940_s18   ;;  %s3307_s17 = sphi %s3352_s17, %s3939_s17   ;;  %s3303_s16 = sphi %s3350_s16, %s3938_s16   ;;  %s3299_s15 = sphi %s3348_s15, %s3937_s15  }
   0xb   : > { %s3373_s21 = sadd.s32 1, %s3311_s18   ;;  %s32_s22 = sadd.s32 1, %s3307_s17 }
   0xc   : > { %s29_s23 = ssub.s32 %s3311_s18, %s3373_s21  ;;  %p39_p0 = scmp.ne.s32.totalorder %s3307_s17, %s3303_s16 }
   0xd   : > { %p30_p1 = scmp.eq.s32.totalorder %s29_s23, 0  ;;  %p40_p2 = scmp.eq.s32.totalorder %s3311_s18, 0 }
   0xe   : > { %p45_p3 = scmp.ne.s32.totalorder %s3303_s16, %s3299_s15  ;;  %p3908_p4 = scmp.eq.s32.totalorder %s3369_s19, 0 }
   0xf   : > { %s3385_s24 = scalar_select %p30_p1, %s3307_s17, %s32_s22  }
  0x10   : > { %p3387_p5 = por %p40_p2, %p39_p0  ;;  %p3393_p6 = por %p3908_p4, %p45_p3 }
  0x11   : > { %p111_p7 = scmp.eq.s32.totalorder %s3369_s19, 1  ;;  %p117_p8 = scmp.eq.s32.totalorder %s2393_s20, 1 }
  0x12   : > { %s3915_s26 = scalar_select %p3393_p6, 1, 0 }
  0x13   : > { %p2394_p9 = scmp.ge.s32.totalorder %s3311_s18, 1  ;;  %p150_p10 = scmp.lt.s32.totalorder %s3311_s18, 3 }
  0x14   : > { %p3400_p11 = por %p111_p7, %p39_p0  ;;  %p3404_p12 = por %p117_p8, %p45_p3 }
  0x15   : > { %p3408_p13 = pnand %p2394_p9, %p150_p10  ;;  %s3313_s30 = smov [#allocation7]  }
  0x16   : > { %s3916_s27 = scalar_select %p3400_p11, 1, 0 }
  0x17   : > { %s3917_s28 = scalar_select %p3404_p12, 1, 0 }
  0x18   : > { %s3918_s29 = scalar_select %p3408_p13, 1, 0 }
  0x19   : > { %p2928_p2 = pneg %p3408_p13  ;;  %s163_s5 = sshll.u32 %s3313_s30, 4  ;;  %s164_s5 = int_to_ptr.vmem [resolvable:$true] %s163_s5 }
  0x1a   : > { %p2948_p4 = scmp.lt.s32.totalorder %s3311_s18, 2  ;;  %p3919_p0 = scmp.eq.s32.totalorder %s3369_s19, 0 }
  0x1b   : > { %s3314_s8 = smov [#allocation9]   ;;  %s3922_s1 = sld [smem:[#allocation17_spill]] }
  0x1c   : > { %p3418_p7 = pnand %p2928_p2, %p3919_p0  ;;  %p3424_p3 = pnand %p2948_p4, %p3387_p5 }
  0x1d   : > { %s173_s9 = sshll.u32 %s3314_s8, 4  ;;  %s3428_s9 = int_to_ptr.vmem [resolvable:$true] %s173_s9 }
  0x1e   : > { %s3921_s7 = scalar_select %p3424_p3, 1, 0 }
  0x1f   : > { %p3125_p9 = pneg %p3418_p7 }
  0x21   : > { %s3123_s12 = scalar_lea.hbm %s3922_s1, 64 }
  0x22   : > { %p3124_p8 = scmp.ne.s32.totalorder %s3922_s1, %s3123_s12  ;;  %p3130_p10 = scmp.lt.u32.totalorder %s3123_s12, %s3922_s1 }
  0x24   : > { %p3126_p4 = pnand %p3125_p9, %p3124_p8 }
  0x26   : > { %p3127_p5 = pneg %p3126_p4 }
  0x28   : > { %p3132_p2 = pnand %p3130_p10, %p3127_p5 }
  0x2a   : > { %3135 = shalt.err (!%p3132_p2)
}
  0x2b   : > { %s3136_s23 = scalar_lea.vmem %s164_s5, 64  ;;  %p3144_p11 = scmp.lt.s32.totalorder %s164_s5, %s164_s5 }
  0x2c   : > { %p3137_p0 = scmp.ne.s32.totalorder %s164_s5, %s3136_s23  ;;  %p3145_p6 = scmp.lt.s32.totalorder %s3136_s23, %s3136_s23 }
  0x2e   : > { %p3139_p1 = pnand %p3137_p0, %p3125_p9  ;;  %p3146_p13 = por %p3145_p6, %p3144_p11 }
  0x30   : > { %p3140_p12 = pneg %p3139_p1 }
  0x32   : > { %p3147_p3 = pnand %p3146_p13, %p3140_p12 }
  0x34   : > { %3150 = shalt.err (!%p3147_p3)
}
  0x35   : > { %2931 = dma.hbm_to_vmem [thread:$0]  (!%p3418_p7), %s3922_s1, 64, %s164_s5, [#allocation8]  }
  0x36   : > { %s187_s8 = sand.u32 1, %s3307_s17   ;;  %s3151_s12 = scalar_lea.hbm %s3905_s2, 9216 }
  0x37   : > { %p3152_p1 = scmp.ne.s32.totalorder %s3905_s2, %s3151_s12  ;;  %p3158_p12 = scmp.lt.u32.totalorder %s3151_s12, %s3905_s2 }
  0x39   : > { %p3154_p6 = pnand %p3152_p1, %p3125_p9 }
  0x3b   : > { %p3155_p11 = pneg %p3154_p6 }
  0x3d   : > { %p3160_p13 = pnand %p3158_p12, %p3155_p11 }
  0x3f   : > { %3163 = shalt.err (!%p3160_p13)
}
  0x40   : > { %s3164_s5 = scalar_lea.vmem %s3428_s9, 9216  ;;  %p3172_p5 = scmp.lt.s32.totalorder %s3428_s9, %s3428_s9 }
  0x41   : > { %p3165_p3 = scmp.ne.s32.totalorder %s3428_s9, %s3164_s5  ;;  %p3173_p10 = scmp.lt.s32.totalorder %s3164_s5, %s3164_s5 }
  0x43   : > { %p3167_p8 = pnand %p3165_p3, %p3125_p9  ;;  %p3174_p2 = por %p3173_p10, %p3172_p5 }
  0x45   : > { %p3168_p4 = pneg %p3167_p8 }
  0x47   : > { %p3175_p0 = pnand %p3174_p2, %p3168_p4 }
  0x49   : > { %3178 = shalt.err (!%p3175_p0)
}
  0x4a   : > { %s3315_s23 = smov 64   ;;  %s3316_s25 = smov 4  }
  0x4b   : > { %2934 = dma.hbm_to_vmem [thread:$0]  (!%p3418_p7), %s3905_s2, 9216, %s3428_s9, [#allocation8], %s3315_s23, %s3315_s23, %s3316_s25  }
  0x4c   : > { %s2398_s11 = sshll.u32 %s187_s8, 5  ;;  %s2586_s12 = sshll.u32 %s3311_s18, 9 }
  0x4d   : > { %s3485_s20 = scalar_lea.hbm %s3903_s0, %s2586_s12  ;;  %s191_s22 = scalar_lea.vmem [#allocation4], %s2398_s11 }
  0x4e   : > { %s198_s6 = sshll.u32 %s191_s22, 4  ;;  %s3489_s5 = scalar_lea.sflag [#allocation5], %s187_s8  ;;  %s3487_s6 = int_to_ptr.vmem [resolvable:$true] %s198_s6 }
  0x4f   : > { %s3179_s1 = scalar_lea.hbm %s3485_s20, 512  ;;  %p3923_p7 = scmp.ne.s32.totalorder %s3921_s7, 0 }
  0x50   : > { %p3180_p9 = scmp.ne.s32.totalorder %s3485_s20, %s3179_s1  ;;  %s3184_s10 = scalar_lea.hbm %s3903_s0, 1024 }
  0x51   : > { %p3181_p1 = pneg %p3923_p7  ;;  %p3185_p12 = scmp.lt.u32.totalorder %s3485_s20, %s3903_s0 }
  0x52   : > { %p3186_p13 = scmp.lt.u32.totalorder %s3184_s10, %s3179_s1  ;;  %p3188_p8 = scmp.lt.u32.totalorder %s3179_s1, %s3485_s20 }
  0x53   : > { %p3182_p6 = pnand %p3181_p1, %p3180_p9 }
  0x54   : > { %p3187_p3 = por %p3186_p13, %p3185_p12 }
  0x55   : > { %p3183_p11 = pneg %p3182_p6 }
  0x56   : > { %p3189_p4 = por %p3188_p8, %p3187_p3 }
  0x58   : > { %p3190_p5 = pnand %p3189_p4, %p3183_p11 }
  0x5a   : > { %3193 = shalt.err (!%p3190_p5)
}
  0x5b   : > { %s3194_s8 = scalar_lea.vmem %s3487_s6, 512  ;;  %s3317_s11 = smov [#allocation4]  }
  0x5c   : > { %p3195_p10 = scmp.ne.s32.totalorder %s3487_s6, %s3194_s8  ;;  %s3199_s14 = sshll.u32 %s3317_s11, 4  ;;  %s3200_s14 = int_to_ptr.vmem [resolvable:$false] %s3199_s14 }
  0x5d   : > { %s3201_s22 = scalar_lea.vmem %s3200_s14, 1024  ;;  %p3202_p9 = scmp.lt.s32.totalorder %s3487_s6, %s3200_s14 }
  0x5e   : > { %p3197_p2 = pnand %p3195_p10, %p3181_p1  ;;  %p3203_p6 = scmp.lt.s32.totalorder %s3201_s22, %s3194_s8 }
  0x60   : > { %p3198_p0 = pneg %p3197_p2  ;;  %p3204_p12 = por %p3203_p6, %p3202_p9 }
  0x62   : > { %p3205_p13 = pnand %p3204_p12, %p3198_p0 }
  0x64   : > { %3208 = shalt.err (!%p3205_p13)
}
  0x65   : > { %2938 = dma.hbm_to_vmem [thread:$0]  (!%p3923_p7), %s3485_s20, 512, %s3487_s6, %s3489_s5, %s3315_s23, %s3315_s23, %s3316_s25  }
  0x66   : > { %p3924_p1 = scmp.ne.s32.totalorder %s3918_s29, 0 }
  0x67   : > { %s3523_s1 = sand.u32 (!%p3924_p1), 1, %s3303_s16   ;;  %p3925_p11 = scmp.ne.s32.totalorder (!%p3924_p1), %s3915_s26, 0 }
  0x68   : > { %210 = sbr.rel (%p3924_p1) target bundleno = 526 (0x20e), region = 32  ;;  %s2402_s9 = sshll.u32 (!%p3924_p1), %s3523_s1, 5 }
  0x69   : > { %s213_s30 = scalar_lea.sflag (!%p3924_p1), [#allocation5], %s3523_s1  ;;  %s3529_s7 = scalar_lea.vmem (!%p3924_p1), [#allocation4], %s2402_s9 }
  0x6f   : > { %3282 = dma.done.wait (%p3925_p11), %s213_s30, 512  }
  0x70   : > { %3284 = vsyncadd (%p3925_p11), %s213_s30, 4294966784  ;;  %p3926_p7 = scmp.eq.s32.totalorder %s3369_s19, 0 }
  0x72   : > { %3286 = dma.done.wait (%p3926_p7), [#allocation8], 9280   ;;  %p3927_p3 = pmov %p3926_p7 }
  0x73   : > { %v3318_v0 = vmov 0   ;;  %v2991_v1 = vld [vmem:[#allocation9 + $0x80] sm:$0xff]   ;;  %v2993_v3 = vld [vmem:[#allocation9 + $0x88] sm:$0xff]   ;;  %vm335_vm0 = vsmask.f32 256  ;;  %v2996_v6 = vld [vmem:[#allocation9 + $0x90] sm:$0xff]   ;;  %v272_v12 = vlaneseq }
  0x74   : > { %3288 = vsyncadd (%p3927_p3), [#allocation8], 4294958016  ;;  %328 = vst [vmem:[#allocation2] sm:$0xf] %v3318_v0  ;;  %v2992_v2 = vld [vmem:[#allocation9 + $0x40] sm:$0xff]   ;;  %2802 = vmatprep.subr.bf16.mxu1 %v2991_v1  ;;  %v2995_v5 = vld [vmem:[#allocation9 + $0x48] sm:$0xff]  }
  0x75   : > { %329 = vst [vmem:[#allocation2 + $0x4] sm:$0x1] %v3318_v0  ;;  %331 = vst [vmem:[#allocation2 + $0x48] sm:$0xf] %v3318_v0  ;;  %2803 = vmatpush3.bf16.msra.mxu1 %v2991_v1  ;;  %2646 = vmatprep.subr.bf16.mxu0 %v2992_v2  ;;  %v2994_v4 = vld [vmem:[#allocation9] sm:$0xff]   ;;  %v2997_v7 = vld [vmem:[#allocation9 + $0x8] sm:$0xff]  }
  0x76   : > { %332 = vst [vmem:[#allocation2 + $0x4c] sm:$0x1] %v3318_v0  ;;  %2804 = vmatprep.subr.bf16.mxu1 %v2993_v3  ;;  %2647 = vmatpush3.bf16.msra.mxu0 %v2994_v4  ;;  %v2998_v8 = vld [vmem:[#allocation9 + $0x50] sm:$0xff]   ;;  %v2999_v9 = vld [vmem:[#allocation9 + $0x98] sm:$0xff]   ;;  %vm361_vm1 = vsmask.f32 7938 }
  0x77   : > { %2648 = vmatprep.subr.bf16.mxu0 %v2995_v5  ;;  %v3000_v10 = vld [vmem:[#allocation9 + $0x10] sm:$0xff]   ;;  %v3001_v11 = vld [vmem:[#allocation9 + $0x58] sm:$0xff]   ;;  %v3002_v13 = vld [vmem:[#allocation9 + $0xa0] sm:$0xff]   ;;  %vm334_vm2 = vcmask 1040384   ;;  %v273_v16 = vshrl.u32 %v272_v12, 7  ;;  %vm499_vm5 = vcmask 1043456  }
  0x78   : > { %v3003_v14 = vld [vmem:[#allocation9 + $0x18] sm:$0xff]   ;;  %v3004_v15 = vld [vmem:[#allocation9 + $0x60] sm:$0xff]   ;;  %vm3541_vm3 = vmand %vm334_vm2, %vm335_vm0  ;;  %s3812_s26 = scalar_lea.vmem [#allocation10], %s2402_s9  ;;  %s2603_s29 = sshll.u32 %s3369_s19, 9 }
  0x79   : > { %2805 = vmatpush3.bf16.msra.mxu1 %v2993_v3  ;;  %v3005_v18 = vld [vmem:[#allocation9 + $0xa8] sm:$0xff]   ;;  %v3006_v19 = vld [vmem:[#allocation9 + $0x20] sm:$0xff]   ;;  %v274_v21 = vsub.s32 0, %v273_v16  ;;  %vm3547_vm4 = vmand %vm334_vm2, %vm361_vm1  ;;  %v286_v24 = vsub.s32 1, %v273_v16  ;;  %v298_v27 = vsub.s32 2, %v273_v16  ;;  %v310_v30 = vsub.s32 3, %v273_v16  ;;  %s3824_s6 = scalar_lea.hbm %s3906_s3, %s2603_s29 }
  0x7a   : > { %2806 = vmatprep.subr.bf16.mxu1 %v2996_v6  ;;  %2649 = vmatpush3.bf16.msra.mxu0 %v2997_v7  ;;  %v3007_v20 = vld [vmem:[#allocation9 + $0x68] sm:$0xff]   ;;  %v3008_v23 = vld [vmem:[#allocation9 + $0xb0] sm:$0xff]   ;;  %v2605_v28 = vld [vmem:[%s3529_s7] sm:$0xff]   ;;  %s2256_s23 = sshll.u32 %s3812_s26, 4  ;;  %s2238_s5 = scalar_lea.sflag [#allocation6], %s3523_s1  ;;  %s3826_s23 = int_to_ptr.vmem [resolvable:$true] %s2256_s23 }
  0x7b   : > { %2650 = vmatprep.subr.bf16.mxu0 %v2998_v8  ;;  %v3009_v25 = vld [vmem:[#allocation9 + $0x28] sm:$0xff]   ;;  %v3010_v26 = vld [vmem:[#allocation9 + $0x70] sm:$0xff]   ;;  %v271_v29 = vld [vmem:[#allocation7] sm:$0xf]  ;;  %v2606_v33 = vunpack.c.l.bf16 %v2605_v28  ;;  %v2607_v34 = vunpack.c.h.bf16 %v2605_v28  ;;  %s3209_s10 = scalar_lea.vmem %s3826_s23, 512  ;;  %p3934_p4 = scmp.ne.s32.totalorder %s3916_s27, 0 }
  0x7c   : > { %v337_v31 = vld [vmem:[#allocation2 + $0x8] sm:$0x1]  ;;  %v3011_v32 = vld [vmem:[#allocation9 + $0xb8] sm:$0xff]   ;;  %v3552_v35 = vrot.slane %v271_v29, %v274_v21  ;;  %v3554_v36 = vrot.slane %v271_v29, %v286_v24  ;;  %v3561_v43 = vrot.slane %v271_v29, %v298_v27  ;;  %v3563_v44 = vld [vmem:[#allocation9 + $0x140] sm:$0xff]   ;;  %v3568_v49 = vrot.slane %v271_v29, %v310_v30  ;;  %p3210_p8 = scmp.ne.s32.totalorder %s3826_s23, %s3209_s10  ;;  %s3319_s12 = smov [#allocation10]  }
  0x7d   : > { %2807 = vmatpush3.bf16.msra.mxu1 %v2996_v6  ;;  %v363_v37 = vld [vmem:[#allocation2 + $0xc] sm:$0x1]  ;;  %v3012_v38 = vld [vmem:[#allocation9 + $0x30] sm:$0xff]   ;;  %v338_v40 = vsel %vm3541_vm3, 0, %v337_v31  ;;  %v2640_v47 = vld [vmem:[%s3529_s7 + $0x8] sm:$0xff]   ;;  %s3213_s13 = sshll.u32 %s3319_s12, 4  ;;  %s3214_s13 = int_to_ptr.vmem [resolvable:$false] %s3213_s13 }
  0x7e   : > { %2808 = vmatprep.subr.bf16.mxu1 %v2999_v9  ;;  %2651 = vmatpush3.bf16.msra.mxu0 %v3000_v10  ;;  %v3013_v39 = vld [vmem:[#allocation9 + $0x78] sm:$0xff]   ;;  %v364_v41 = vsel %vm3547_vm4, 0, %v363_v37  ;;  %v276_v42 = vsub.f32 %v2606_v33, %v3552_v35  ;;  %339 = vst [vmem:[#allocation2 + $0x8] sm:$0x1] %v338_v40  ;;  %v277_v45 = vsub.f32 %v2607_v34, %v3552_v35  ;;  %v2610_v50 = vunpack.c.l.bf16 %v2640_v47  ;;  %v343_v53 = vld [vmem:[#allocation2 + $0x18] sm:$0x1]  ;;  %vm3600_vm6 = vmand %vm499_vm5, %vm361_vm1  ;;  %p3211_p5 = pnand %p3210_p8, %p3934_p4  ;;  %p3216_p2 = scmp.lt.s32.totalorder %s3826_s23, %s3214_s13 }
  0x7f   : > { %2652 = vmatprep.subr.bf16.mxu0 %v3001_v11  ;;  %365 = vst [vmem:[#allocation2 + $0xc] sm:$0x1] %v364_v41  ;;  %v3019_v46 = vld [vmem:[#allocation9 + $0x38] sm:$0xff]   ;;  %v2611_v51 = vunpack.c.h.bf16 %v2640_v47  ;;  %v3024_v54 = vld [vmem:[#allocation9 + $0x100] sm:$0xff]   ;;  %v344_v57 = vsel %vm3541_vm3, 0, %v343_v53  ;;  %v3078_v30 = vld [vmem:[#allocation9 + $0x190] sm:$0xff]  }
  0x80   : > { %v288_v48 = vmul.f32 %v3554_v36, %v276_v42  ;;  %v340_v52 = vld [vmem:[#allocation2 + $0x10] sm:$0x1]  ;;  %v289_v55 = vmul.f32 %v3554_v36, %v277_v45  ;;  %v366_v58 = vld [vmem:[#allocation2 + $0x14] sm:$0x1]  ;;  %v369_v59 = vld [vmem:[#allocation2 + $0x1c] sm:$0x1]  ;;  %v278_v61 = vsub.f32 %v2610_v50, %v3552_v35  ;;  %p3212_p10 = pneg %p3211_p5 }
  0x81   : > { %2809 = vmatpush3.bf16.msra.mxu1 %v2999_v9  ;;  %v341_v56 = vsel %vm3541_vm3, 0, %v340_v52  ;;  %345 = vst [vmem:[#allocation2 + $0x18] sm:$0x1] %v344_v57  ;;  %v367_v62 = vsel %vm3547_vm4, 0, %v366_v58  ;;  %v370_v63 = vsel %vm3547_vm4, 0, %v369_v59  ;;  %v279_v1 = vsub.f32 %v2611_v51, %v3552_v35  ;;  %s3215_s8 = scalar_lea.vmem %s3214_s13, 1024 }
  0x82   : > { %2810 = vmatprep.subr.bf16.mxu1 %v3002_v13  ;;  %2653 = vmatpush3.bf16.msra.mxu0 %v3003_v14  ;;  %v300_v60 = vmul.f32 %v3561_v43, %v288_v48  ;;  %342 = vst [vmem:[#allocation2 + $0x10] sm:$0x1] %v341_v56  ;;  %v301_v0 = vmul.f32 %v3561_v43, %v289_v55  ;;  %368 = vst [vmem:[#allocation2 + $0x14] sm:$0x1] %v367_v62  ;;  %v3590_v11 = vld [vmem:[#allocation2] sm:$0xf]  ;;  %p3217_p0 = scmp.lt.s32.totalorder %s3215_s8, %s3209_s10 }
  0x83   : > { %2654 = vmatprep.subr.bf16.mxu0 %v3004_v15  ;;  %371 = vst [vmem:[#allocation2 + $0x1c] sm:$0x1] %v370_v63  ;;  %v290_v3 = vmul.f32 %v3554_v36, %v278_v61  ;;  %v291_v5 = vmul.f32 %v3554_v36, %v279_v1  ;;  %v3592_v12 = vld [vmem:[#allocation2 + $0x4] sm:$0x1]  ;;  %v346_v56 = vld [vmem:[#allocation2 + $0x20] sm:$0x1] }
  0x84   : > { %v312_v2 = vadd.f32 %v3568_v49, %v300_v60  ;;  %v313_v4 = vadd.f32 %v3568_v49, %v301_v0  ;;  %v347_v60 = vsel %vm3541_vm3, 0, %v346_v56  ;;  %v349_v61 = vld [vmem:[#allocation2 + $0x28] sm:$0x1]  ;;  %v372_v62 = vld [vmem:[#allocation2 + $0x24] sm:$0x1]  ;;  %p3218_p9 = por %p3217_p0, %p3216_p2 }
  0x85   : > { %2811 = vmatpush3.bf16.msra.mxu1 %v3002_v13  ;;  %v302_v7 = vmul.f32 %v3561_v43, %v290_v3  ;;  %v303_v14 = vmul.f32 %v3561_v43, %v291_v5  ;;  %348 = vst [vmem:[#allocation2 + $0x20] sm:$0x1] %v347_v60  ;;  %v350_v63 = vsel %vm3541_vm3, 0, %v349_v61  ;;  %v373_v0 = vsel %vm3547_vm4, 0, %v372_v62  ;;  %v375_v1 = vld [vmem:[#allocation2 + $0x2c] sm:$0x1] }
  0x86   : > { %2812 = vmatprep.subr.bf16.mxu1 %v3005_v18  ;;  %2655 = vmatpush3.bf16.msra.mxu0 %v3006_v19  ;;  %v320_v6 = vmax.f32 %v312_v2, 0.0  ;;  %v321_v8 = vmax.f32 %v313_v4, 0.0  ;;  %v501_v19 = vld [vmem:[#allocation2 + $0x8] sm:$0xf]  ;;  %351 = vst [vmem:[#allocation2 + $0x28] sm:$0x1] %v350_v63  ;;  %p3219_p6 = pnand %p3218_p9, %p3212_p10 }
  0x87   : > { %2656 = vmatprep.subr.bf16.mxu0 %v3007_v20  ;;  %v314_v10 = vadd.f32 %v3568_v49, %v302_v7  ;;  %v504_v20 = vld [vmem:[#allocation2 + $0xc] sm:$0x1]  ;;  %374 = vst [vmem:[#allocation2 + $0x24] sm:$0x1] %v373_v0  ;;  %v376_v7 = vsel %vm3547_vm4, 0, %v375_v1 }
  0x88   : > { %v2587_v9 = vpack.c.bf16 %v320_v6, %v320_v6  ;;  %v2588_v13 = vpack.c.bf16 %v321_v8, %v321_v8  ;;  %v513_v41 = vld [vmem:[#allocation2 + $0x18] sm:$0xf]  ;;  %377 = vst [vmem:[#allocation2 + $0x2c] sm:$0x1] %v376_v7  ;;  %v352_v61 = vld [vmem:[#allocation2 + $0x30] sm:$0x1] }
  0x89   : > { %2813 = vmatpush3.bf16.msra.mxu1 %v3005_v18  ;;  %v322_v18 = vmax.f32 %v314_v10, 0.0  ;;  %v507_v28 = vld [vmem:[#allocation2 + $0x10] sm:$0xf]  ;;  %v510_v29 = vld [vmem:[#allocation2 + $0x14] sm:$0x1] }
  0x8a   : > { %2814 = vmatprep.subr.bf16.mxu1 %v3008_v23  ;;  %2657 = vmatpush3.bf16.msra.mxu0 %v3009_v25  ;;  %v420_v15 = vshrl.u32 %v2587_v9, 16  ;;  %v423_v16 = vshll.u32 %v2587_v9, 16  ;;  %v428_v21 = vshrl.u32 %v2588_v13, 16  ;;  %v565_v25 = vld [vmem:[#allocation2] sm:$0xe] }
  0x8b   : > { %2658 = vmatprep.subr.bf16.mxu0 %v3010_v26  ;;  %v3597_v26 = vcombine.low %v3590_v11, %v3592_v12  ;;  %v2589_v27 = vpack.c.bf16 %v322_v18, %v322_v18  ;;  %v516_v42 = vld [vmem:[#allocation2 + $0x1c] sm:$0x1]  ;;  %v2423_v51 = vcombine.low %v565_v25, %v3592_v12 }
  0x8c   : > { %v422_v24 = vrot.slane %v420_v15, 7  ;;  %v430_v31 = vrot.slane %v428_v21, 7 }
  0x8d   : > { %2815 = vmatpush3.bf16.msra.mxu1 %v3008_v23  ;;  %v431_v23 = vshll.u32 %v2588_v13, 16  ;;  %v436_v37 = vshrl.u32 %v2589_v27, 16  ;;  %v614_v45 = vshrl.u32 %v3597_v26, 16  ;;  %v616_v50 = vshll.u32 %v3597_v26, 16 }
  0x8e   : > { %2816 = vmatprep.subr.bf16.mxu1 %v3011_v32  ;;  %2659 = vmatpush3.bf16.msra.mxu0 %v3012_v38  ;;  %v425_v33 = vor.u32 %v423_v16, %v422_v24  ;;  %v426_v34 = vrot.slane %v422_v24, 4  ;;  %v439_v38 = vshll.u32 %v2589_v27, 16  ;;  %v434_v40 = vrot.slane %v430_v31, 4 }
  0x8f   : > { %2660 = vmatprep.subr.bf16.mxu0 %v3013_v39  ;;  %v433_v39 = vor.u32 %v431_v23, %v430_v31  ;;  %v438_v48 = vrot.slane %v436_v37, 7  ;;  %v618_v8 = vrot.slane %v616_v50, 1  ;;  %v519_v37 = vld [vmem:[#allocation2 + $0x20] sm:$0xf] }
  0x90   : > { %v505_v47 = vsel %vm3541_vm3, %v426_v34, %v504_v20  ;;  %v511_v53 = vsel %vm3541_vm3, %v434_v40, %v510_v29 }
  0x91   : > { %2817 = vmatpush3.bf16.msra.mxu1 %v3011_v32  ;;  %v315_v32 = vadd.f32 %v3568_v49, %v303_v14  ;;  %506 = vst [vmem:[#allocation2 + $0xc] sm:$0x1] %v505_v47  ;;  %v508_v52 = vsel %vm3600_vm6, %v433_v39, %v507_v28  ;;  %v441_v57 = vor.u32 %v439_v38, %v438_v48  ;;  %v442_v58 = vrot.slane %v438_v48, 4 }
  0x92   : > { %2826 = vmatprep.subr.bf16.mxu1 %v3563_v44  ;;  %2661 = vmatpush3.bf16.msra.mxu0 %v3019_v46  ;;  %v502_v46 = vsel %vm3600_vm6, %v425_v33, %v501_v19  ;;  %509 = vst [vmem:[#allocation2 + $0x10] sm:$0xf] %v508_v52  ;;  %512 = vst [vmem:[#allocation2 + $0x14] sm:$0x1] %v511_v53  ;;  %v693_v14 = vrot.slane %v2423_v51, 1  ;;  %v619_v28 = vor.u32 %v618_v8, %v614_v45 }
  0x93   : > { %2698 = vmatprep.subr.bf16.mxu0 %v3024_v54  ;;  %503 = vst [vmem:[#allocation2 + $0x8] sm:$0xf] %v502_v46  ;;  %v2641_v54 = vld [vmem:[%s3529_s7 + $0x10] sm:$0xff]   ;;  %v323_v55 = vmax.f32 %v315_v32, 0.0  ;;  %v514_v4 = vsel %vm3600_vm6, %v441_v57, %v513_v41  ;;  %v517_v5 = vsel %vm3541_vm3, %v442_v58, %v516_v42  ;;  %v2642_v46 = vld [vmem:[%s3529_s7 + $0x18] sm:$0xff]  }
  0x94   : > { %v2614_v59 = vunpack.c.l.bf16 %v2641_v54  ;;  %v2615_v3 = vunpack.c.h.bf16 %v2641_v54  ;;  %515 = vst [vmem:[#allocation2 + $0x18] sm:$0xf] %v514_v4  ;;  %518 = vst [vmem:[#allocation2 + $0x1c] sm:$0x1] %v517_v5  ;;  %v522_v42 = vld [vmem:[#allocation2 + $0x24] sm:$0x1]  ;;  %v2618_v52 = vunpack.c.l.bf16 %v2642_v46  ;;  %v2619_v62 = vunpack.c.h.bf16 %v2642_v46 }
  0x95   : > { %v2590_v2 = vpack.c.bf16 %v323_v55, %v323_v55  ;;  %v3025_v4 = vld [vmem:[#allocation9 + $0x148] sm:$0xff]   ;;  %v378_v8 = vld [vmem:[#allocation2 + $0x34] sm:$0x1] }
  0x96   : > { %v280_v6 = vsub.f32 %v2614_v59, %v3552_v35  ;;  %v281_v12 = vsub.f32 %v2615_v3, %v3552_v35 }
  0x97   : > { %v444_v9 = vshrl.u32 %v2590_v2, 16  ;;  %v447_v10 = vshll.u32 %v2590_v2, 16  ;;  %v355_v2 = vld [vmem:[#allocation2 + $0x38] sm:$0x1] }
  0x98   : > { %v292_v13 = vmul.f32 %v3554_v36, %v280_v6  ;;  %v558_v18 = vld [vmem:[#allocation2 + $0xc] sm:$0x1]  ;;  %v293_v21 = vmul.f32 %v3554_v36, %v281_v12  ;;  %v282_v6 = vsub.f32 %v2618_v52, %v3552_v35 }
  0x99   : > { %v446_v15 = vrot.slane %v444_v9, 7  ;;  %v3637_v25 = vld [vmem:[#allocation2 + $0x10] sm:$0xf]  ;;  %v559_v26 = vld [vmem:[#allocation2 + $0x14] sm:$0x1] }
  0x9a   : > { %v3632_v16 = vld [vmem:[#allocation2 + $0x8] sm:$0xf]  ;;  %v304_v20 = vmul.f32 %v3561_v43, %v292_v13  ;;  %v567_v27 = vld [vmem:[#allocation2 + $0x10] sm:$0xe]  ;;  %v2417_v31 = vcombine.low %v3637_v25, %v559_v26  ;;  %v305_v53 = vmul.f32 %v3561_v43, %v293_v21  ;;  %v381_v9 = vld [vmem:[#allocation2 + $0x3c] sm:$0x1] }
  0x9b   : > { %v566_v19 = vld [vmem:[#allocation2 + $0x8] sm:$0xe]  ;;  %v2416_v23 = vcombine.low %v3632_v16, %v558_v18  ;;  %v449_v29 = vor.u32 %v447_v10, %v446_v15  ;;  %v2425_v32 = vcombine.low %v567_v27, %v559_v26  ;;  %v450_v34 = vrot.slane %v446_v15, 4  ;;  %v3644_v47 = vld [vmem:[#allocation2 + $0x18] sm:$0xf]  ;;  %v3028_v21 = vld [vmem:[#allocation9 + $0x108] sm:$0xff]  }
  0x9c   : > { %v2424_v24 = vcombine.low %v566_v19, %v558_v18  ;;  %v316_v33 = vadd.f32 %v3568_v49, %v304_v20  ;;  %v560_v48 = vld [vmem:[#allocation2 + $0x1c] sm:$0x1]  ;;  %v568_v45 = vld [vmem:[#allocation2 + $0x18] sm:$0xe]  ;;  %v2431_v50 = vcombine.low %v3590_v11, %v3632_v16  ;;  %v628_v59 = vshrl.u32 %v2417_v31, 16 }
  0x9d   : > { %v621_v39 = vshrl.u32 %v2416_v23, 16  ;;  %v623_v40 = vshll.u32 %v2416_v23, 16  ;;  %v520_v41 = vsel %vm3600_vm6, %v449_v29, %v519_v37  ;;  %v523_v51 = vsel %vm3541_vm3, %v450_v34, %v522_v42  ;;  %v3027_v16 = vld [vmem:[#allocation9 + $0xc0] sm:$0xff]  }
  0x9e   : > { %v694_v38 = vrot.slane %v2424_v24, 1  ;;  %521 = vst [vmem:[#allocation2 + $0x20] sm:$0xf] %v520_v41  ;;  %v2418_v55 = vcombine.low %v3644_v47, %v560_v48  ;;  %v2426_v56 = vcombine.low %v568_v45, %v560_v48  ;;  %v695_v57 = vrot.slane %v2425_v32, 1  ;;  %524 = vst [vmem:[#allocation2 + $0x24] sm:$0x1] %v523_v51 }
  0x9f   : > { %v625_v58 = vrot.slane %v623_v40, 1  ;;  %v630_v60 = vshll.u32 %v2417_v31, 16  ;;  %v324_v1 = vmax.f32 %v316_v33, 0.0  ;;  %v317_v7 = vadd.f32 %v3568_v49, %v305_v53  ;;  %v3029_v31 = vld [vmem:[#allocation9 + $0x150] sm:$0xff]   ;;  %v528_v32 = vld [vmem:[#allocation2 + $0x2c] sm:$0x1] }
  0xa0   : > { %v2433_v54 = vcombine.low %v693_v14, %v694_v38  ;;  %v696_v11 = vrot.slane %v2426_v56, 1  ;;  %v635_v63 = vshrl.u32 %v2418_v55, 16  ;;  %v637_v0 = vshll.u32 %v2418_v55, 16  ;;  %v3031_v48 = vld [vmem:[#allocation9 + $0x110] sm:$0xff]   ;;  %v3032_v56 = vld [vmem:[#allocation9 + $0x158] sm:$0xff]  }
  0xa1   : > { %v626_v3 = vor.u32 %v625_v58, %v621_v39  ;;  %v632_v5 = vrot.slane %v630_v60, 1  ;;  %v2591_v13 = vpack.c.bf16 %v324_v1, %v324_v1  ;;  %v353_v14 = vsel %vm3541_vm3, 0, %v352_v61  ;;  %v3034_v60 = vld [vmem:[#allocation9 + $0xd0] sm:$0xff]   ;;  %v3035_v61 = vld [vmem:[#allocation9 + $0x118] sm:$0xff]  }
  0xa2   : > { %2818 = vmatprep.mubr.bf16.mxu1 %v2433_v54  ;;  %v2436_v10 = vcombine.low %v695_v57, %v696_v11  ;;  %v639_v12 = vrot.slane %v637_v0, 1  ;;  %v294_v19 = vmul.f32 %v3554_v36, %v282_v6  ;;  %v325_v20 = vmax.f32 %v317_v7, 0.0  ;;  %354 = vst [vmem:[#allocation2 + $0x30] sm:$0x1] %v353_v14  ;;  %v3036_v0 = vld [vmem:[#allocation9 + $0x160] sm:$0xff]  }
  0xa3   : > { %v2432_v15 = vcombine.low %v619_v28, %v626_v3  ;;  %v633_v18 = vor.u32 %v632_v5, %v628_v59  ;;  %v452_v24 = vshrl.u32 %v2591_v13, 16  ;;  %v455_v26 = vshll.u32 %v2591_v13, 16  ;;  %v525_v28 = vld [vmem:[#allocation2 + $0x28] sm:$0xf] }
  0xa4   : > { %2819 = vmatmul.mubr.bf16.vlgmr.msra.gmra.mrb[0].mxu1 %v2436_v10  ;;  %v640_v23 = vor.u32 %v639_v12, %v635_v63  ;;  %v283_v29 = vsub.f32 %v2619_v62, %v3552_v35  ;;  %v306_v34 = vmul.f32 %v3561_v43, %v294_v19  ;;  %v356_v37 = vsel %vm3541_vm3, 0, %v355_v2  ;;  %v3030_v35 = vld [vmem:[#allocation9 + $0xc8] sm:$0xff]   ;;  %v3687_v10 = vld [vmem:[#allocation2 + $0x10] sm:$0xf]  ;;  %v1079_v12 = vld [vmem:[#allocation2 + $0xc] sm:$0x1] }
  0xa5   : > { %v3657_v27 = vld [vmem:[#allocation2 + $0x20] sm:$0xf]  ;;  %2827 = vmatpush3.bf16.msra.mxu1 %v3563_v44  ;;  %965 = vmatprep.mubr.bf16.mxu0 %v2432_v15  ;;  %v561_v33 = vld [vmem:[#allocation2 + $0x24] sm:$0x1]  ;;  %v379_v38 = vsel %vm3547_vm4, 0, %v378_v8  ;;  %v382_v39 = vsel %vm3547_vm4, 0, %v381_v9  ;;  %v2592_v42 = vpack.c.bf16 %v325_v20, %v325_v20  ;;  %v2434_v57 = vcombine.low %v3637_v25, %v3644_v47 }
  0xa6   : > { %2828 = vmatprep.subr.bf16.mxu1 %v3025_v4  ;;  %966 = vmatmul.mubr.bf16.vlgmr.msra.gmra.mrb[0].mxu0 %v2431_v50  ;;  %v2435_v44 = vcombine.low %v633_v18, %v640_v23  ;;  %v454_v40 = vrot.slane %v452_v24, 7  ;;  %357 = vst [vmem:[#allocation2 + $0x38] sm:$0x1] %v356_v37  ;;  %380 = vst [vmem:[#allocation2 + $0x34] sm:$0x1] %v379_v38  ;;  %v318_v41 = vadd.f32 %v3568_v49, %v306_v34  ;;  %v3040_v9 = vld [vmem:[#allocation9 + $0x120] sm:$0xff]  }
  0xa7   : > { %383 = vst [vmem:[#allocation2 + $0x3c] sm:$0x1] %v382_v39  ;;  %2699 = vmatpush3.bf16.msra.mxu0 %v3027_v16  ;;  %v295_v46 = vmul.f32 %v3554_v36, %v283_v29  ;;  %v3671_v52 = vcombine.low %v3657_v27, %v561_v33  ;;  %v569_v50 = vld [vmem:[#allocation2 + $0x20] sm:$0xe]  ;;  %v460_v54 = vshrl.u32 %v2592_v42, 16  ;;  %v463_v55 = vshll.u32 %v2592_v42, 16 }
  0xa8   : > { %2700 = vmatprep.subr.bf16.mxu0 %v3028_v21  ;;  %973 = vmatprep.mubr.bf16.mxu0 %v2435_v44  ;;  %v457_v45 = vor.u32 %v455_v26, %v454_v40  ;;  %v458_v51 = vrot.slane %v454_v40, 4  ;;  %v326_v53 = vmax.f32 %v318_v41, 0.0  ;;  %v2427_v62 = vcombine.low %v569_v50, %v561_v33  ;;  %v3685_v8 = vld [vmem:[#allocation2 + $0x8] sm:$0xf]  ;;  %v3041_v16 = vld [vmem:[#allocation9 + $0x168] sm:$0xff]   ;;  %v3043_v23 = vld [vmem:[#allocation9 + $0xe0] sm:$0xff]  }
  0xa9   : > { %2829 = vmatpush3.bf16.msra.mxu1 %v3025_v4  ;;  %v307_v59 = vmul.f32 %v3561_v43, %v295_v46  ;;  %v462_v63 = vrot.slane %v460_v54, 7  ;;  %v642_v25 = vshrl.u32 %v3671_v52, 16  ;;  %v644_v47 = vshll.u32 %v3671_v52, 16  ;;  %v531_v1 = vld [vmem:[#allocation2 + $0x30] sm:$0xf]  ;;  %v3046_v34 = vld [vmem:[#allocation9 + $0x128] sm:$0xff]  }
  0xaa   : > { %2830 = vmatprep.subr.bf16.mxu1 %v3029_v31  ;;  %v526_v36 = vsel %vm3600_vm6, %v457_v45, %v525_v28  ;;  %v529_v58 = vsel %vm3541_vm3, %v458_v51, %v528_v32  ;;  %v2593_v11 = vpack.c.bf16 %v326_v53, %v326_v53  ;;  %v3037_v43 = vld [vmem:[#allocation9 + $0xd8] sm:$0xff]   ;;  %v3689_v13 = vrot.slane %v2427_v62, 1  ;;  %v1080_v19 = vld [vmem:[#allocation2 + $0x14] sm:$0x1]  ;;  %v1087_v20 = vld [vmem:[#allocation2 + $0x8] sm:$0xe] }
  0xab   : > { %2701 = vmatpush3.bf16.msra.mxu0 %v3030_v35  ;;  %527 = vst [vmem:[#allocation2 + $0x28] sm:$0xf] %v526_v36  ;;  %530 = vst [vmem:[#allocation2 + $0x2c] sm:$0x1] %v529_v58  ;;  %v3683_v2 = vadd.f32 %v3568_v49, %v307_v59  ;;  %v465_v3 = vor.u32 %v463_v55, %v462_v63  ;;  %v466_v4 = vrot.slane %v462_v63, 4  ;;  %v646_v21 = vrot.slane %v644_v47, 1 }
  0xac   : > { %2702 = vmatprep.subr.bf16.mxu0 %v3031_v48  ;;  %v468_v5 = vshrl.u32 %v2593_v11, 16  ;;  %v471_v6 = vshll.u32 %v2593_v11, 16  ;;  %v3698_v37 = vcombine.low %v3685_v8, %v1079_v12  ;;  %v3704_v44 = vcombine.low %v3687_v10, %v1080_v19  ;;  %v3047_v40 = vld [vmem:[#allocation9 + $0x170] sm:$0xff]   ;;  %v3708_v48 = vld [vmem:[#allocation2 + $0x1c] sm:$0x1] }
  0xad   : > { %2831 = vmatpush3.bf16.msra.mxu1 %v3029_v31  ;;  %v534_v7 = vld [vmem:[#allocation2 + $0x34] sm:$0x1]  ;;  %v532_v14 = vsel %vm3600_vm6, %v465_v3, %v531_v1  ;;  %v537_v18 = vld [vmem:[#allocation2 + $0x38] sm:$0xf]  ;;  %v1088_v31 = vld [vmem:[#allocation2 + $0x10] sm:$0xe]  ;;  %v2475_v42 = vcombine.low %v1087_v20, %v1079_v12  ;;  %v647_v59 = vor.u32 %v646_v21, %v642_v25 }
  0xae   : > { %2832 = vmatprep.subr.bf16.mxu1 %v3032_v56  ;;  %974 = vmatmul.mubr.bf16.gmra.mrb[4].mxu0 %v2434_v57  ;;  %v470_v49 = vrot.slane %v468_v5, 7  ;;  %v535_v15 = vsel %vm3541_vm3, %v466_v4, %v534_v7  ;;  %533 = vst [vmem:[#allocation2 + $0x30] sm:$0xf] %v532_v14  ;;  %v540_v29 = vld [vmem:[#allocation2 + $0x3c] sm:$0x1]  ;;  %v2476_v46 = vcombine.low %v1088_v31, %v1080_v19  ;;  %v3053_v57 = vld [vmem:[#allocation9 + $0x130] sm:$0xff]  }
  0xaf   : > { %2703 = vmatpush3.bf16.msra.mxu0 %v3034_v60  ;;  %536 = vst [vmem:[#allocation2 + $0x34] sm:$0x1] %v535_v15  ;;  %v1089_v45 = vld [vmem:[#allocation2 + $0x18] sm:$0xe]  ;;  %v3052_v54 = vld [vmem:[#allocation9 + $0xe8] sm:$0xff]   ;;  %v1136_v36 = vshrl.u32 %v3698_v37, 16 }
  0xb0   : > { %2704 = vmatprep.subr.bf16.mxu0 %v3035_v61  ;;  %v473_v24 = vor.u32 %v471_v6, %v470_v49  ;;  %v474_v26 = vrot.slane %v470_v49, 4  ;;  %v1082_v55 = vld [vmem:[#allocation2 + $0x24] sm:$0x1]  ;;  %v1138_v58 = vshll.u32 %v3698_v37, 16  ;;  %v1145_v63 = vshll.u32 %v3704_v44, 16  ;;  %v3054_v1 = vld [vmem:[#allocation9 + $0x178] sm:$0xff]  }
  0xb1   : > { %2833 = vmatpush3.bf16.msra.mxu1 %v3032_v56  ;;  %v1090_v56 = vld [vmem:[#allocation2 + $0x20] sm:$0xe]  ;;  %v3721_v3 = vrot.slane %v2476_v46, 1  ;;  %v3056_v4 = vld [vmem:[#allocation9 + $0xf0] sm:$0xff]   ;;  %v2477_v5 = vcombine.low %v1089_v45, %v3708_v48  ;;  %v3726_v49 = vld [vmem:[#allocation2 + $0x18] sm:$0xf] }
  0xb2   : > { %2834 = vmatprep.subr.bf16.mxu1 %v3036_v0  ;;  %v3695_v28 = vld [vmem:[#allocation2 + $0x28] sm:$0xf]  ;;  %v562_v32 = vld [vmem:[#allocation2 + $0x2c] sm:$0x1]  ;;  %v538_v35 = vsel %vm3600_vm6, %v473_v24, %v537_v18  ;;  %v541_v41 = vsel %vm3541_vm3, %v474_v26, %v540_v29  ;;  %v2478_v12 = vcombine.low %v1090_v56, %v1082_v55  ;;  %v1147_v19 = vrot.slane %v1145_v63, 1  ;;  %v3731_v24 = vld [vmem:[#allocation9 + $0x200] sm:$0xff]  }
  0xb3   : > { %v570_v33 = vld [vmem:[#allocation2 + $0x28] sm:$0xe]  ;;  %2705 = vmatpush3.bf16.msra.mxu0 %v3037_v43  ;;  %v2420_v38 = vcombine.low %v3695_v28, %v562_v32  ;;  %539 = vst [vmem:[#allocation2 + $0x38] sm:$0xf] %v538_v35  ;;  %542 = vst [vmem:[#allocation2 + $0x3c] sm:$0x1] %v541_v41  ;;  %v2437_v6 = vcombine.low %v3657_v27, %v3695_v28  ;;  %v2469_v20 = vcombine.low %v3726_v49, %v3708_v48 }
  0xb4   : > { %v2428_v39 = vcombine.low %v570_v33, %v562_v32  ;;  %2706 = vmatprep.subr.bf16.mxu0 %v3040_v9  ;;  %v3719_v43 = vrot.slane %v2475_v42, 1  ;;  %v3057_v9 = vld [vmem:[#allocation9 + $0x138] sm:$0xff]   ;;  %v3733_v26 = vld [vmem:[#allocation2 + $0x20] sm:$0xf]  ;;  %v1217_v37 = vrot.slane %v2477_v5, 1  ;;  %v1218_v42 = vrot.slane %v2478_v12, 1 }
  0xb5   : > { %2835 = vmatpush3.bf16.msra.mxu1 %v3036_v0  ;;  %v649_v51 = vshrl.u32 %v2420_v38, 16  ;;  %v651_v50 = vshll.u32 %v2420_v38, 16  ;;  %v3715_v62 = vld [vmem:[#allocation2 + $0x30] sm:$0xf]  ;;  %v2470_v33 = vcombine.low %v3733_v26, %v1082_v55  ;;  %v3067_v38 = vld [vmem:[#allocation9 + $0x1c0] sm:$0xff]   ;;  %v1150_v48 = vshrl.u32 %v2469_v20, 16 }
  0xb6   : > { %v698_v53 = vrot.slane %v2428_v39, 1  ;;  %2836 = vmatprep.subr.bf16.mxu1 %v3041_v16  ;;  %v563_v11 = vld [vmem:[#allocation2 + $0x34] sm:$0x1]  ;;  %v571_v0 = vld [vmem:[#allocation2 + $0x30] sm:$0xe]  ;;  %v1152_v39 = vshll.u32 %v2469_v20, 16 }
  0xb7   : > { %v653_v60 = vrot.slane %v651_v50, 1  ;;  %2707 = vmatpush3.bf16.msra.mxu0 %v3043_v23  ;;  %v2421_v47 = vcombine.low %v3715_v62, %v563_v11  ;;  %v2429_v25 = vcombine.low %v571_v0, %v563_v11  ;;  %v3064_v32 = vld [vmem:[#allocation9 + $0xf8] sm:$0xff]   ;;  %v1159_v45 = vshll.u32 %v2470_v33, 16  ;;  %v3068_v5 = vld [vmem:[#allocation9 + $0x208] sm:$0xff]   ;;  %v3069_v20 = vld [vmem:[#allocation9 + $0x180] sm:$0xff]  }
  0xb8   : > { %v2439_v61 = vcombine.low %v3689_v13, %v698_v53  ;;  %2708 = vmatprep.subr.bf16.mxu0 %v3046_v34  ;;  %v1140_v13 = vrot.slane %v1138_v58, 1  ;;  %v2485_v34 = vcombine.low %v3719_v43, %v3721_v3  ;;  %v1154_v55 = vrot.slane %v1152_v39, 1  ;;  %v3739_v58 = vld [vmem:[#allocation2 + $0x28] sm:$0xf] }
  0xb9   : > { %v654_v52 = vor.u32 %v653_v60, %v649_v51  ;;  %2837 = vmatpush3.bf16.msra.mxu1 %v3041_v16  ;;  %v658_v7 = vshll.u32 %v2421_v47, 16  ;;  %v1143_v16 = vshrl.u32 %v3704_v44, 16  ;;  %v699_v23 = vrot.slane %v2429_v25, 1  ;;  %v1083_v60 = vld [vmem:[#allocation2 + $0x2c] sm:$0x1] }
  0xba   : > { %2822 = vmatprep.mubr.bf16.mxu1 %v2439_v61  ;;  %2838 = vmatprep.subr.bf16.mxu1 %v3047_v40  ;;  %v556_v15 = vld [vmem:[#allocation2 + $0x38] sm:$0xf]  ;;  %v564_v21 = vld [vmem:[#allocation2 + $0x3c] sm:$0x1]  ;;  %v656_v27 = vshrl.u32 %v2421_v47, 16  ;;  %v1141_v46 = vor.u32 %v1140_v13, %v1136_v36  ;;  %v1161_v56 = vrot.slane %v1159_v45, 1  ;;  %v2471_v0 = vcombine.low %v3739_v58, %v1083_v60 }
  0xbb   : > { %v2438_v14 = vcombine.low %v647_v59, %v654_v52  ;;  %v572_v18 = vld [vmem:[#allocation2 + $0x38] sm:$0xe]  ;;  %2709 = vmatpush3.bf16.msra.mxu0 %v3052_v54  ;;  %v2422_v29 = vcombine.low %v556_v15, %v564_v21  ;;  %v660_v28 = vrot.slane %v658_v7, 1  ;;  %v1157_v54 = vshrl.u32 %v2470_v33, 16  ;;  %v3741_v59 = vld [vmem:[#allocation2 + $0x30] sm:$0xf] }
  0xbc   : > { %2710 = vmatprep.subr.bf16.mxu0 %v3053_v57  ;;  %v2430_v31 = vcombine.low %v572_v18, %v564_v21  ;;  %v2440_v36 = vcombine.low %v3715_v62, %v556_v15  ;;  %v1084_v61 = vld [vmem:[#allocation2 + $0x34] sm:$0x1]  ;;  %v2488_v43 = vcombine.low %v1217_v37, %v1218_v42  ;;  %v1155_v3 = vor.u32 %v1154_v55, %v1150_v48  ;;  %v1091_v52 = vld [vmem:[#allocation2 + $0x28] sm:$0xe]  ;;  %v1092_v25 = vld [vmem:[#allocation2 + $0x30] sm:$0xe] }
  0xbd   : > { %981 = vmatprep.mubr.bf16.mxu0 %v2438_v14  ;;  %2839 = vmatpush3.bf16.msra.mxu1 %v3047_v40  ;;  %v663_v44 = vshrl.u32 %v2422_v29, 16  ;;  %v665_v41 = vshll.u32 %v2422_v29, 16  ;;  %v1148_v40 = vor.u32 %v1147_v19, %v1143_v16  ;;  %v661_v50 = vor.u32 %v660_v28, %v656_v27  ;;  %v384_v13 = vld [vmem:[#allocation2 + $0x44] sm:$0x1]  ;;  %v3747_v14 = vld [vmem:[#allocation2 + $0x38] sm:$0xf] }
  0xbe   : > { %982 = vmatmul.mubr.bf16.gmra.mrb[8].mxu0 %v2437_v6  ;;  %2840 = vmatprep.subr.bf16.mxu1 %v3054_v1  ;;  %v700_v35 = vrot.slane %v2430_v31, 1  ;;  %v2472_v47 = vcombine.low %v3741_v59, %v1084_v61  ;;  %v1162_v6 = vor.u32 %v1161_v56, %v1157_v54  ;;  %v1166_v7 = vshll.u32 %v2471_v0, 16  ;;  %v3753_v19 = vld [vmem:[#allocation2 + $0x3c] sm:$0x1]  ;;  %v3071_v28 = vld [vmem:[#allocation9 + $0x210] sm:$0xff]  }
  0xbf   : > { %2711 = vmatpush3.bf16.msra.mxu0 %v3056_v4  ;;  %v667_v53 = vrot.slane %v665_v41, 1  ;;  %v2484_v63 = vcombine.low %v1141_v46, %v1148_v40  ;;  %v358_v4 = vld [vmem:[#allocation2 + $0x40] sm:$0x1]  ;;  %v2480_v12 = vcombine.low %v1092_v25, %v1084_v61  ;;  %v385_v18 = vsel %vm3547_vm4, 0, %v384_v13  ;;  %v3763_v46 = vld [vmem:[#allocation2 + $0x10] sm:$0xf] }
  0xc0   : > { %2712 = vmatprep.subr.bf16.mxu0 %v3057_v9  ;;  %v2442_v51 = vcombine.low %v699_v23, %v700_v35  ;;  %v2479_v9 = vcombine.low %v1091_v52, %v1083_v60  ;;  %v1173_v15 = vshll.u32 %v2472_v47, 16  ;;  %386 = vst [vmem:[#allocation2 + $0x44] sm:$0x1] %v385_v18  ;;  %v2483_v29 = vcombine.low %v3685_v8, %v3687_v10  ;;  %v3070_v31 = vld [vmem:[#allocation9 + $0x1c8] sm:$0xff]   ;;  %v3075_v10 = vld [vmem:[#allocation9 + $0x1d0] sm:$0xff]  }
  0xc1   : > { %2841 = vmatpush3.bf16.msra.mxu1 %v3054_v1  ;;  %v668_v57 = vor.u32 %v667_v53, %v663_v44  ;;  %v327_v1 = vmax.f32 %v3683_v2, 0.0  ;;  %v359_v2 = vsel %vm3541_vm3, 0, %v358_v4  ;;  %v1220_v23 = vrot.slane %v2480_v12, 1  ;;  %v3072_v44 = vld [vmem:[#allocation9 + $0x188] sm:$0xff]   ;;  %v3765_v53 = vld [vmem:[#allocation2 + $0x18] sm:$0xf] }
  0xc2   : > { %2850 = vmatprep.subr.bf16.mxu1 %v3731_v24  ;;  %2823 = vmatmul.mubr.bf16.gmra.mrb[4].mxu1 %v2442_v51  ;;  %v1219_v21 = vrot.slane %v2479_v9, 1  ;;  %360 = vst [vmem:[#allocation2 + $0x40] sm:$0x1] %v359_v2  ;;  %v2487_v22 = vcombine.low %v1155_v3, %v1162_v6  ;;  %v1164_v37 = vshrl.u32 %v2471_v0, 16  ;;  %v1171_v39 = vshrl.u32 %v2472_v47, 16  ;;  %v3080_v0 = vld [vmem:[#allocation9 + $0x220] sm:$0xff]  }
  0xc3   : > { %2713 = vmatpush3.bf16.msra.mxu0 %v3064_v32  ;;  %2842 = vmatprep.mubr.bf16.mxu1 %v2485_v34  ;;  %v2441_v11 = vcombine.low %v661_v50, %v668_v57  ;;  %v2594_v62 = vpack.c.bf16 %v327_v1, %v327_v1  ;;  %v3760_v34 = vcombine.low %v3747_v14, %v3753_v19  ;;  %v1175_v35 = vrot.slane %v1173_v15, 1  ;;  %v1093_v50 = vld [vmem:[#allocation2 + $0x38] sm:$0xe]  ;;  %v1619_v56 = vld [vmem:[#allocation2 + $0x14] sm:$0x1]  ;;  %v3079_v1 = vld [vmem:[#allocation9 + $0x1d8] sm:$0xff]  }
  0xc4   : > { %2750 = vmatprep.subr.bf16.mxu0 %v3067_v38  ;;  %v2491_v33 = vcombine.low %v1219_v21, %v1220_v23  ;;  %v1168_v38 = vrot.slane %v1166_v7, 1  ;;  %v1620_v57 = vld [vmem:[#allocation2 + $0x1c] sm:$0x1]  ;;  %v2486_v60 = vcombine.low %v3726_v49, %v3733_v26  ;;  %v1628_v61 = vld [vmem:[#allocation2 + $0x18] sm:$0xe]  ;;  %v3081_v3 = vld [vmem:[#allocation9 + $0x198] sm:$0xff]   ;;  %v2481_v49 = vcombine.low %v1093_v50, %v3753_v19 }
  0xc5   : > { %989 = vmatprep.mubr.bf16.mxu0 %v2441_v11  ;;  %v476_v16 = vshrl.u32 %v2594_v62, 16  ;;  %v479_v27 = vshll.u32 %v2594_v62, 16  ;;  %v1180_v42 = vshll.u32 %v3760_v34, 16  ;;  %v1176_v48 = vor.u32 %v1175_v35, %v1171_v39  ;;  %v3085_v52 = vld [vmem:[#allocation9 + $0x228] sm:$0xff]   ;;  %v3084_v26 = vld [vmem:[#allocation9 + $0x1e0] sm:$0xff]  }
  0xc6   : > { %990 = vmatmul.mubr.bf16.gmra.mrb[12].mxu0 %v2440_v36  ;;  %v1169_v40 = vor.u32 %v1168_v38, %v1164_v37  ;;  %v1627_v36 = vld [vmem:[#allocation2 + $0x10] sm:$0xe]  ;;  %v2519_v11 = vcombine.low %v3763_v46, %v1619_v56  ;;  %v2528_v47 = vcombine.low %v1628_v61, %v1620_v57  ;;  %v1178_v25 = vshrl.u32 %v3760_v34, 16  ;;  %v3777_v62 = vld [vmem:[#allocation2 + $0x24] sm:$0x1] }
  0xc7   : > { %1488 = vmatprep.mubr.bf16.mxu0 %v2484_v63  ;;  %v478_v32 = vrot.slane %v476_v16, 7  ;;  %v546_v51 = vld [vmem:[#allocation2 + $0x44] sm:$0x1]  ;;  %v2520_v63 = vcombine.low %v3765_v53, %v1620_v57  ;;  %v2527_v17 = vcombine.low %v1627_v36, %v1619_v56  ;;  %v1182_v4 = vrot.slane %v1180_v42, 1  ;;  %v1622_v12 = vld [vmem:[#allocation2 + $0x2c] sm:$0x1] }
  0xc8   : > { %v1756_v9 = vrot.slane %v2528_v47, 1  ;;  %v1629_v13 = vld [vmem:[#allocation2 + $0x20] sm:$0xe]  ;;  %v1630_v15 = vld [vmem:[#allocation2 + $0x28] sm:$0xe]  ;;  %v1676_v2 = vshrl.u32 %v2519_v11, 16 }
  0xc9   : > { %v481_v41 = vor.u32 %v479_v27, %v478_v32  ;;  %v482_v8 = vrot.slane %v478_v32, 4  ;;  %v543_v45 = vld [vmem:[#allocation2 + $0x40] sm:$0xf]  ;;  %v1685_v6 = vshll.u32 %v2520_v63, 16  ;;  %v1755_v7 = vrot.slane %v2527_v17, 1  ;;  %v3095_v34 = vld [vmem:[#allocation9 + $0x230] sm:$0xff]  }
  0xca   : > { %2843 = vmatmul.mubr.bf16.vlgmr.msra.gmra.mrb[0].mxu1 %v2488_v43  ;;  %v2490_v43 = vcombine.low %v1169_v40, %v1176_v48  ;;  %v1683_v16 = vshrl.u32 %v2520_v63, 16  ;;  %v2489_v27 = vcombine.low %v3739_v58, %v3741_v59  ;;  %v1221_v32 = vrot.slane %v2481_v49, 1  ;;  %v1624_v39 = vld [vmem:[#allocation2 + $0x3c] sm:$0x1]  ;;  %v1632_v35 = vld [vmem:[#allocation2 + $0x38] sm:$0xe] }
  0xcb   : > { %2851 = vmatpush3.bf16.msra.mxu1 %v3731_v24  ;;  %2846 = vmatprep.mubr.bf16.mxu1 %v2491_v33  ;;  %v3076_v24 = vld [vmem:[#allocation9 + $0x218] sm:$0xff]   ;;  %v544_v54 = vsel %vm3600_vm6, %v481_v41, %v543_v45  ;;  %v547_v55 = vsel %vm3541_vm3, %v482_v8, %v546_v51  ;;  %v1687_v19 = vrot.slane %v1685_v6, 1  ;;  %v1183_v37 = vor.u32 %v1182_v4, %v1178_v25  ;;  %v3094_v41 = vld [vmem:[#allocation9 + $0x1e8] sm:$0xff]   ;;  %v3791_v56 = vld [vmem:[#allocation2 + $0x28] sm:$0xf] }
  0xcc   : > { %2852 = vmatprep.subr.bf16.mxu1 %v3068_v5  ;;  %545 = vst [vmem:[#allocation2 + $0x40] sm:$0xf] %v544_v54  ;;  %548 = vst [vmem:[#allocation2 + $0x44] sm:$0x1] %v547_v55  ;;  %v1631_v33 = vld [vmem:[#allocation2 + $0x30] sm:$0xe]  ;;  %v2529_v38 = vcombine.low %v1629_v13, %v3777_v62  ;;  %v2530_v59 = vcombine.low %v1630_v15, %v1622_v12  ;;  %v2532_v55 = vcombine.low %v1632_v35, %v1624_v39 }
  0xcd   : > { %v1688_v42 = vor.u32 %v1687_v19, %v1683_v16  ;;  %v3785_v40 = vld [vmem:[#allocation2 + $0x30] sm:$0xf]  ;;  %v3787_v45 = vld [vmem:[#allocation2 + $0x20] sm:$0xf]  ;;  %v3789_v54 = vld [vmem:[#allocation2 + $0x38] sm:$0xf]  ;;  %v2522_v61 = vcombine.low %v3791_v56, %v1622_v12 }
  0xce   : > { %1489 = vmatmul.mubr.bf16.vlgmr.msra.gmra.mrb[16].mxu0 %v2483_v29  ;;  %v3087_v29 = vld [vmem:[#allocation9 + $0x1a0] sm:$0xff]   ;;  %v2521_v57 = vcombine.low %v3787_v45, %v3777_v62  ;;  %v3096_v36 = vld [vmem:[#allocation9 + $0x1a8] sm:$0xff]   ;;  %v3097_v63 = vld [vmem:[#allocation9 + $0x1f0] sm:$0xff]   ;;  %v1760_v62 = vrot.slane %v2532_v55, 1 }
  0xcf   : > { %2853 = vmatpush3.bf16.msra.mxu1 %v3068_v5  ;;  %2751 = vmatpush3.bf16.msra.mxu0 %v3069_v20  ;;  %v1678_v5 = vshll.u32 %v2519_v11, 16  ;;  %v1699_v49 = vshll.u32 %v2522_v61, 16  ;;  %v1634_v6 = vld [vmem:[#allocation2 + $0x48] sm:$0xe]  ;;  %v1697_v12 = vshrl.u32 %v2522_v61, 16  ;;  %v3106_v15 = vld [vmem:[#allocation9 + $0x1f8] sm:$0xff]  }
  0xd0   : > { %2854 = vmatprep.subr.bf16.mxu1 %v3071_v28  ;;  %2752 = vmatprep.subr.bf16.mxu0 %v3070_v31  ;;  %v1692_v17 = vshll.u32 %v2521_v57, 16  ;;  %v3109_v19 = vld [vmem:[#allocation9 + $0x1b8] sm:$0xff]  }
  0xd1   : > { %1496 = vmatprep.mubr.bf16.mxu0 %v2487_v22  ;;  %v1680_v18 = vrot.slane %v1678_v5, 1  ;;  %v1623_v22 = vld [vmem:[#allocation2 + $0x34] sm:$0x1]  ;;  %v1701_v13 = vrot.slane %v1699_v49, 1 }
  0xd2   : > { %v2531_v48 = vcombine.low %v1631_v33, %v1623_v22  ;;  %v2535_v33 = vcombine.low %v3763_v46, %v3765_v53  ;;  %v2538_v46 = vcombine.low %v3787_v45, %v3791_v56 }
  0xd3   : > { %2855 = vmatpush3.bf16.msra.mxu1 %v3071_v28  ;;  %2753 = vmatpush3.bf16.msra.mxu0 %v3072_v44  ;;  %v3779_v20 = vld [vmem:[#allocation2 + $0x40] sm:$0xf]  ;;  %v1086_v21 = vld [vmem:[#allocation2 + $0x44] sm:$0x1] }
  0xd4   : > { %2856 = vmatprep.subr.bf16.mxu1 %v3076_v24  ;;  %2754 = vmatprep.subr.bf16.mxu0 %v3075_v10  ;;  %v1094_v23 = vld [vmem:[#allocation2 + $0x40] sm:$0xe]  ;;  %v2474_v31 = vcombine.low %v3779_v20, %v1086_v21  ;;  %v2537_v10 = vcombine.low %v1755_v7, %v1756_v9  ;;  %v2492_v47 = vcombine.low %v3747_v14, %v3779_v20  ;;  %v1759_v4 = vrot.slane %v2531_v48, 1  ;;  %v3100_v7 = vld [vmem:[#allocation9 + $0x1b0] sm:$0xff]  }
  0xd5   : > { %v2482_v28 = vcombine.low %v1094_v23, %v1086_v21  ;;  %v1633_v5 = vld [vmem:[#allocation2 + $0x40] sm:$0xe]  ;;  %v1690_v9 = vshrl.u32 %v2521_v57, 16  ;;  %v1694_v14 = vrot.slane %v1692_v17, 1  ;;  %v1618_v23 = vld [vmem:[#allocation2 + $0x48] sm:$0xf] }
  0xd6   : > { %1497 = vmatmul.mubr.bf16.gmra.mrb[20].mxu0 %v2486_v60  ;;  %v1185_v8 = vshrl.u32 %v2474_v31, 16  ;;  %v1187_v58 = vshll.u32 %v2474_v31, 16  ;;  %v3098_v60 = vld [vmem:[#allocation9 + $0x238] sm:$0xff]   ;;  %v2543_v20 = vcombine.low %v1759_v4, %v1760_v62  ;;  %v1617_v21 = vld [vmem:[#allocation2 + $0x40] sm:$0xf] }
  0xd7   : > { %2857 = vmatpush3.bf16.msra.mxu1 %v3076_v24  ;;  %2755 = vmatpush3.bf16.msra.mxu0 %v3078_v30  ;;  %v1222_v44 = vrot.slane %v2482_v28, 1  ;;  %v1681_v24 = vor.u32 %v1680_v18, %v1676_v2  ;;  %v1757_v30 = vrot.slane %v2529_v38, 1  ;;  %v2544_v61 = vcombine.low %v1617_v21, %v1618_v23 }
  0xd8   : > { %2858 = vmatprep.subr.bf16.mxu1 %v3080_v0  ;;  %2756 = vmatprep.subr.bf16.mxu0 %v3079_v1  ;;  %v1189_v50 = vrot.slane %v1187_v58, 1  ;;  %v2523_v1 = vcombine.low %v3785_v40, %v1623_v22 }
  0xd9   : > { %1504 = vmatprep.mubr.bf16.mxu0 %v2490_v43  ;;  %v2494_v51 = vcombine.low %v1221_v32, %v1222_v44  ;;  %v2524_v43 = vcombine.low %v3789_v54, %v1624_v39  ;;  %v2536_v25 = vcombine.low %v1681_v24, %v1688_v42 }
  0xda   : > { %v1190_v11 = vor.u32 %v1189_v50, %v1185_v8  ;;  %v1706_v31 = vshll.u32 %v2523_v1, 16  ;;  %v1704_v38 = vshrl.u32 %v2523_v1, 16 }
  0xdb   : > { %2859 = vmatpush3.bf16.msra.mxu1 %v3080_v0  ;;  %2757 = vmatpush3.bf16.msra.mxu0 %v3081_v3  ;;  %v1758_v0 = vrot.slane %v2530_v59, 1  ;;  %v1625_v3 = vld [vmem:[#allocation2 + $0x44] sm:$0x1]  ;;  %v1713_v28 = vshll.u32 %v2524_v43, 16  ;;  %v1711_v44 = vshrl.u32 %v2524_v43, 16 }
  0xdc   : > { %2860 = vmatprep.subr.bf16.mxu1 %v3085_v52  ;;  %2758 = vmatprep.subr.bf16.mxu0 %v3084_v26  ;;  %v2493_v26 = vcombine.low %v1183_v37, %v1190_v11  ;;  %v2533_v18 = vcombine.low %v1633_v5, %v1625_v3  ;;  %v1708_v35 = vrot.slane %v1706_v31, 1 }
  0xdd   : > { %2847 = vmatmul.mubr.bf16.gmra.mrb[4].mxu1 %v2494_v51  ;;  %v2540_v2 = vcombine.low %v1757_v30, %v1758_v0 }
  0xde   : > { %1505 = vmatmul.mubr.bf16.gmra.mrb[24].mxu0 %v2489_v27  ;;  %2866 = vmatprep.mubr.bf16.mxu1 %v2537_v10  ;;  %v1695_v27 = vor.u32 %v1694_v14, %v1690_v9  ;;  %v1761_v32 = vrot.slane %v2533_v18, 1  ;;  %v1709_v58 = vor.u32 %v1708_v35, %v1704_v38 }
  0xdf   : > { %2861 = vmatpush3.bf16.msra.mxu1 %v3085_v52  ;;  %2759 = vmatpush3.bf16.msra.mxu0 %v3087_v29  ;;  %v1626_v52 = vld [vmem:[#allocation2 + $0x4c] sm:$0x1]  ;;  %v1702_v29 = vor.u32 %v1701_v13, %v1697_v12 }
  0xe0   : > { %2862 = vmatprep.subr.bf16.mxu1 %v3095_v34  ;;  %2760 = vmatprep.subr.bf16.mxu0 %v3094_v41  ;;  %v2534_v16 = vcombine.low %v1634_v6, %v1626_v52  ;;  %v2526_v37 = vcombine.low %v1618_v23, %v1626_v52  ;;  %v1715_v41 = vrot.slane %v1713_v28, 1 }
  0xe1   : > { %1512 = vmatprep.mubr.bf16.mxu0 %v2493_v26  ;;  %v2539_v39 = vcombine.low %v1695_v27, %v1702_v29 }
  0xe2   : > { %v1762_v22 = vrot.slane %v2534_v16, 1  ;;  %v1716_v59 = vor.u32 %v1715_v41, %v1711_v44  ;;  %v1727_v24 = vshll.u32 %v2526_v37, 16  ;;  %v1725_v51 = vshrl.u32 %v2526_v37, 16 }
  0xe3   : > { %2863 = vmatpush3.bf16.msra.mxu1 %v3095_v34  ;;  %2761 = vmatpush3.bf16.msra.mxu0 %v3096_v36  ;;  %v2525_v34 = vcombine.low %v1617_v21, %v1625_v3  ;;  %v2541_v36 = vcombine.low %v3785_v40, %v3789_v54 }
  0xe4   : > { %2864 = vmatprep.subr.bf16.mxu1 %v3098_v60  ;;  %2762 = vmatprep.subr.bf16.mxu0 %v3097_v63  ;;  %v2546_v8 = vcombine.low %v1761_v32, %v1762_v22  ;;  %v2542_v42 = vcombine.low %v1709_v58, %v1716_v59  ;;  %v1729_v50 = vrot.slane %v1727_v24, 1 }
  0xe5   : > { %v1720_v10 = vshll.u32 %v2525_v34, 16  ;;  %v1718_v53 = vshrl.u32 %v2525_v34, 16 }
  0xe6   : > { %1513 = vmatmul.mubr.bf16.gmra.mrb[28].mxu0 %v2492_v47  ;;  %v1730_v57 = vor.u32 %v1729_v50, %v1725_v51 }
  0xe7   : > { %2865 = vmatpush3.bf16.msra.mxu1 %v3098_v60  ;;  %2763 = vmatpush3.bf16.msra.mxu0 %v3100_v7  ;;  %v1722_v48 = vrot.slane %v1720_v10, 1 }
  0xe8   : > { %2028 = vmatprep.mubr.bf16.mxu0 %v2536_v25  ;;  %2764 = vmatprep.subr.bf16.mxu0 %v3106_v15 }
  0xe9   : > { %v1723_v55 = vor.u32 %v1722_v48, %v1718_v53 }
  0xea   : > { %2867 = vmatmul.mubr.bf16.vlgmr.msra.gmra.mrb[0].mxu1 %v2540_v2 }
  0xeb   : > { %2870 = vmatprep.mubr.bf16.mxu1 %v2543_v20  ;;  %2765 = vmatpush3.bf16.msra.mxu0 %v3109_v19  ;;  %v2545_v60 = vcombine.low %v1723_v55, %v1730_v57 }
  0xee   : > { %2029 = vmatmul.mubr.bf16.vlgmr.msra.gmra.mrb[32].mxu0 %v2535_v33 }
  0xef   : > { %2036 = vmatprep.mubr.bf16.mxu0 %v2539_v39 }
  0xf2   : > { %2871 = vmatmul.mubr.bf16.gmra.mrb[4].mxu1 %v2546_v8 }
  0xf6   : > { %2037 = vmatmul.mubr.bf16.gmra.mrb[36].mxu0 %v2538_v46 }
  0xf7   : > { %2044 = vmatprep.mubr.bf16.mxu0 %v2542_v42 }
  0xfe   : > { %2045 = vmatmul.mubr.bf16.gmra.mrb[40].mxu0 %v2541_v36 }
  0xff   : > { %2052 = vmatprep.mubr.bf16.mxu0 %v2545_v60 }
 0x106   : > { %2053 = vmatmul.mubr.bf16.gmra.mrb[44].mxu0 %v2544_v61 }
 0x179   : > { %v2662_v11 = vpop.f32.mrb[0].mxu0 }
 0x17a   : > { %v2663_v63 = vpop.f32.mrb[1].mxu0 }
 0x17b   : > { %v2664_v45 = vadd.f32 %v2663_v63, %v2662_v11  ;;  %v2665_v56 = vpop.f32.mrb[2].mxu0 }
 0x17c   : > { %v2666_v30 = vpop.f32.mrb[3].mxu0 }
 0x17d   : > { %v2667_v0 = vadd.f32 %v2666_v30, %v2665_v56 }
 0x181   : > { %v2668_v17 = vpop.f32.mrb[4].mxu0 }
 0x182   : > { %v2669_v47 = vpop.f32.mrb[5].mxu0 }
 0x183   : > { %v2670_v1 = vadd.f32 %v2669_v47, %v2668_v17  ;;  %v2671_v43 = vpop.f32.mrb[6].mxu0 }
 0x184   : > { %v2672_v3 = vpop.f32.mrb[7].mxu0 }
 0x185   : > { %v2673_v52 = vadd.f32 %v2672_v3, %v2671_v43 }
 0x191   : > { %v2674_v49 = vpop.f32.mrb[8].mxu0 }
 0x192   : > { %v2675_v26 = vpop.f32.mrb[9].mxu0 }
 0x193   : > { %v2676_v40 = vadd.f32 %v2675_v26, %v2674_v49  ;;  %v2677_v54 = vpop.f32.mrb[10].mxu0 }
 0x194   : > { %v2678_v25 = vpop.f32.mrb[11].mxu0 }
 0x195   : > { %v2679_v4 = vadd.f32 %v2678_v25, %v2677_v54 }
 0x199   : > { %v2680_v62 = vpop.f32.mrb[12].mxu0 }
 0x19a   : > { %v2681_v5 = vpop.f32.mrb[13].mxu0 }
 0x19b   : > { %v2682_v6 = vadd.f32 %v2681_v5, %v2680_v62  ;;  %v2683_v7 = vpop.f32.mrb[14].mxu0 }
 0x19c   : > { %v2684_v9 = vpop.f32.mrb[15].mxu0 }
 0x19d   : > { %v2685_v14 = vadd.f32 %v2684_v9, %v2683_v7 }
 0x1a1   : > { %v2714_v12 = vpop.f32.mrb[16].mxu0 }
 0x1a2   : > { %v2715_v13 = vpop.f32.mrb[17].mxu0 }
 0x1a3   : > { %v2716_v15 = vadd.f32 %v2715_v13, %v2714_v12  ;;  %v2717_v2 = vpop.f32.mrb[18].mxu0 }
 0x1a4   : > { %v2718_v18 = vpop.f32.mrb[19].mxu0 }
 0x1a5   : > { %v2877_v16 = vadd.f32 %v2716_v15, %v2664_v45  ;;  %v2719_v19 = vadd.f32 %v2718_v18, %v2717_v2 }
 0x1a7   : > { %v2883_v20 = vadd.f32 %v2719_v19, %v2667_v0 }
 0x1a9   : > { %v2720_v21 = vpop.f32.mrb[20].mxu0 }
 0x1aa   : > { %v2721_v23 = vpop.f32.mrb[21].mxu0 }
 0x1ab   : > { %v2722_v27 = vadd.f32 %v2721_v23, %v2720_v21  ;;  %v2723_v29 = vpop.f32.mrb[22].mxu0 }
 0x1ac   : > { %v2724_v31 = vpop.f32.mrb[23].mxu0 }
 0x1ad   : > { %v2874_v28 = vadd.f32 %v2722_v27, %v2670_v1  ;;  %v2725_v32 = vadd.f32 %v2724_v31, %v2723_v29 }
 0x1af   : > { %v2880_v22 = vadd.f32 %v2725_v32, %v2673_v52 }
 0x1b1   : > { %v2726_v33 = vpop.f32.mrb[24].mxu0 }
 0x1b2   : > { %v2727_v34 = vpop.f32.mrb[25].mxu0 }
 0x1b3   : > { %v2728_v37 = vadd.f32 %v2727_v34, %v2726_v33  ;;  %v2729_v38 = vpop.f32.mrb[26].mxu0 }
 0x1b4   : > { %v2730_v39 = vpop.f32.mrb[27].mxu0 }
 0x1b5   : > { %v2889_v35 = vadd.f32 %v2728_v37, %v2676_v40  ;;  %v2731_v44 = vadd.f32 %v2730_v39, %v2729_v38 }
 0x1b7   : > { %v2895_v41 = vadd.f32 %v2731_v44, %v2679_v4 }
 0x1b9   : > { %v2732_v8 = vpop.f32.mrb[28].mxu0 }
 0x1ba   : > { %v2733_v58 = vpop.f32.mrb[29].mxu0 }
 0x1bb   : > { %v2734_v59 = vadd.f32 %v2733_v58, %v2732_v8  ;;  %v2735_v10 = vpop.f32.mrb[30].mxu0 }
 0x1bc   : > { %v2736_v24 = vpop.f32.mrb[31].mxu0 }
 0x1bd   : > { %v2868_v46 = vpop.f32.mrb[0].mxu1  ;;  %v3806_v53 = vadd.f32 %v2734_v59, %v2682_v6  ;;  %v2737_v42 = vadd.f32 %v2736_v24, %v2735_v10 }
 0x1be   : > { %v2095_v48 = vpop.f32.mrb[1].mxu1 }
 0x1bf   : > { %v2869_v51 = vpop.f32.mrb[2].mxu1  ;;  %v3808_v50 = vadd.f32 %v2737_v42, %v2685_v14 }
 0x1c0   : > { %v2098_v55 = vpop.f32.mrb[3].mxu1 }
 0x1c1   : > { %v2766_v57 = vpop.f32.mrb[32].mxu0 }
 0x1c2   : > { %v2767_v36 = vpop.f32.mrb[33].mxu0 }
 0x1c3   : > { %v2768_v60 = vadd.f32 %v2767_v36, %v2766_v57  ;;  %v2769_v61 = vpop.f32.mrb[34].mxu0 }
 0x1c4   : > { %v2770_v11 = vpop.f32.mrb[35].mxu0 }
 0x1c5   : > { %v2872_v63 = vpop.f32.mrb[4].mxu1  ;;  %v2878_v45 = vadd.f32 %v2877_v16, %v2768_v60  ;;  %v2771_v56 = vadd.f32 %v2770_v11, %v2769_v61 }
 0x1c6   : > { %v2111_v30 = vpop.f32.mrb[5].mxu1 }
 0x1c7   : > { %v2873_v0 = vpop.f32.mrb[6].mxu1  ;;  %v2879_v17 = vadd.f32 %v2878_v45, %v2095_v48  ;;  %v2884_v47 = vadd.f32 %v2883_v20, %v2771_v56 }
 0x1c8   : > { %v2114_v1 = vpop.f32.mrb[7].mxu1 }
 0x1c9   : > { %v2885_v43 = vadd.f32 %v2884_v47, %v2098_v55  ;;  %v2772_v3 = vpop.f32.mrb[36].mxu0  ;;  %v2211_v52 = vmul.f32 %v2879_v17, %v2879_v17 }
 0x1ca   : > { %v2773_v49 = vpop.f32.mrb[37].mxu0 }
 0x1cb   : > { %v2623_v26 = vpack.c.bf16 %v2885_v43, %v2879_v17  ;;  %v2198_v40 = vadd.f32 %v2885_v43, %v2879_v17  ;;  %v2212_v54 = vmul.f32 %v2885_v43, %v2885_v43  ;;  %v2774_v25 = vadd.f32 %v2773_v49, %v2772_v3  ;;  %v2775_v4 = vpop.f32.mrb[38].mxu0 }
 0x1cc   : > { %v2776_v62 = vpop.f32.mrb[39].mxu0 }
 0x1cd   : > { %2624 = vst [vmem:[%s3812_s26] sm:$0xff] %v2623_v26   ;;  %v2219_v5 = vadd.f32 %v2212_v54, %v2211_v52  ;;  %v2875_v6 = vadd.f32 %v2874_v28, %v2774_v25  ;;  %v2777_v7 = vadd.f32 %v2776_v62, %v2775_v4 }
 0x1cf   : > { %v2876_v9 = vadd.f32 %v2875_v6, %v2868_v46  ;;  %v2881_v14 = vadd.f32 %v2880_v22, %v2777_v7 }
 0x1d1   : > { %v2199_v12 = vadd.f32 %v2876_v9, %v2198_v40  ;;  %v2213_v13 = vmul.f32 %v2876_v9, %v2876_v9  ;;  %v2882_v15 = vadd.f32 %v2881_v14, %v2869_v51  ;;  %v2778_v2 = vpop.f32.mrb[40].mxu0 }
 0x1d2   : > { %v2779_v18 = vpop.f32.mrb[41].mxu0 }
 0x1d3   : > { %v2220_v16 = vadd.f32 %v2219_v5, %v2213_v13  ;;  %v2628_v19 = vpack.c.bf16 %v2882_v15, %v2876_v9  ;;  %v2200_v20 = vadd.f32 %v2882_v15, %v2199_v12  ;;  %v2214_v21 = vmul.f32 %v2882_v15, %v2882_v15  ;;  %v2781_v23 = vpop.f32.mrb[42].mxu0 }
 0x1d4   : > { %v2780_v27 = vadd.f32 %v2779_v18, %v2778_v2  ;;  %v2782_v29 = vpop.f32.mrb[43].mxu0 }
 0x1d5   : > { %2643 = vst [vmem:[%s3812_s26 + $0x8] sm:$0xff] %v2628_v19   ;;  %v2221_v31 = vadd.f32 %v2220_v16, %v2214_v21  ;;  %v2783_v32 = vadd.f32 %v2782_v29, %v2781_v23 }
 0x1d6   : > { %v2890_v28 = vadd.f32 %v2889_v35, %v2780_v27 }
 0x1d7   : > { %v2896_v33 = vadd.f32 %v2895_v41, %v2783_v32 }
 0x1d8   : > { %v2891_v34 = vadd.f32 %v2890_v28, %v2111_v30 }
 0x1d9   : > { %v2897_v22 = vadd.f32 %v2896_v33, %v2114_v1  ;;  %v2784_v37 = vpop.f32.mrb[44].mxu0 }
 0x1da   : > { %v2201_v38 = vadd.f32 %v2891_v34, %v2200_v20  ;;  %v2215_v39 = vmul.f32 %v2891_v34, %v2891_v34  ;;  %v2785_v44 = vpop.f32.mrb[45].mxu0 }
 0x1db   : > { %v2633_v8 = vpack.c.bf16 %v2897_v22, %v2891_v34  ;;  %v2216_v58 = vmul.f32 %v2897_v22, %v2897_v22  ;;  %v2786_v59 = vadd.f32 %v2785_v44, %v2784_v37  ;;  %v2787_v10 = vpop.f32.mrb[46].mxu0 }
 0x1dc   : > { %v2222_v24 = vadd.f32 %v2221_v31, %v2215_v39  ;;  %v2202_v46 = vadd.f32 %v2897_v22, %v2201_v38  ;;  %v2788_v42 = vpop.f32.mrb[47].mxu0 }
 0x1dd   : > { %2644 = vst [vmem:[%s3812_s26 + $0x10] sm:$0xff] %v2633_v8   ;;  %v2887_v48 = vadd.f32 %v3806_v53, %v2786_v59  ;;  %v2789_v35 = vadd.f32 %v2788_v42, %v2787_v10 }
 0x1de   : > { %v2223_v41 = vadd.f32 %v2222_v24, %v2216_v58 }
 0x1df   : > { %v2888_v51 = vadd.f32 %v2887_v48, %v2872_v63  ;;  %v2893_v55 = vadd.f32 %v3808_v50, %v2789_v35 }
 0x1e1   : > { %v2203_v57 = vadd.f32 %v2888_v51, %v2202_v46  ;;  %v2217_v36 = vmul.f32 %v2888_v51, %v2888_v51  ;;  %v2894_v60 = vadd.f32 %v2893_v55, %v2873_v0 }
 0x1e3   : > { %v2224_v53 = vadd.f32 %v2223_v41, %v2217_v36  ;;  %v2638_v61 = vpack.c.bf16 %v2894_v60, %v2888_v51  ;;  %v2204_v11 = vadd.f32 %v2894_v60, %v2203_v57  ;;  %v2218_v50 = vmul.f32 %v2894_v60, %v2894_v60 }
 0x1e5   : > { %2645 = vst [vmem:[%s3812_s26 + $0x18] sm:$0xff] %v2638_v61   ;;  %v2205_v63 = vrot.slane %v2204_v11, 4  ;;  %v2225_v45 = vadd.f32 %v2224_v53, %v2218_v50 }
 0x1e6   : > { %3222 = shalt.err (!%p3219_p6)
}
 0x1e7   : > { %s3223_s11 = scalar_lea.hbm %s3824_s6, 512  ;;  %s3227_s9 = scalar_lea.hbm %s3906_s3, 1024 }
 0x1e8   : > { %p3224_p12 = scmp.ne.s32.totalorder %s3824_s6, %s3223_s11  ;;  %p3228_p11 = scmp.lt.u32.totalorder %s3824_s6, %s3906_s3 }
 0x1e9   : > { %p3229_p7 = scmp.lt.u32.totalorder %s3227_s9, %s3223_s11  ;;  %p3231_p8 = scmp.lt.u32.totalorder %s3223_s11, %s3824_s6 }
 0x1ea   : > { %p3225_p13 = pnand %p3224_p12, %p3934_p4 }
 0x1eb   : > { %p3230_p3 = por %p3229_p7, %p3228_p11 }
 0x1ec   : > { %p3226_p1 = pneg %p3225_p13 }
 0x1ed   : > { %p3232_p5 = por %p3231_p8, %p3230_p3 }
 0x1ef   : > { %p3233_p10 = pnand %p3232_p5, %p3226_p1 }
 0x1f1   : > { %3236 = shalt.err (!%p3233_p10)
}
 0x1f2   : > { %s3320_s26 = smov 64   ;;  %s3321_s29 = smov 4   ;;  %v2206_v56 = vadd.f32 %v2205_v63, %v2204_v11  ;;  %v2226_v30 = vrot.slane %v2225_v45, 4  ;;  %vm2234_vm7 = vcmask 1041408  }
 0x1f3   : > { %2924 = dma.vmem_to_hbm [thread:$0]  (%p3934_p4), %s3826_s23, 512, %s3824_s6, %s2238_s5, %s3320_s26, %s3320_s26, %s3321_s29  }
 0x1f4   : > { %v2207_v0 = vrot.slane %v2206_v56, 2  ;;  %v2227_v17 = vadd.f32 %v2226_v30, %v2225_v45  ;;  %s2406_s25 = sshll.u32 %s3523_s1, 3  ;;  %s2583_s20 = sshll.u32 %s3369_s19, 7 }
 0x1f5   : > { %s253_s10 = scalar_lea.vmem [#allocation11], %s2406_s25  ;;  %s3859_s5 = scalar_lea.hbm %s3907_s4, %s2583_s20 }
 0x1f6   : > { %v2208_v47 = vadd.f32 %v2207_v0, %v2206_v56  ;;  %v2228_v1 = vrot.slane %v2227_v17, 2  ;;  %s2272_s12 = sshll.u32 %s253_s10, 4  ;;  %s2243_s19 = scalar_lea.sflag [#allocation12], %s3523_s1  ;;  %s3861_s12 = int_to_ptr.vmem [resolvable:$true] %s2272_s12 }
 0x1f7   : > { %s3237_s13 = scalar_lea.vmem %s3861_s12, 128  ;;  %s3322_s8 = smov [#allocation11]  }
 0x1f8   : > { %v2209_v43 = vrot.slane %v2208_v47, 1  ;;  %v2229_v3 = vadd.f32 %v2228_v1, %v2227_v17  ;;  %p3238_p2 = scmp.ne.s32.totalorder %s3861_s12, %s3237_s13  ;;  %s3241_s11 = sshll.u32 %s3322_s8, 4  ;;  %s3242_s11 = int_to_ptr.vmem [resolvable:$false] %s3241_s11 }
 0x1f9   : > { %s3243_s14 = scalar_lea.vmem %s3242_s11, 256  ;;  %p3244_p6 = scmp.lt.s32.totalorder %s3861_s12, %s3242_s11 }
 0x1fa   : > { %v2230_v52 = vrot.slane %v2229_v3, 1  ;;  %v2210_v49 = vadd.f32 %v2209_v43, %v2208_v47  ;;  %p3239_p0 = pnand %p3238_p2, %p3934_p4  ;;  %p3245_p12 = scmp.lt.s32.totalorder %s3243_s14, %s3237_s13 }
 0x1fc   : > { %v2231_v26 = vadd.f32 %v2230_v52, %v2229_v3  ;;  %p3240_p9 = pneg %p3239_p0  ;;  %p3246_p13 = por %p3245_p12, %p3244_p6 }
 0x1fe   : > { %v2233_v40 = vsel %vm334_vm2, %v2210_v49, %v2231_v26  ;;  %p3247_p1 = pnand %p3246_p13, %p3240_p9 }
 0x1ff   : > { %v2235_v54 = vsel %vm2234_vm7, %v2233_v40, 0.0 }
 0x200   : > { %2236 = vst [vmem:[%s253_s10] sm:$0xff] %v2235_v54 }
 0x201   : > { %3250 = shalt.err (!%p3247_p1)
}
 0x202   : > { %s3251_s1 = scalar_lea.hbm %s3859_s5, 128  ;;  %s3255_s30 = scalar_lea.hbm %s3907_s4, 256 }
 0x203   : > { %p3252_p11 = scmp.ne.s32.totalorder %s3859_s5, %s3251_s1  ;;  %p3256_p8 = scmp.lt.u32.totalorder %s3859_s5, %s3907_s4 }
 0x204   : > { %p3257_p5 = scmp.lt.u32.totalorder %s3255_s30, %s3251_s1  ;;  %p3259_p2 = scmp.lt.u32.totalorder %s3251_s1, %s3859_s5 }
 0x205   : > { %p3253_p7 = pnand %p3252_p11, %p3934_p4 }
 0x206   : > { %p3258_p10 = por %p3257_p5, %p3256_p8 }
 0x207   : > { %p3254_p3 = pneg %p3253_p7 }
 0x208   : > { %p3260_p0 = por %p3259_p2, %p3258_p10 }
 0x20a   : > { %p3261_p9 = pnand %p3260_p0, %p3254_p3 }
 0x20c   : > { %3264 = shalt.err (!%p3261_p9)
}
 0x20d   : > { %2925 = dma.vmem_to_hbm [thread:$0]  (%p3934_p4), %s3861_s12, 128, %s3859_s5, %s2243_s19  }
 0x20e PF: > { %s2284_s29 = sand.u32 1, %s3299_s15   ;;  %p3935_p6 = scmp.ne.s32.totalorder %s3917_s28, 0 }
 0x20f   : > { %p3936_p12 = scmp.ge.s32.totalorder %s3311_s18, 2  ;;  %s2285_s25 = scalar_lea.sflag [#allocation6], %s2284_s29 }
 0x211   : > { %p2940_p13 = pnand %p3936_p12, %p3935_p6 }
 0x213   : > { %3290 = dma.done.wait (!%p2940_p13), %s2285_s25, 512  }
 0x214   : > { %3292 = vsyncadd (!%p2940_p13), %s2285_s25, 4294966784  ;;  %s2294_s20 = scalar_lea.sflag [#allocation12], %s2284_s29 }
 0x215   : > { %3294 = dma.done.wait (!%p2940_p13), %s2294_s20, 128  }
 0x216   : > { %3296 = vsyncadd (!%p2940_p13), %s2294_s20, 4294967168  ;;  %p22_p4 = scmp.ge.s32.totalorder %s3373_s21, 4   ;;  %s3937_s15 = smov %s3303_s16 }
 0x217   : > { %s3938_s16 = smov %s3307_s17  ;;  %s3939_s17 = smov %s3385_s24 }
 0x218   : > { %s3940_s18 = smov %s3373_s21  ;;  %24 = sbr.rel (!%p22_p4) target bundleno = 10 (0xa), region = 107 }
 0x21f   :  { %2299 = vsyncpa [#allocation5], 1 }
 0x220   :  { %2301 = vsyncpa [#allocation5 + $0x1], 1 }
 0x221   :  { %2302 = vsyncpa [#allocation8], 1 }
 0x222   :  { %2303 = vsyncpa [#allocation6], 1 }
 0x223   :  { %2305 = vsyncpa [#allocation6 + $0x1], 1 }
 0x224   :  { %2306 = vsyncpa [#allocation12], 1 }
 0x225   :  { %2308 = vsyncpa [#allocation12 + $0x1], 1 }

</bundles_post_ra>
